<compile_context>
chip_gen: v7x
topology: tpu7x:2x2x1
jax: 0.10.0
libtpu: 0.0.40
codegen_flags: <defaults>
</compile_context>

<pallas_src>
import numpy as np
import jax
import jax.numpy as jnp
from jax.experimental import pallas as pl
from jax.experimental.pallas import tpu as pltpu

# ---------------- sizes (small, consistent with the module) ----------------
B = 2          # batch
T = 8          # caption length
E = 32         # embed_size
H = 32         # hidden_size
VOCAB = 40     # vocab_size
K = 49         # number of spatial regions (affine_v/_g/_s project to 49)
ATT = 49       # attention feature dim fixed by affine_* layers
KP = 56        # K padded up to a multiple of 8 sublanes (per-batch slab)

PACK = 384     # lane-tile aligned packed output width
_S0 = 0        # scores at lane 0
_A0 = 128      # alpha at lane 128
_B0 = 256      # beta at lane 256


# ------------------------- fused decoder kernel ----------------------------
def decoder_kernel(x_ref, vflat_ref,
                   win_ref, whh_ref, b_ref,
                   wsh_ref,
                   wav_ref, wag_ref, was_ref, wah_ref,
                   wm_ref, bm_ref,
                   out_ref, states_ref,
                   hid_s, cell_s):
    f32 = jnp.float32
    bf16 = jnp.bfloat16

    # ---- LSTM: hoisted input projection (incl. sentinel x-term), unrolled loop ----
    x_flat = x_ref[...].reshape(B * T, 2 * E)                          # (16, 64)
    xw_all = jnp.dot(x_flat, win_ref[...],
                     preferred_element_type=f32)                       # (16, 4H + H)
    xwb = (xw_all[:, :4 * H] + b_ref[...]).reshape(B, T, 4 * H)        # (B, T, 4H)
    sxx = xw_all[:, 4 * H:]                                            # (16, H) sentinel x-term

    whh = whh_ref[...]                                                 # (H, 4H) bf16, hoisted
    h = jnp.zeros((B, H), f32)
    c = jnp.zeros((B, H), f32)
    for t in range(T):                         # static unroll, T = 8 (serial)
        gates = xwb[:, t, :] + jnp.dot(h.astype(bf16), whh,
                                       preferred_element_type=f32)     # (B, 4H)
        sg = jax.nn.sigmoid(gates)             # full-width (B, 128) EUP push
        tg = jnp.tanh(gates)                   # full-width (B, 128) EUP push
        c = sg[:, H:2 * H] * c + sg[:, 0:H] * tg[:, 2 * H:3 * H]
        h = sg[:, 3 * H:4 * H] * jnp.tanh(c)
        hid_s[:, t, :] = h
        cell_s[:, t, :] = c

    states_ref[0] = h                          # final hidden state (B, H)
    states_ref[1] = c                          # final cell state   (B, H)

    # ---------- Adaptive block: batched over B*T = 16 rows ----------
    h_flat = hid_s[...].reshape(B * T, H)                              # (16, H)
    c_flat = cell_s[...].reshape(B * T, H)                             # (16, H)

    # h_{t-1}: shift hiddens down by one step per batch, zero at t = 0
    # (built once here instead of 8 masked stores inside the serial loop).
    hp_parts = []
    for b in range(B):                         # static unroll, B = 2
        hp_parts.append(jnp.zeros((1, H), f32))
        hp_parts.append(h_flat[b * T:b * T + T - 1, :])
    hp_flat = jnp.concatenate(hp_parts, axis=0)                        # (16, H)

    # Sentinel: s_t = sigmoid(Wx x + Wh h_{t-1}) * tanh(c_t)
    gate = jax.nn.sigmoid(
        sxx + jnp.dot(hp_flat, wsh_ref[...], preferred_element_type=f32))
    s = gate * jnp.tanh(c_flat)                                        # (16, H)

    Gh = jnp.dot(h_flat, wag_ref[...], preferred_element_type=f32)     # (16, ATT)
    ah = wah_ref[...]                                                  # (1, ATT)
    ah3 = ah.reshape(1, 1, ATT)                                        # hoisted

    # Merged V projection: one (B*KP, H) @ (H, ATT) matmul for both batches.
    Vv_all = jnp.dot(vflat_ref[...], wav_ref[...],
                     preferred_element_type=f32)                       # (B*KP, ATT)

    # Spatial attention logits (broadcast tanh stays per-batch: (T,K,ATT)).
    z_parts = []
    for b in range(B):                         # static unroll, B = 2
        Vv_b = Vv_all[b * KP:b * KP + K, :]                            # (K, ATT)
        Gh_b = Gh[b * T:(b + 1) * T, :]                                # (T, ATT)
        cv = jnp.tanh(Vv_b[None, :, :] + Gh_b[:, None, :])             # (T, K, ATT)
        z_parts.append(jnp.sum(cv * ah3, axis=-1))                     # (T, K)
    z = jnp.concatenate(z_parts, axis=0)                               # (16, K)

    zmax = jnp.max(z, axis=-1, keepdims=True)                          # (16, 1)
    ez = jnp.exp(z - zmax)                                             # (16, K)
    sum_ez = jnp.sum(ez, axis=-1, keepdims=True)                       # (16, 1)
    alpha = ez / sum_ez                        # exact division (correctness review)

    ct_parts = []
    for b in range(B):                         # alpha @ V per batch
        V_b = vflat_ref[b * KP:b * KP + K, :]                          # (K, H)
        ct_parts.append(jnp.dot(alpha[b * T:(b + 1) * T, :], V_b,
                                preferred_element_type=f32))           # (T, H)
    c_t = jnp.concatenate(ct_parts, axis=0)                            # (16, H)

    # Sentinel-extended softmax -> beta (reuses ez / sum_ez, no re-exp of z)
    cs = jnp.tanh(jnp.dot(s, was_ref[...], preferred_element_type=f32) + Gh)
    z_ext = jnp.sum(cs * ah, axis=-1, keepdims=True)                   # (16, 1)
    m2 = jnp.maximum(zmax, z_ext)
    e_ext = jnp.exp(z_ext - m2)
    denom = sum_ez * jnp.exp(zmax - m2) + e_ext
    beta = e_ext / denom                       # exact division (correctness review)

    c_hat = beta * s + (1.0 - beta) * c_t
    scores = (jnp.dot(c_hat + h_flat, wm_ref[...], preferred_element_type=f32)
              + bm_ref[...])                                           # (16, VOCAB)

    # ---------- lane-tile aligned packed output slab (16, 384) ----------
    def pad128(a):
        return jnp.concatenate(
            [a, jnp.zeros((B * T, 128 - a.shape[1]), f32)], axis=1)

    out_ref[...] = jnp.concatenate(
        [pad128(scores), pad128(alpha), pad128(beta)], axis=1)         # one dense store


# -------------------------- JAX wrapper --------------------------
def _spec2(shape):
    return pl.BlockSpec(shape, lambda i: (0, 0))


def _spec3(shape):
    return pl.BlockSpec(shape, lambda i: (0, 0, 0))


def decoder_forward(V_feat, v_g, captions, p):
    emb = jnp.take(p["embed"], captions, axis=0)                       # (B, T, E)
    x = jnp.concatenate(
        [emb, jnp.broadcast_to(v_g[:, None, :], emb.shape)], axis=2)   # (B, T, 2E)

    # sentinel input projection folded into the hoisted input matmul
    w_in = jnp.concatenate([p["w_ih"].T, p["sx"].T], axis=1)           # (2E, 4H + H)
    whh_bf16 = p["w_hh"].T.astype(jnp.bfloat16)                        # (H, 4H) bf16
    bias = (p["b_ih"] + p["b_hh"])[None, :]                            # (1, 4H)

    # V zero-padded to KP rows per batch and flattened (8-sublane aligned slices)
    V_pad = jnp.pad(V_feat, ((0, 0), (0, KP - K), (0, 0)))             # (B, KP, H)
    V_flat = V_pad.reshape(B * KP, H)                                  # (112, H)

    packed, states = pl.pallas_call(
        decoder_kernel,
        out_shape=(jax.ShapeDtypeStruct((B * T, PACK), jnp.float32),
                   jax.ShapeDtypeStruct((2, B, H), jnp.float32)),
        grid_spec=pltpu.PrefetchScalarGridSpec(
            num_scalar_prefetch=0,
            grid=(1,),
            in_specs=[
                _spec3((B, T, 2 * E)),        # x
                _spec2((B * KP, H)),          # V (padded, flattened)
                _spec2((2 * E, 5 * H)),       # [W_ih^T | W_sx^T]
                _spec2((H, 4 * H)),           # W_hh^T (bf16)
                _spec2((1, 4 * H)),           # b_ih + b_hh
                _spec2((H, H)),               # sentinel affine_h^T
                _spec2((H, ATT)),             # atten affine_v^T
                _spec2((H, ATT)),             # atten affine_g^T
                _spec2((H, ATT)),             # atten affine_s^T
                _spec2((1, ATT)),             # atten affine_h (1, 49)
                _spec2((H, VOCAB)),           # mlp W^T
                _spec2((1, VOCAB)),           # mlp b
            ],
            out_specs=[
                _spec2((B * T, PACK)),        # packed scores|alpha|beta (aligned)
                _spec3((2, B, H)),            # final (h, c)
            ],
            scratch_shapes=[pltpu.VMEM((B, T, H), jnp.float32),   # hiddens
                            pltpu.VMEM((B, T, H), jnp.float32)],  # cells
        ),
        compiler_params=pltpu.CompilerParams(dimension_semantics=("arbitrary",)),
    )(x, V_flat,
      w_in, whh_bf16, bias,
      p["sh"].T,
      p["av"].T, p["ag"].T, p["as"].T, p["ah"],
      p["mlp_w"].T, p["mlp_b"][None, :])

    packed = packed.reshape(B, T, PACK)
    scores = packed[:, :, _S0:_S0 + VOCAB]
    alpha = packed[:, :, _A0:_A0 + K]
    beta = packed[:, :, _B0:_B0 + 1]
    states_out = (states[0:1], states[1:2])                            # (1, B, H) each
    return scores, states_out, alpha, beta


# ---------------- pure-JAX reference (for validation) ----------------
def reference_forward(V_feat, v_g, captions, p):
    emb = p["embed"][captions]
    x = jnp.concatenate([emb, jnp.broadcast_to(v_g[:, None, :], emb.shape)], axis=2)
    h = jnp.zeros((B, H), jnp.float32)
    c = jnp.zeros((B, H), jnp.float32)
    hs, cs = [], []
    for t in range(T):
        gates = x[:, t, :] @ p["w_ih"].T + h @ p["w_hh"].T + p["b_ih"] + p["b_hh"]
        i = jax.nn.sigmoid(gates[:, :H])
        f = jax.nn.sigmoid(gates[:, H:2 * H])
        g = jnp.tanh(gates[:, 2 * H:3 * H])
        o = jax.nn.sigmoid(gates[:, 3 * H:])
        c = f * c + i * g
        h = o * jnp.tanh(c)
        hs.append(h)
        cs.append(c)
    hiddens = jnp.stack(hs, axis=1)
    cells = jnp.stack(cs, axis=1)
    h_prev = jnp.concatenate([jnp.zeros((B, 1, H), jnp.float32),
                              hiddens[:, :-1, :]], axis=1)
    gate = jax.nn.sigmoid(x @ p["sx"].T + h_prev @ p["sh"].T)
    s = gate * jnp.tanh(cells)
    Vv = V_feat @ p["av"].T
    Gh = hiddens @ p["ag"].T
    cv = jnp.tanh(Vv[:, None, :, :] + Gh[:, :, None, :])
    z = jnp.einsum("btkf,f->btk", cv, p["ah"][0])
    alpha = jax.nn.softmax(z, axis=-1)
    c_t = jnp.einsum("btk,bkh->bth", alpha, V_feat)
    cs_ = jnp.tanh(s @ p["as"].T + Gh)
    z_ext = jnp.einsum("btf,f->bt", cs_, p["ah"][0])[..., None]
    extended = jnp.concatenate([z, z_ext], axis=-1)
    alpha_hat = jax.nn.softmax(extended, axis=-1)
    beta = alpha_hat[:, :, -1:]
    c_hat = beta * s + (1.0 - beta) * c_t
    scores = (c_hat + hiddens) @ p["mlp_w"].T + p["mlp_b"]
    return scores, alpha, beta, hiddens, cells


# ---------------- deterministic parameter init ----------------
def xavier(key, shape):
    fan_out, fan_in = shape
    bound = np.sqrt(6.0 / (fan_in + fan_out))
    return jax.random.uniform(key, shape, jnp.float32, -bound, bound)


def make_params(key):
    ks = jax.random.split(key, 16)
    return {
        "embed": jax.random.normal(ks[0], (VOCAB, E), jnp.float32) * 0.1,
        "w_ih": xavier(ks[1], (4 * H, 2 * E)),
        "w_hh": xavier(ks[2], (4 * H, H)),
        "b_ih": jax.random.normal(ks[3], (4 * H,), jnp.float32) * 0.05,
        "b_hh": jax.random.normal(ks[4], (4 * H,), jnp.float32) * 0.05,
        "sx": xavier(ks[5], (H, 2 * E)),       # Sentinel.affine_x
        "sh": xavier(ks[6], (H, H)),           # Sentinel.affine_h
        "av": xavier(ks[7], (ATT, H)),         # Atten.affine_v
        "ag": xavier(ks[8], (ATT, H)),         # Atten.affine_g
        "as": xavier(ks[9], (ATT, H)),         # Atten.affine_s
        "ah": xavier(ks[10], (1, ATT)),        # Atten.affine_h (49 -> 1)
        "mlp_w": jax.random.normal(ks[11], (VOCAB, H), jnp.float32) * np.sqrt(2.0 / H),
        "mlp_b": jnp.zeros((VOCAB,), jnp.float32),
    }


if __name__ == "__main__":
    key = jax.random.PRNGKey(0)
    kp, kV, kvg, kcap = jax.random.split(key, 4)
    params = make_params(kp)

    V_feat = jax.random.normal(kV, (B, K, H), jnp.float32)        # spatial features
    v_g = jax.random.normal(kvg, (B, E), jnp.float32)             # global feature
    captions = jax.random.randint(kcap, (B, T), 0, VOCAB, jnp.int32)

    scores, states, alpha, beta = decoder_forward(V_feat, v_g, captions, params)
    jax.block_until_ready((scores, states, alpha, beta))

    ref_scores, ref_alpha, ref_beta, ref_hid, ref_cell = reference_forward(
        V_feat, v_g, captions, params)

    # Approx-reciprocal softmax was removed (exact division now); the remaining
    # tolerance slack only covers bf16-operand rounding in the 8-step LSTM
    # recurrence (observed-level error << 1e-2 against the f32 reference).
    tol = dict(rtol=1e-2, atol=1e-2)
    np.testing.assert_allclose(np.asarray(scores), np.asarray(ref_scores), **tol)
    np.testing.assert_allclose(np.asarray(alpha), np.asarray(ref_alpha), **tol)
    np.testing.assert_allclose(np.asarray(beta), np.asarray(ref_beta), **tol)
    np.testing.assert_allclose(np.asarray(states[0][0]),
                               np.asarray(ref_hid[:, -1, :]), **tol)
    np.testing.assert_allclose(np.asarray(states[1][0]),
                               np.asarray(ref_cell[:, -1, :]), **tol)
    # exact-softmax sanity check (addresses the approx-reciprocal concern)
    np.testing.assert_allclose(np.asarray(alpha).sum(-1), 1.0, rtol=0, atol=1e-5)

    print("KERNEL_OK")
</pallas_src>

<mosaic_0001>
module attributes {stable_mosaic.version = 11 : i64} {
  func.func @decoder_kernel(%arg0: i32, %arg1: memref<2x8x64xf32, #tpu.memory_space<vmem>>, %arg2: memref<112x32xf32, #tpu.memory_space<vmem>>, %arg3: memref<64x160xf32, #tpu.memory_space<vmem>>, %arg4: memref<32x128xbf16, #tpu.memory_space<vmem>>, %arg5: memref<1x128xf32, #tpu.memory_space<vmem>>, %arg6: memref<32x32xf32, #tpu.memory_space<vmem>>, %arg7: memref<32x49xf32, #tpu.memory_space<vmem>>, %arg8: memref<32x49xf32, #tpu.memory_space<vmem>>, %arg9: memref<32x49xf32, #tpu.memory_space<vmem>>, %arg10: memref<1x49xf32, #tpu.memory_space<vmem>>, %arg11: memref<32x40xf32, #tpu.memory_space<vmem>>, %arg12: memref<1x40xf32, #tpu.memory_space<vmem>>, %arg13: memref<16x384xf32, #tpu.memory_space<vmem>>, %arg14: memref<2x2x32xf32, #tpu.memory_space<vmem>>, %arg15: memref<2x8x32xf32, #tpu.memory_space<vmem>>, %arg16: memref<2x8x32xf32, #tpu.memory_space<vmem>>) attributes {dimension_semantics = [#tpu.dimension_semantics<arbitrary>], iteration_bounds = array<i64: 1>, scalar_prefetch = 0 : i64, scratch_operands = 2 : i64, tpu.core_type = #tpu.core_type<tc>, window_params = [{pipeline_mode = #tpu.pipeline_mode<synchronous>, transform_indices = @transform_0, window_bounds = array<i64: 2, 8, 64>}, {pipeline_mode = #tpu.pipeline_mode<synchronous>, transform_indices = @transform_1, window_bounds = array<i64: 112, 32>}, {pipeline_mode = #tpu.pipeline_mode<synchronous>, transform_indices = @transform_2, window_bounds = array<i64: 64, 160>}, {pipeline_mode = #tpu.pipeline_mode<synchronous>, transform_indices = @transform_3, window_bounds = array<i64: 32, 128>}, {pipeline_mode = #tpu.pipeline_mode<synchronous>, transform_indices = @transform_4, window_bounds = array<i64: 1, 128>}, {pipeline_mode = #tpu.pipeline_mode<synchronous>, transform_indices = @transform_5, window_bounds = array<i64: 32, 32>}, {pipeline_mode = #tpu.pipeline_mode<synchronous>, transform_indices = @transform_6, window_bounds = array<i64: 32, 49>}, {pipeline_mode = #tpu.pipeline_mode<synchronous>, transform_indices = @transform_7, window_bounds = array<i64: 32, 49>}, {pipeline_mode = #tpu.pipeline_mode<synchronous>, transform_indices = @transform_8, window_bounds = array<i64: 32, 49>}, {pipeline_mode = #tpu.pipeline_mode<synchronous>, transform_indices = @transform_9, window_bounds = array<i64: 1, 49>}, {pipeline_mode = #tpu.pipeline_mode<synchronous>, transform_indices = @transform_10, window_bounds = array<i64: 32, 40>}, {pipeline_mode = #tpu.pipeline_mode<synchronous>, transform_indices = @transform_11, window_bounds = array<i64: 1, 40>}, {pipeline_mode = #tpu.pipeline_mode<synchronous>, transform_indices = @transform_12, window_bounds = array<i64: 16, 384>}, {pipeline_mode = #tpu.pipeline_mode<synchronous>, transform_indices = @transform_13, window_bounds = array<i64: 2, 2, 32>}]} {
    %c0 = arith.constant 0 : index
    %c0_0 = arith.constant 0 : index
    %c0_1 = arith.constant 0 : index
    %0 = vector.load %arg1[%c0, %c0_0, %c0_1] : memref<2x8x64xf32, #tpu.memory_space<vmem>>, vector<2x8x64xf32>
    %1 = vector.shape_cast %0 : vector<2x8x64xf32> to vector<16x64xf32>
    %c0_2 = arith.constant 0 : index
    %c0_3 = arith.constant 0 : index
    %2 = vector.load %arg3[%c0_2, %c0_3] : memref<64x160xf32, #tpu.memory_space<vmem>>, vector<64x160xf32>
    %cst = arith.constant dense<0.000000e+00> : vector<16x160xf32>
    %3 = tpu.matmul %1, %2, %cst {dimension_numbers = #tpu.dot_dimension_numbers<[1], [0], [0], [1], [0, 0, 1, 1], [], []>} : vector<16x64xf32>, vector<64x160xf32>, vector<16x160xf32> -> vector<16x160xf32>
    %4 = vector.extract_strided_slice %3 {offsets = [0, 0], sizes = [16, 128], strides = [1, 1]} : vector<16x160xf32> to vector<16x128xf32>
    %c0_4 = arith.constant 0 : index
    %c0_5 = arith.constant 0 : index
    %5 = vector.load %arg5[%c0_4, %c0_5] : memref<1x128xf32, #tpu.memory_space<vmem>>, vector<1x128xf32>
    %6 = vector.broadcast %5 : vector<1x128xf32> to vector<16x128xf32>
    %7 = arith.addf %4, %6 : vector<16x128xf32>
    %8 = vector.shape_cast %7 : vector<16x128xf32> to vector<2x8x128xf32>
    %9 = vector.extract_strided_slice %3 {offsets = [0, 128], sizes = [16, 32], strides = [1, 1]} : vector<16x160xf32> to vector<16x32xf32>
    %c0_6 = arith.constant 0 : index
    %c0_7 = arith.constant 0 : index
    %10 = vector.load %arg4[%c0_6, %c0_7] : memref<32x128xbf16, #tpu.memory_space<vmem>>, vector<32x128xbf16>
    %cst_8 = arith.constant 0.000000e+00 : f32
    %11 = vector.broadcast %cst_8 : f32 to vector<2x32xf32>
    %cst_9 = arith.constant 0.000000e+00 : f32
    %12 = vector.broadcast %cst_9 : f32 to vector<2x32xf32>
    %13 = vector.extract_strided_slice %8 {offsets = [0, 0, 0], sizes = [2, 1, 128], strides = [1, 1, 1]} : vector<2x8x128xf32> to vector<2x1x128xf32>
    %14 = vector.shape_cast %13 : vector<2x1x128xf32> to vector<2x128xf32>
    %15 = arith.truncf %11 : vector<2x32xf32> to vector<2x32xbf16>
    %cst_10 = arith.constant dense<0.000000e+00> : vector<2x128xf32>
    %16 = tpu.matmul %15, %10, %cst_10 {dimension_numbers = #tpu.dot_dimension_numbers<[1], [0], [0], [1], [0, 0, 1, 1], [], []>} : vector<2x32xbf16>, vector<32x128xbf16>, vector<2x128xf32> -> vector<2x128xf32>
    %17 = arith.addf %14, %16 : vector<2x128xf32>
    %18 = arith.negf %17 : vector<2x128xf32>
    %19 = math.exp %18 : vector<2x128xf32>
    %cst_11 = arith.constant 1.000000e+00 : f32
    %20 = vector.broadcast %cst_11 : f32 to vector<2x128xf32>
    %21 = arith.addf %20, %19 : vector<2x128xf32>
    %22 = arith.divf %20, %21 : vector<2x128xf32>
    %23 = math.tanh %17 : vector<2x128xf32>
    %24 = vector.extract_strided_slice %22 {offsets = [0, 32], sizes = [2, 32], strides = [1, 1]} : vector<2x128xf32> to vector<2x32xf32>
    %25 = arith.mulf %24, %12 : vector<2x32xf32>
    %26 = vector.extract_strided_slice %22 {offsets = [0, 0], sizes = [2, 32], strides = [1, 1]} : vector<2x128xf32> to vector<2x32xf32>
    %27 = vector.extract_strided_slice %23 {offsets = [0, 64], sizes = [2, 32], strides = [1, 1]} : vector<2x128xf32> to vector<2x32xf32>
    %28 = arith.mulf %26, %27 : vector<2x32xf32>
    %29 = arith.addf %25, %28 : vector<2x32xf32>
    %30 = vector.extract_strided_slice %22 {offsets = [0, 96], sizes = [2, 32], strides = [1, 1]} : vector<2x128xf32> to vector<2x32xf32>
    %31 = math.tanh %29 : vector<2x32xf32>
    %32 = arith.mulf %30, %31 : vector<2x32xf32>
    %c0_12 = arith.constant 0 : index
    %c0_13 = arith.constant 0 : index
    %c0_14 = arith.constant 0 : index
    %33 = vector.load %arg15[%c0_12, %c0_13, %c0_14] : memref<2x8x32xf32, #tpu.memory_space<vmem>>, vector<2x1x32xf32>
    %34 = vector.shape_cast %33 : vector<2x1x32xf32> to vector<2x32xf32>
    %35 = vector.shape_cast %32 : vector<2x32xf32> to vector<2x1x32xf32>
    tpu.vector_store %arg15[%c0_12, %c0_13, %c0_14], %35 {strides = array<i32>} : memref<2x8x32xf32, #tpu.memory_space<vmem>>, vector<2x1x32xf32>,
    %c0_15 = arith.constant 0 : index
    %c0_16 = arith.constant 0 : index
    %c0_17 = arith.constant 0 : index
    %36 = vector.load %arg16[%c0_15, %c0_16, %c0_17] : memref<2x8x32xf32, #tpu.memory_space<vmem>>, vector<2x1x32xf32>
    %37 = vector.shape_cast %36 : vector<2x1x32xf32> to vector<2x32xf32>
    %38 = vector.shape_cast %29 : vector<2x32xf32> to vector<2x1x32xf32>
    tpu.vector_store %arg16[%c0_15, %c0_16, %c0_17], %38 {strides = array<i32>} : memref<2x8x32xf32, #tpu.memory_space<vmem>>, vector<2x1x32xf32>,
    %39 = vector.extract_strided_slice %8 {offsets = [0, 1, 0], sizes = [2, 1, 128], strides = [1, 1, 1]} : vector<2x8x128xf32> to vector<2x1x128xf32>
    %40 = vector.shape_cast %39 : vector<2x1x128xf32> to vector<2x128xf32>
    %41 = arith.truncf %32 : vector<2x32xf32> to vector<2x32xbf16>
    %cst_18 = arith.constant dense<0.000000e+00> : vector<2x128xf32>
    %42 = tpu.matmul %41, %10, %cst_18 {dimension_numbers = #tpu.dot_dimension_numbers<[1], [0], [0], [1], [0, 0, 1, 1], [], []>} : vector<2x32xbf16>, vector<32x128xbf16>, vector<2x128xf32> -> vector<2x128xf32>
    %43 = arith.addf %40, %42 : vector<2x128xf32>
    %44 = arith.negf %43 : vector<2x128xf32>
    %45 = math.exp %44 : vector<2x128xf32>
    %cst_19 = arith.constant 1.000000e+00 : f32
    %46 = vector.broadcast %cst_19 : f32 to vector<2x128xf32>
    %47 = arith.addf %46, %45 : vector<2x128xf32>
    %48 = arith.divf %46, %47 : vector<2x128xf32>
    %49 = math.tanh %43 : vector<2x128xf32>
    %50 = vector.extract_strided_slice %48 {offsets = [0, 32], sizes = [2, 32], strides = [1, 1]} : vector<2x128xf32> to vector<2x32xf32>
    %51 = arith.mulf %50, %29 : vector<2x32xf32>
    %52 = vector.extract_strided_slice %48 {offsets = [0, 0], sizes = [2, 32], strides = [1, 1]} : vector<2x128xf32> to vector<2x32xf32>
    %53 = vector.extract_strided_slice %49 {offsets = [0, 64], sizes = [2, 32], strides = [1, 1]} : vector<2x128xf32> to vector<2x32xf32>
    %54 = arith.mulf %52, %53 : vector<2x32xf32>
    %55 = arith.addf %51, %54 : vector<2x32xf32>
    %56 = vector.extract_strided_slice %48 {offsets = [0, 96], sizes = [2, 32], strides = [1, 1]} : vector<2x128xf32> to vector<2x32xf32>
    %57 = math.tanh %55 : vector<2x32xf32>
    %58 = arith.mulf %56, %57 : vector<2x32xf32>
    %c0_20 = arith.constant 0 : index
    %c1 = arith.constant 1 : index
    %c0_21 = arith.constant 0 : index
    %59 = vector.load %arg15[%c0_20, %c1, %c0_21] : memref<2x8x32xf32, #tpu.memory_space<vmem>>, vector<2x1x32xf32>
    %60 = vector.shape_cast %59 : vector<2x1x32xf32> to vector<2x32xf32>
    %61 = vector.shape_cast %58 : vector<2x32xf32> to vector<2x1x32xf32>
    tpu.vector_store %arg15[%c0_20, %c1, %c0_21], %61 {strides = array<i32>} : memref<2x8x32xf32, #tpu.memory_space<vmem>>, vector<2x1x32xf32>,
    %c0_22 = arith.constant 0 : index
    %c1_23 = arith.constant 1 : index
    %c0_24 = arith.constant 0 : index
    %62 = vector.load %arg16[%c0_22, %c1_23, %c0_24] : memref<2x8x32xf32, #tpu.memory_space<vmem>>, vector<2x1x32xf32>
    %63 = vector.shape_cast %62 : vector<2x1x32xf32> to vector<2x32xf32>
    %64 = vector.shape_cast %55 : vector<2x32xf32> to vector<2x1x32xf32>
    tpu.vector_store %arg16[%c0_22, %c1_23, %c0_24], %64 {strides = array<i32>} : memref<2x8x32xf32, #tpu.memory_space<vmem>>, vector<2x1x32xf32>,
    %65 = vector.extract_strided_slice %8 {offsets = [0, 2, 0], sizes = [2, 1, 128], strides = [1, 1, 1]} : vector<2x8x128xf32> to vector<2x1x128xf32>
    %66 = vector.shape_cast %65 : vector<2x1x128xf32> to vector<2x128xf32>
    %67 = arith.truncf %58 : vector<2x32xf32> to vector<2x32xbf16>
    %cst_25 = arith.constant dense<0.000000e+00> : vector<2x128xf32>
    %68 = tpu.matmul %67, %10, %cst_25 {dimension_numbers = #tpu.dot_dimension_numbers<[1], [0], [0], [1], [0, 0, 1, 1], [], []>} : vector<2x32xbf16>, vector<32x128xbf16>, vector<2x128xf32> -> vector<2x128xf32>
    %69 = arith.addf %66, %68 : vector<2x128xf32>
    %70 = arith.negf %69 : vector<2x128xf32>
    %71 = math.exp %70 : vector<2x128xf32>
    %cst_26 = arith.constant 1.000000e+00 : f32
    %72 = vector.broadcast %cst_26 : f32 to vector<2x128xf32>
    %73 = arith.addf %72, %71 : vector<2x128xf32>
    %74 = arith.divf %72, %73 : vector<2x128xf32>
    %75 = math.tanh %69 : vector<2x128xf32>
    %76 = vector.extract_strided_slice %74 {offsets = [0, 32], sizes = [2, 32], strides = [1, 1]} : vector<2x128xf32> to vector<2x32xf32>
    %77 = arith.mulf %76, %55 : vector<2x32xf32>
    %78 = vector.extract_strided_slice %74 {offsets = [0, 0], sizes = [2, 32], strides = [1, 1]} : vector<2x128xf32> to vector<2x32xf32>
    %79 = vector.extract_strided_slice %75 {offsets = [0, 64], sizes = [2, 32], strides = [1, 1]} : vector<2x128xf32> to vector<2x32xf32>
    %80 = arith.mulf %78, %79 : vector<2x32xf32>
    %81 = arith.addf %77, %80 : vector<2x32xf32>
    %82 = vector.extract_strided_slice %74 {offsets = [0, 96], sizes = [2, 32], strides = [1, 1]} : vector<2x128xf32> to vector<2x32xf32>
    %83 = math.tanh %81 : vector<2x32xf32>
    %84 = arith.mulf %82, %83 : vector<2x32xf32>
    %c0_27 = arith.constant 0 : index
    %c2 = arith.constant 2 : index
    %c0_28 = arith.constant 0 : index
    %85 = vector.load %arg15[%c0_27, %c2, %c0_28] : memref<2x8x32xf32, #tpu.memory_space<vmem>>, vector<2x1x32xf32>
    %86 = vector.shape_cast %85 : vector<2x1x32xf32> to vector<2x32xf32>
    %87 = vector.shape_cast %84 : vector<2x32xf32> to vector<2x1x32xf32>
    tpu.vector_store %arg15[%c0_27, %c2, %c0_28], %87 {strides = array<i32>} : memref<2x8x32xf32, #tpu.memory_space<vmem>>, vector<2x1x32xf32>,
    %c0_29 = arith.constant 0 : index
    %c2_30 = arith.constant 2 : index
    %c0_31 = arith.constant 0 : index
    %88 = vector.load %arg16[%c0_29, %c2_30, %c0_31] : memref<2x8x32xf32, #tpu.memory_space<vmem>>, vector<2x1x32xf32>
    %89 = vector.shape_cast %88 : vector<2x1x32xf32> to vector<2x32xf32>
    %90 = vector.shape_cast %81 : vector<2x32xf32> to vector<2x1x32xf32>
    tpu.vector_store %arg16[%c0_29, %c2_30, %c0_31], %90 {strides = array<i32>} : memref<2x8x32xf32, #tpu.memory_space<vmem>>, vector<2x1x32xf32>,
    %91 = vector.extract_strided_slice %8 {offsets = [0, 3, 0], sizes = [2, 1, 128], strides = [1, 1, 1]} : vector<2x8x128xf32> to vector<2x1x128xf32>
    %92 = vector.shape_cast %91 : vector<2x1x128xf32> to vector<2x128xf32>
    %93 = arith.truncf %84 : vector<2x32xf32> to vector<2x32xbf16>
    %cst_32 = arith.constant dense<0.000000e+00> : vector<2x128xf32>
    %94 = tpu.matmul %93, %10, %cst_32 {dimension_numbers = #tpu.dot_dimension_numbers<[1], [0], [0], [1], [0, 0, 1, 1], [], []>} : vector<2x32xbf16>, vector<32x128xbf16>, vector<2x128xf32> -> vector<2x128xf32>
    %95 = arith.addf %92, %94 : vector<2x128xf32>
    %96 = arith.negf %95 : vector<2x128xf32>
    %97 = math.exp %96 : vector<2x128xf32>
    %cst_33 = arith.constant 1.000000e+00 : f32
    %98 = vector.broadcast %cst_33 : f32 to vector<2x128xf32>
    %99 = arith.addf %98, %97 : vector<2x128xf32>
    %100 = arith.divf %98, %99 : vector<2x128xf32>
    %101 = math.tanh %95 : vector<2x128xf32>
    %102 = vector.extract_strided_slice %100 {offsets = [0, 32], sizes = [2, 32], strides = [1, 1]} : vector<2x128xf32> to vector<2x32xf32>
    %103 = arith.mulf %102, %81 : vector<2x32xf32>
    %104 = vector.extract_strided_slice %100 {offsets = [0, 0], sizes = [2, 32], strides = [1, 1]} : vector<2x128xf32> to vector<2x32xf32>
    %105 = vector.extract_strided_slice %101 {offsets = [0, 64], sizes = [2, 32], strides = [1, 1]} : vector<2x128xf32> to vector<2x32xf32>
    %106 = arith.mulf %104, %105 : vector<2x32xf32>
    %107 = arith.addf %103, %106 : vector<2x32xf32>
    %108 = vector.extract_strided_slice %100 {offsets = [0, 96], sizes = [2, 32], strides = [1, 1]} : vector<2x128xf32> to vector<2x32xf32>
    %109 = math.tanh %107 : vector<2x32xf32>
    %110 = arith.mulf %108, %109 : vector<2x32xf32>
    %c0_34 = arith.constant 0 : index
    %c3 = arith.constant 3 : index
    %c0_35 = arith.constant 0 : index
    %111 = vector.load %arg15[%c0_34, %c3, %c0_35] : memref<2x8x32xf32, #tpu.memory_space<vmem>>, vector<2x1x32xf32>
    %112 = vector.shape_cast %111 : vector<2x1x32xf32> to vector<2x32xf32>
    %113 = vector.shape_cast %110 : vector<2x32xf32> to vector<2x1x32xf32>
    tpu.vector_store %arg15[%c0_34, %c3, %c0_35], %113 {strides = array<i32>} : memref<2x8x32xf32, #tpu.memory_space<vmem>>, vector<2x1x32xf32>,
    %c0_36 = arith.constant 0 : index
    %c3_37 = arith.constant 3 : index
    %c0_38 = arith.constant 0 : index
    %114 = vector.load %arg16[%c0_36, %c3_37, %c0_38] : memref<2x8x32xf32, #tpu.memory_space<vmem>>, vector<2x1x32xf32>
    %115 = vector.shape_cast %114 : vector<2x1x32xf32> to vector<2x32xf32>
    %116 = vector.shape_cast %107 : vector<2x32xf32> to vector<2x1x32xf32>
    tpu.vector_store %arg16[%c0_36, %c3_37, %c0_38], %116 {strides = array<i32>} : memref<2x8x32xf32, #tpu.memory_space<vmem>>, vector<2x1x32xf32>,
    %117 = vector.extract_strided_slice %8 {offsets = [0, 4, 0], sizes = [2, 1, 128], strides = [1, 1, 1]} : vector<2x8x128xf32> to vector<2x1x128xf32>
    %118 = vector.shape_cast %117 : vector<2x1x128xf32> to vector<2x128xf32>
    %119 = arith.truncf %110 : vector<2x32xf32> to vector<2x32xbf16>
    %cst_39 = arith.constant dense<0.000000e+00> : vector<2x128xf32>
    %120 = tpu.matmul %119, %10, %cst_39 {dimension_numbers = #tpu.dot_dimension_numbers<[1], [0], [0], [1], [0, 0, 1, 1], [], []>} : vector<2x32xbf16>, vector<32x128xbf16>, vector<2x128xf32> -> vector<2x128xf32>
    %121 = arith.addf %118, %120 : vector<2x128xf32>
    %122 = arith.negf %121 : vector<2x128xf32>
    %123 = math.exp %122 : vector<2x128xf32>
    %cst_40 = arith.constant 1.000000e+00 : f32
    %124 = vector.broadcast %cst_40 : f32 to vector<2x128xf32>
    %125 = arith.addf %124, %123 : vector<2x128xf32>
    %126 = arith.divf %124, %125 : vector<2x128xf32>
    %127 = math.tanh %121 : vector<2x128xf32>
    %128 = vector.extract_strided_slice %126 {offsets = [0, 32], sizes = [2, 32], strides = [1, 1]} : vector<2x128xf32> to vector<2x32xf32>
    %129 = arith.mulf %128, %107 : vector<2x32xf32>
    %130 = vector.extract_strided_slice %126 {offsets = [0, 0], sizes = [2, 32], strides = [1, 1]} : vector<2x128xf32> to vector<2x32xf32>
    %131 = vector.extract_strided_slice %127 {offsets = [0, 64], sizes = [2, 32], strides = [1, 1]} : vector<2x128xf32> to vector<2x32xf32>
    %132 = arith.mulf %130, %131 : vector<2x32xf32>
    %133 = arith.addf %129, %132 : vector<2x32xf32>
    %134 = vector.extract_strided_slice %126 {offsets = [0, 96], sizes = [2, 32], strides = [1, 1]} : vector<2x128xf32> to vector<2x32xf32>
    %135 = math.tanh %133 : vector<2x32xf32>
    %136 = arith.mulf %134, %135 : vector<2x32xf32>
    %c0_41 = arith.constant 0 : index
    %c4 = arith.constant 4 : index
    %c0_42 = arith.constant 0 : index
    %137 = vector.load %arg15[%c0_41, %c4, %c0_42] : memref<2x8x32xf32, #tpu.memory_space<vmem>>, vector<2x1x32xf32>
    %138 = vector.shape_cast %137 : vector<2x1x32xf32> to vector<2x32xf32>
    %139 = vector.shape_cast %136 : vector<2x32xf32> to vector<2x1x32xf32>
    tpu.vector_store %arg15[%c0_41, %c4, %c0_42], %139 {strides = array<i32>} : memref<2x8x32xf32, #tpu.memory_space<vmem>>, vector<2x1x32xf32>,
    %c0_43 = arith.constant 0 : index
    %c4_44 = arith.constant 4 : index
    %c0_45 = arith.constant 0 : index
    %140 = vector.load %arg16[%c0_43, %c4_44, %c0_45] : memref<2x8x32xf32, #tpu.memory_space<vmem>>, vector<2x1x32xf32>
    %141 = vector.shape_cast %140 : vector<2x1x32xf32> to vector<2x32xf32>
    %142 = vector.shape_cast %133 : vector<2x32xf32> to vector<2x1x32xf32>
    tpu.vector_store %arg16[%c0_43, %c4_44, %c0_45], %142 {strides = array<i32>} : memref<2x8x32xf32, #tpu.memory_space<vmem>>, vector<2x1x32xf32>,
    %143 = vector.extract_strided_slice %8 {offsets = [0, 5, 0], sizes = [2, 1, 128], strides = [1, 1, 1]} : vector<2x8x128xf32> to vector<2x1x128xf32>
    %144 = vector.shape_cast %143 : vector<2x1x128xf32> to vector<2x128xf32>
    %145 = arith.truncf %136 : vector<2x32xf32> to vector<2x32xbf16>
    %cst_46 = arith.constant dense<0.000000e+00> : vector<2x128xf32>
    %146 = tpu.matmul %145, %10, %cst_46 {dimension_numbers = #tpu.dot_dimension_numbers<[1], [0], [0], [1], [0, 0, 1, 1], [], []>} : vector<2x32xbf16>, vector<32x128xbf16>, vector<2x128xf32> -> vector<2x128xf32>
    %147 = arith.addf %144, %146 : vector<2x128xf32>
    %148 = arith.negf %147 : vector<2x128xf32>
    %149 = math.exp %148 : vector<2x128xf32>
    %cst_47 = arith.constant 1.000000e+00 : f32
    %150 = vector.broadcast %cst_47 : f32 to vector<2x128xf32>
    %151 = arith.addf %150, %149 : vector<2x128xf32>
    %152 = arith.divf %150, %151 : vector<2x128xf32>
    %153 = math.tanh %147 : vector<2x128xf32>
    %154 = vector.extract_strided_slice %152 {offsets = [0, 32], sizes = [2, 32], strides = [1, 1]} : vector<2x128xf32> to vector<2x32xf32>
    %155 = arith.mulf %154, %133 : vector<2x32xf32>
    %156 = vector.extract_strided_slice %152 {offsets = [0, 0], sizes = [2, 32], strides = [1, 1]} : vector<2x128xf32> to vector<2x32xf32>
    %157 = vector.extract_strided_slice %153 {offsets = [0, 64], sizes = [2, 32], strides = [1, 1]} : vector<2x128xf32> to vector<2x32xf32>
    %158 = arith.mulf %156, %157 : vector<2x32xf32>
    %159 = arith.addf %155, %158 : vector<2x32xf32>
    %160 = vector.extract_strided_slice %152 {offsets = [0, 96], sizes = [2, 32], strides = [1, 1]} : vector<2x128xf32> to vector<2x32xf32>
    %161 = math.tanh %159 : vector<2x32xf32>
    %162 = arith.mulf %160, %161 : vector<2x32xf32>
    %c0_48 = arith.constant 0 : index
    %c5 = arith.constant 5 : index
    %c0_49 = arith.constant 0 : index
    %163 = vector.load %arg15[%c0_48, %c5, %c0_49] : memref<2x8x32xf32, #tpu.memory_space<vmem>>, vector<2x1x32xf32>
    %164 = vector.shape_cast %163 : vector<2x1x32xf32> to vector<2x32xf32>
    %165 = vector.shape_cast %162 : vector<2x32xf32> to vector<2x1x32xf32>
    tpu.vector_store %arg15[%c0_48, %c5, %c0_49], %165 {strides = array<i32>} : memref<2x8x32xf32, #tpu.memory_space<vmem>>, vector<2x1x32xf32>,
    %c0_50 = arith.constant 0 : index
    %c5_51 = arith.constant 5 : index
    %c0_52 = arith.constant 0 : index
    %166 = vector.load %arg16[%c0_50, %c5_51, %c0_52] : memref<2x8x32xf32, #tpu.memory_space<vmem>>, vector<2x1x32xf32>
    %167 = vector.shape_cast %166 : vector<2x1x32xf32> to vector<2x32xf32>
    %168 = vector.shape_cast %159 : vector<2x32xf32> to vector<2x1x32xf32>
    tpu.vector_store %arg16[%c0_50, %c5_51, %c0_52], %168 {strides = array<i32>} : memref<2x8x32xf32, #tpu.memory_space<vmem>>, vector<2x1x32xf32>,
    %169 = vector.extract_strided_slice %8 {offsets = [0, 6, 0], sizes = [2, 1, 128], strides = [1, 1, 1]} : vector<2x8x128xf32> to vector<2x1x128xf32>
    %170 = vector.shape_cast %169 : vector<2x1x128xf32> to vector<2x128xf32>
    %171 = arith.truncf %162 : vector<2x32xf32> to vector<2x32xbf16>
    %cst_53 = arith.constant dense<0.000000e+00> : vector<2x128xf32>
    %172 = tpu.matmul %171, %10, %cst_53 {dimension_numbers = #tpu.dot_dimension_numbers<[1], [0], [0], [1], [0, 0, 1, 1], [], []>} : vector<2x32xbf16>, vector<32x128xbf16>, vector<2x128xf32> -> vector<2x128xf32>
    %173 = arith.addf %170, %172 : vector<2x128xf32>
    %174 = arith.negf %173 : vector<2x128xf32>
    %175 = math.exp %174 : vector<2x128xf32>
    %cst_54 = arith.constant 1.000000e+00 : f32
    %176 = vector.broadcast %cst_54 : f32 to vector<2x128xf32>
    %177 = arith.addf %176, %175 : vector<2x128xf32>
    %178 = arith.divf %176, %177 : vector<2x128xf32>
    %179 = math.tanh %173 : vector<2x128xf32>
    %180 = vector.extract_strided_slice %178 {offsets = [0, 32], sizes = [2, 32], strides = [1, 1]} : vector<2x128xf32> to vector<2x32xf32>
    %181 = arith.mulf %180, %159 : vector<2x32xf32>
    %182 = vector.extract_strided_slice %178 {offsets = [0, 0], sizes = [2, 32], strides = [1, 1]} : vector<2x128xf32> to vector<2x32xf32>
    %183 = vector.extract_strided_slice %179 {offsets = [0, 64], sizes = [2, 32], strides = [1, 1]} : vector<2x128xf32> to vector<2x32xf32>
    %184 = arith.mulf %182, %183 : vector<2x32xf32>
    %185 = arith.addf %181, %184 : vector<2x32xf32>
    %186 = vector.extract_strided_slice %178 {offsets = [0, 96], sizes = [2, 32], strides = [1, 1]} : vector<2x128xf32> to vector<2x32xf32>
    %187 = math.tanh %185 : vector<2x32xf32>
    %188 = arith.mulf %186, %187 : vector<2x32xf32>
    %c0_55 = arith.constant 0 : index
    %c6 = arith.constant 6 : index
    %c0_56 = arith.constant 0 : index
    %189 = vector.load %arg15[%c0_55, %c6, %c0_56] : memref<2x8x32xf32, #tpu.memory_space<vmem>>, vector<2x1x32xf32>
    %190 = vector.shape_cast %189 : vector<2x1x32xf32> to vector<2x32xf32>
    %191 = vector.shape_cast %188 : vector<2x32xf32> to vector<2x1x32xf32>
    tpu.vector_store %arg15[%c0_55, %c6, %c0_56], %191 {strides = array<i32>} : memref<2x8x32xf32, #tpu.memory_space<vmem>>, vector<2x1x32xf32>,
    %c0_57 = arith.constant 0 : index
    %c6_58 = arith.constant 6 : index
    %c0_59 = arith.constant 0 : index
    %192 = vector.load %arg16[%c0_57, %c6_58, %c0_59] : memref<2x8x32xf32, #tpu.memory_space<vmem>>, vector<2x1x32xf32>
    %193 = vector.shape_cast %192 : vector<2x1x32xf32> to vector<2x32xf32>
    %194 = vector.shape_cast %185 : vector<2x32xf32> to vector<2x1x32xf32>
    tpu.vector_store %arg16[%c0_57, %c6_58, %c0_59], %194 {strides = array<i32>} : memref<2x8x32xf32, #tpu.memory_space<vmem>>, vector<2x1x32xf32>,
    %195 = vector.extract_strided_slice %8 {offsets = [0, 7, 0], sizes = [2, 1, 128], strides = [1, 1, 1]} : vector<2x8x128xf32> to vector<2x1x128xf32>
    %196 = vector.shape_cast %195 : vector<2x1x128xf32> to vector<2x128xf32>
    %197 = arith.truncf %188 : vector<2x32xf32> to vector<2x32xbf16>
    %cst_60 = arith.constant dense<0.000000e+00> : vector<2x128xf32>
    %198 = tpu.matmul %197, %10, %cst_60 {dimension_numbers = #tpu.dot_dimension_numbers<[1], [0], [0], [1], [0, 0, 1, 1], [], []>} : vector<2x32xbf16>, vector<32x128xbf16>, vector<2x128xf32> -> vector<2x128xf32>
    %199 = arith.addf %196, %198 : vector<2x128xf32>
    %200 = arith.negf %199 : vector<2x128xf32>
    %201 = math.exp %200 : vector<2x128xf32>
    %cst_61 = arith.constant 1.000000e+00 : f32
    %202 = vector.broadcast %cst_61 : f32 to vector<2x128xf32>
    %203 = arith.addf %202, %201 : vector<2x128xf32>
    %204 = arith.divf %202, %203 : vector<2x128xf32>
    %205 = math.tanh %199 : vector<2x128xf32>
    %206 = vector.extract_strided_slice %204 {offsets = [0, 32], sizes = [2, 32], strides = [1, 1]} : vector<2x128xf32> to vector<2x32xf32>
    %207 = arith.mulf %206, %185 : vector<2x32xf32>
    %208 = vector.extract_strided_slice %204 {offsets = [0, 0], sizes = [2, 32], strides = [1, 1]} : vector<2x128xf32> to vector<2x32xf32>
    %209 = vector.extract_strided_slice %205 {offsets = [0, 64], sizes = [2, 32], strides = [1, 1]} : vector<2x128xf32> to vector<2x32xf32>
    %210 = arith.mulf %208, %209 : vector<2x32xf32>
    %211 = arith.addf %207, %210 : vector<2x32xf32>
    %212 = vector.extract_strided_slice %204 {offsets = [0, 96], sizes = [2, 32], strides = [1, 1]} : vector<2x128xf32> to vector<2x32xf32>
    %213 = math.tanh %211 : vector<2x32xf32>
    %214 = arith.mulf %212, %213 : vector<2x32xf32>
    %c0_62 = arith.constant 0 : index
    %c7 = arith.constant 7 : index
    %c0_63 = arith.constant 0 : index
    %215 = vector.load %arg15[%c0_62, %c7, %c0_63] : memref<2x8x32xf32, #tpu.memory_space<vmem>>, vector<2x1x32xf32>
    %216 = vector.shape_cast %215 : vector<2x1x32xf32> to vector<2x32xf32>
    %217 = vector.shape_cast %214 : vector<2x32xf32> to vector<2x1x32xf32>
    tpu.vector_store %arg15[%c0_62, %c7, %c0_63], %217 {strides = array<i32>} : memref<2x8x32xf32, #tpu.memory_space<vmem>>, vector<2x1x32xf32>,
    %c0_64 = arith.constant 0 : index
    %c7_65 = arith.constant 7 : index
    %c0_66 = arith.constant 0 : index
    %218 = vector.load %arg16[%c0_64, %c7_65, %c0_66] : memref<2x8x32xf32, #tpu.memory_space<vmem>>, vector<2x1x32xf32>
    %219 = vector.shape_cast %218 : vector<2x1x32xf32> to vector<2x32xf32>
    %220 = vector.shape_cast %211 : vector<2x32xf32> to vector<2x1x32xf32>
    tpu.vector_store %arg16[%c0_64, %c7_65, %c0_66], %220 {strides = array<i32>} : memref<2x8x32xf32, #tpu.memory_space<vmem>>, vector<2x1x32xf32>,
    %c0_67 = arith.constant 0 : index
    %c0_68 = arith.constant 0 : index
    %c0_69 = arith.constant 0 : index
    %221 = vector.load %arg14[%c0_67, %c0_68, %c0_69] : memref<2x2x32xf32, #tpu.memory_space<vmem>>, vector<1x2x32xf32>
    %222 = vector.shape_cast %221 : vector<1x2x32xf32> to vector<2x32xf32>
    %223 = vector.shape_cast %214 : vector<2x32xf32> to vector<1x2x32xf32>
    tpu.vector_store %arg14[%c0_67, %c0_68, %c0_69], %223 {strides = array<i32>} : memref<2x2x32xf32, #tpu.memory_space<vmem>>, vector<1x2x32xf32>,
    %c1_70 = arith.constant 1 : index
    %c0_71 = arith.constant 0 : index
    %c0_72 = arith.constant 0 : index
    %224 = vector.load %arg14[%c1_70, %c0_71, %c0_72] : memref<2x2x32xf32, #tpu.memory_space<vmem>>, vector<1x2x32xf32>
    %225 = vector.shape_cast %224 : vector<1x2x32xf32> to vector<2x32xf32>
    %226 = vector.shape_cast %211 : vector<2x32xf32> to vector<1x2x32xf32>
    tpu.vector_store %arg14[%c1_70, %c0_71, %c0_72], %226 {strides = array<i32>} : memref<2x2x32xf32, #tpu.memory_space<vmem>>, vector<1x2x32xf32>,
    %c0_73 = arith.constant 0 : index
    %c0_74 = arith.constant 0 : index
    %c0_75 = arith.constant 0 : index
    %227 = vector.load %arg15[%c0_73, %c0_74, %c0_75] : memref<2x8x32xf32, #tpu.memory_space<vmem>>, vector<2x8x32xf32>
    %228 = vector.shape_cast %227 : vector<2x8x32xf32> to vector<16x32xf32>
    %c0_76 = arith.constant 0 : index
    %c0_77 = arith.constant 0 : index
    %c0_78 = arith.constant 0 : index
    %229 = vector.load %arg16[%c0_76, %c0_77, %c0_78] : memref<2x8x32xf32, #tpu.memory_space<vmem>>, vector<2x8x32xf32>
    %230 = vector.shape_cast %229 : vector<2x8x32xf32> to vector<16x32xf32>
    %cst_79 = arith.constant 0.000000e+00 : f32
    %231 = vector.broadcast %cst_79 : f32 to vector<1x32xf32>
    %232 = vector.extract_strided_slice %228 {offsets = [0, 0], sizes = [7, 32], strides = [1, 1]} : vector<16x32xf32> to vector<7x32xf32>
    %cst_80 = arith.constant 0.000000e+00 : f32
    %233 = vector.broadcast %cst_80 : f32 to vector<1x32xf32>
    %234 = vector.extract_strided_slice %228 {offsets = [8, 0], sizes = [7, 32], strides = [1, 1]} : vector<16x32xf32> to vector<7x32xf32>
    %235 = tpu.concatenate %231, %232, %233, %234 in 0 : vector<1x32xf32>, vector<7x32xf32>, vector<1x32xf32>, vector<7x32xf32> -> vector<16x32xf32>
    %c0_81 = arith.constant 0 : index
    %c0_82 = arith.constant 0 : index
    %236 = vector.load %arg6[%c0_81, %c0_82] : memref<32x32xf32, #tpu.memory_space<vmem>>, vector<32x32xf32>
    %cst_83 = arith.constant dense<0.000000e+00> : vector<16x32xf32>
    %237 = tpu.matmul %235, %236, %cst_83 {dimension_numbers = #tpu.dot_dimension_numbers<[1], [0], [0], [1], [0, 0, 1, 1], [], []>} : vector<16x32xf32>, vector<32x32xf32>, vector<16x32xf32> -> vector<16x32xf32>
    %238 = arith.addf %9, %237 : vector<16x32xf32>
    %239 = arith.negf %238 : vector<16x32xf32>
    %240 = math.exp %239 : vector<16x32xf32>
    %cst_84 = arith.constant 1.000000e+00 : f32
    %241 = vector.broadcast %cst_84 : f32 to vector<16x32xf32>
    %242 = arith.addf %241, %240 : vector<16x32xf32>
    %243 = arith.divf %241, %242 : vector<16x32xf32>
    %244 = math.tanh %230 : vector<16x32xf32>
    %245 = arith.mulf %243, %244 : vector<16x32xf32>
    %c0_85 = arith.constant 0 : index
    %c0_86 = arith.constant 0 : index
    %246 = vector.load %arg8[%c0_85, %c0_86] : memref<32x49xf32, #tpu.memory_space<vmem>>, vector<32x49xf32>
    %cst_87 = arith.constant dense<0.000000e+00> : vector<16x49xf32>
    %247 = tpu.matmul %228, %246, %cst_87 {dimension_numbers = #tpu.dot_dimension_numbers<[1], [0], [0], [1], [0, 0, 1, 1], [], []>} : vector<16x32xf32>, vector<32x49xf32>, vector<16x49xf32> -> vector<16x49xf32>
    %c0_88 = arith.constant 0 : index
    %c0_89 = arith.constant 0 : index
    %248 = vector.load %arg10[%c0_88, %c0_89] : memref<1x49xf32, #tpu.memory_space<vmem>>, vector<1x49xf32>
    %249 = vector.shape_cast %248 : vector<1x49xf32> to vector<1x1x49xf32>
    %c0_90 = arith.constant 0 : index
    %c0_91 = arith.constant 0 : index
    %250 = vector.load %arg2[%c0_90, %c0_91] : memref<112x32xf32, #tpu.memory_space<vmem>>, vector<112x32xf32>
    %c0_92 = arith.constant 0 : index
    %c0_93 = arith.constant 0 : index
    %251 = vector.load %arg7[%c0_92, %c0_93] : memref<32x49xf32, #tpu.memory_space<vmem>>, vector<32x49xf32>
    %cst_94 = arith.constant dense<0.000000e+00> : vector<112x49xf32>
    %252 = tpu.matmul %250, %251, %cst_94 {dimension_numbers = #tpu.dot_dimension_numbers<[1], [0], [0], [1], [0, 0, 1, 1], [], []>} : vector<112x32xf32>, vector<32x49xf32>, vector<112x49xf32> -> vector<112x49xf32>
    %253 = vector.extract_strided_slice %252 {offsets = [0, 0], sizes = [49, 49], strides = [1, 1]} : vector<112x49xf32> to vector<49x49xf32>
    %254 = vector.extract_strided_slice %247 {offsets = [0, 0], sizes = [8, 49], strides = [1, 1]} : vector<16x49xf32> to vector<8x49xf32>
    %255 = vector.shape_cast %253 : vector<49x49xf32> to vector<1x49x49xf32>
    %256 = vector.shape_cast %254 : vector<8x49xf32> to vector<8x1x49xf32>
    %257 = vector.broadcast %255 : vector<1x49x49xf32> to vector<8x49x49xf32>
    %258 = vector.broadcast %256 : vector<8x1x49xf32> to vector<8x49x49xf32>
    %259 = arith.addf %257, %258 : vector<8x49x49xf32>
    %260 = math.tanh %259 : vector<8x49x49xf32>
    %261 = vector.broadcast %249 : vector<1x1x49xf32> to vector<8x49x49xf32>
    %262 = arith.mulf %260, %261 : vector<8x49x49xf32>
    %cst_95 = arith.constant dense<0.000000e+00> : vector<8x49xf32>
    %263 = vector.multi_reduction <add>, %262, %cst_95 [2] : vector<8x49x49xf32> to vector<8x49xf32>
    %264 = vector.extract_strided_slice %252 {offsets = [56, 0], sizes = [49, 49], strides = [1, 1]} : vector<112x49xf32> to vector<49x49xf32>
    %265 = vector.extract_strided_slice %247 {offsets = [8, 0], sizes = [8, 49], strides = [1, 1]} : vector<16x49xf32> to vector<8x49xf32>
    %266 = vector.shape_cast %264 : vector<49x49xf32> to vector<1x49x49xf32>
    %267 = vector.shape_cast %265 : vector<8x49xf32> to vector<8x1x49xf32>
    %268 = vector.broadcast %266 : vector<1x49x49xf32> to vector<8x49x49xf32>
    %269 = vector.broadcast %267 : vector<8x1x49xf32> to vector<8x49x49xf32>
    %270 = arith.addf %268, %269 : vector<8x49x49xf32>
    %271 = math.tanh %270 : vector<8x49x49xf32>
    %272 = vector.broadcast %249 : vector<1x1x49xf32> to vector<8x49x49xf32>
    %273 = arith.mulf %271, %272 : vector<8x49x49xf32>
    %cst_96 = arith.constant dense<0.000000e+00> : vector<8x49xf32>
    %274 = vector.multi_reduction <add>, %273, %cst_96 [2] : vector<8x49x49xf32> to vector<8x49xf32>
    %275 = tpu.concatenate %263, %274 in 0 : vector<8x49xf32>, vector<8x49xf32> -> vector<16x49xf32>
    %cst_97 = arith.constant dense<0xFF800000> : vector<16xf32>
    %276 = vector.multi_reduction <maximumf>, %275, %cst_97 [1] : vector<16x49xf32> to vector<16xf32>
    %277 = vector.shape_cast %276 : vector<16xf32> to vector<16x1xf32>
    %278 = vector.broadcast %277 : vector<16x1xf32> to vector<16x49xf32>
    %279 = arith.subf %275, %278 : vector<16x49xf32>
    %280 = math.exp %279 : vector<16x49xf32>
    %cst_98 = arith.constant dense<0.000000e+00> : vector<16xf32>
    %281 = vector.multi_reduction <add>, %280, %cst_98 [1] : vector<16x49xf32> to vector<16xf32>
    %282 = vector.shape_cast %281 : vector<16xf32> to vector<16x1xf32>
    %283 = vector.broadcast %282 : vector<16x1xf32> to vector<16x49xf32>
    %284 = arith.divf %280, %283 : vector<16x49xf32>
    %c0_99 = arith.constant 0 : index
    %c0_100 = arith.constant 0 : index
    %285 = vector.load %arg2[%c0_99, %c0_100] : memref<112x32xf32, #tpu.memory_space<vmem>>, vector<49x32xf32>
    %286 = vector.extract_strided_slice %284 {offsets = [0, 0], sizes = [8, 49], strides = [1, 1]} : vector<16x49xf32> to vector<8x49xf32>
    %cst_101 = arith.constant dense<0.000000e+00> : vector<8x32xf32>
    %287 = tpu.matmul %286, %285, %cst_101 {dimension_numbers = #tpu.dot_dimension_numbers<[1], [0], [0], [1], [0, 0, 1, 1], [], []>} : vector<8x49xf32>, vector<49x32xf32>, vector<8x32xf32> -> vector<8x32xf32>
    %c56 = arith.constant 56 : index
    %c0_102 = arith.constant 0 : index
    %288 = vector.load %arg2[%c56, %c0_102] : memref<112x32xf32, #tpu.memory_space<vmem>>, vector<49x32xf32>
    %289 = vector.extract_strided_slice %284 {offsets = [8, 0], sizes = [8, 49], strides = [1, 1]} : vector<16x49xf32> to vector<8x49xf32>
    %cst_103 = arith.constant dense<0.000000e+00> : vector<8x32xf32>
    %290 = tpu.matmul %289, %288, %cst_103 {dimension_numbers = #tpu.dot_dimension_numbers<[1], [0], [0], [1], [0, 0, 1, 1], [], []>} : vector<8x49xf32>, vector<49x32xf32>, vector<8x32xf32> -> vector<8x32xf32>
    %291 = tpu.concatenate %287, %290 in 0 : vector<8x32xf32>, vector<8x32xf32> -> vector<16x32xf32>
    %c0_104 = arith.constant 0 : index
    %c0_105 = arith.constant 0 : index
    %292 = vector.load %arg9[%c0_104, %c0_105] : memref<32x49xf32, #tpu.memory_space<vmem>>, vector<32x49xf32>
    %cst_106 = arith.constant dense<0.000000e+00> : vector<16x49xf32>
    %293 = tpu.matmul %245, %292, %cst_106 {dimension_numbers = #tpu.dot_dimension_numbers<[1], [0], [0], [1], [0, 0, 1, 1], [], []>} : vector<16x32xf32>, vector<32x49xf32>, vector<16x49xf32> -> vector<16x49xf32>
    %294 = arith.addf %293, %247 : vector<16x49xf32>
    %295 = math.tanh %294 : vector<16x49xf32>
    %296 = vector.broadcast %248 : vector<1x49xf32> to vector<16x49xf32>
    %297 = arith.mulf %295, %296 : vector<16x49xf32>
    %cst_107 = arith.constant dense<0.000000e+00> : vector<16xf32>
    %298 = vector.multi_reduction <add>, %297, %cst_107 [1] : vector<16x49xf32> to vector<16xf32>
    %299 = vector.shape_cast %298 : vector<16xf32> to vector<16x1xf32>
    %300 = arith.maximumf %277, %299 : vector<16x1xf32>
    %301 = arith.subf %299, %300 : vector<16x1xf32>
    %302 = math.exp %301 : vector<16x1xf32>
    %303 = arith.subf %277, %300 : vector<16x1xf32>
    %304 = math.exp %303 : vector<16x1xf32>
    %305 = arith.mulf %282, %304 : vector<16x1xf32>
    %306 = arith.addf %305, %302 : vector<16x1xf32>
    %307 = arith.divf %302, %306 : vector<16x1xf32>
    %308 = vector.broadcast %307 : vector<16x1xf32> to vector<16x32xf32>
    %309 = arith.mulf %308, %245 : vector<16x32xf32>
    %cst_108 = arith.constant 1.000000e+00 : f32
    %310 = vector.broadcast %cst_108 : f32 to vector<16x1xf32>
    %311 = arith.subf %310, %307 : vector<16x1xf32>
    %312 = vector.broadcast %311 : vector<16x1xf32> to vector<16x32xf32>
    %313 = arith.mulf %312, %291 : vector<16x32xf32>
    %314 = arith.addf %309, %313 : vector<16x32xf32>
    %315 = arith.addf %314, %228 : vector<16x32xf32>
    %c0_109 = arith.constant 0 : index
    %c0_110 = arith.constant 0 : index
    %316 = vector.load %arg11[%c0_109, %c0_110] : memref<32x40xf32, #tpu.memory_space<vmem>>, vector<32x40xf32>
    %cst_111 = arith.constant dense<0.000000e+00> : vector<16x40xf32>
    %317 = tpu.matmul %315, %316, %cst_111 {dimension_numbers = #tpu.dot_dimension_numbers<[1], [0], [0], [1], [0, 0, 1, 1], [], []>} : vector<16x32xf32>, vector<32x40xf32>, vector<16x40xf32> -> vector<16x40xf32>
    %c0_112 = arith.constant 0 : index
    %c0_113 = arith.constant 0 : index
    %318 = vector.load %arg12[%c0_112, %c0_113] : memref<1x40xf32, #tpu.memory_space<vmem>>, vector<1x40xf32>
    %319 = vector.broadcast %318 : vector<1x40xf32> to vector<16x40xf32>
    %320 = arith.addf %317, %319 : vector<16x40xf32>
    %cst_114 = arith.constant 0.000000e+00 : f32
    %321 = vector.broadcast %cst_114 : f32 to vector<16x88xf32>
    %322 = tpu.concatenate %320, %321 in 1 : vector<16x40xf32>, vector<16x88xf32> -> vector<16x128xf32>
    %cst_115 = arith.constant 0.000000e+00 : f32
    %323 = vector.broadcast %cst_115 : f32 to vector<16x79xf32>
    %324 = tpu.concatenate %284, %323 in 1 : vector<16x49xf32>, vector<16x79xf32> -> vector<16x128xf32>
    %cst_116 = arith.constant 0.000000e+00 : f32
    %325 = vector.broadcast %cst_116 : f32 to vector<16x127xf32>
    %326 = tpu.concatenate %307, %325 in 1 : vector<16x1xf32>, vector<16x127xf32> -> vector<16x128xf32>
    %327 = tpu.concatenate %322, %324, %326 in 1 : vector<16x128xf32>, vector<16x128xf32>, vector<16x128xf32> -> vector<16x384xf32>
    %c0_117 = arith.constant 0 : index
    %c0_118 = arith.constant 0 : index
    %328 = vector.load %arg13[%c0_117, %c0_118] : memref<16x384xf32, #tpu.memory_space<vmem>>, vector<16x384xf32>
    tpu.vector_store %arg13[%c0_117, %c0_118], %327 {strides = array<i32>} : memref<16x384xf32, #tpu.memory_space<vmem>>, vector<16x384xf32>,
    return
  }
  func.func @transform_0(%arg0: i32) -> (i32, i32, i32) {
    %c0_i32 = arith.constant 0 : i32
    %c0_i32_0 = arith.constant 0 : i32
    %c0_i32_1 = arith.constant 0 : i32
    %c0_i32_2 = arith.constant 0 : i32
    return %c0_i32, %c0_i32_0, %c0_i32_1 : i32, i32, i32
  }
  func.func @transform_1(%arg0: i32) -> (i32, i32) {
    %c0_i32 = arith.constant 0 : i32
    %c0_i32_0 = arith.constant 0 : i32
    %c0_i32_1 = arith.constant 0 : i32
    return %c0_i32, %c0_i32_0 : i32, i32
  }
  func.func @transform_2(%arg0: i32) -> (i32, i32) {
    %c0_i32 = arith.constant 0 : i32
    %c0_i32_0 = arith.constant 0 : i32
    %c0_i32_1 = arith.constant 0 : i32
    return %c0_i32, %c0_i32_0 : i32, i32
  }
  func.func @transform_3(%arg0: i32) -> (i32, i32) {
    %c0_i32 = arith.constant 0 : i32
    %c0_i32_0 = arith.constant 0 : i32
    %c0_i32_1 = arith.constant 0 : i32
    return %c0_i32, %c0_i32_0 : i32, i32
  }
  func.func @transform_4(%arg0: i32) -> (i32, i32) {
    %c0_i32 = arith.constant 0 : i32
    %c0_i32_0 = arith.constant 0 : i32
    %c0_i32_1 = arith.constant 0 : i32
    return %c0_i32, %c0_i32_0 : i32, i32
  }
  func.func @transform_5(%arg0: i32) -> (i32, i32) {
    %c0_i32 = arith.constant 0 : i32
    %c0_i32_0 = arith.constant 0 : i32
    %c0_i32_1 = arith.constant 0 : i32
    return %c0_i32, %c0_i32_0 : i32, i32
  }
  func.func @transform_6(%arg0: i32) -> (i32, i32) {
    %c0_i32 = arith.constant 0 : i32
    %c0_i32_0 = arith.constant 0 : i32
    %c0_i32_1 = arith.constant 0 : i32
    return %c0_i32, %c0_i32_0 : i32, i32
  }
  func.func @transform_7(%arg0: i32) -> (i32, i32) {
    %c0_i32 = arith.constant 0 : i32
    %c0_i32_0 = arith.constant 0 : i32
    %c0_i32_1 = arith.constant 0 : i32
    return %c0_i32, %c0_i32_0 : i32, i32
  }
  func.func @transform_8(%arg0: i32) -> (i32, i32) {
    %c0_i32 = arith.constant 0 : i32
    %c0_i32_0 = arith.constant 0 : i32
    %c0_i32_1 = arith.constant 0 : i32
    return %c0_i32, %c0_i32_0 : i32, i32
  }
  func.func @transform_9(%arg0: i32) -> (i32, i32) {
    %c0_i32 = arith.constant 0 : i32
    %c0_i32_0 = arith.constant 0 : i32
    %c0_i32_1 = arith.constant 0 : i32
    return %c0_i32, %c0_i32_0 : i32, i32
  }
  func.func @transform_10(%arg0: i32) -> (i32, i32) {
    %c0_i32 = arith.constant 0 : i32
    %c0_i32_0 = arith.constant 0 : i32
    %c0_i32_1 = arith.constant 0 : i32
    return %c0_i32, %c0_i32_0 : i32, i32
  }
  func.func @transform_11(%arg0: i32) -> (i32, i32) {
    %c0_i32 = arith.constant 0 : i32
    %c0_i32_0 = arith.constant 0 : i32
    %c0_i32_1 = arith.constant 0 : i32
    return %c0_i32, %c0_i32_0 : i32, i32
  }
  func.func @transform_12(%arg0: i32) -> (i32, i32) {
    %c0_i32 = arith.constant 0 : i32
    %c0_i32_0 = arith.constant 0 : i32
    %c0_i32_1 = arith.constant 0 : i32
    return %c0_i32, %c0_i32_0 : i32, i32
  }
  func.func @transform_13(%arg0: i32) -> (i32, i32, i32) {
    %c0_i32 = arith.constant 0 : i32
    %c0_i32_0 = arith.constant 0 : i32
    %c0_i32_1 = arith.constant 0 : i32
    %c0_i32_2 = arith.constant 0 : i32
    return %c0_i32, %c0_i32_0, %c0_i32_1 : i32, i32, i32
  }
}

</mosaic_0001>

<bundles_post_ra>
// kernel: tpu_custom_call.1
= control target key start
LH: loop header
LB: loop body
LE: loop exit
PB: predicated region body
PF: predicated region fallthrough
CT: control target
= control target key end

     0   :  { %19 = vsyncpa [#allocation5], 0  ;;  %s6786_s0 = inlined_call_operand.hbm [shape: f32[2,8,64], index: 0, kind: input, shape index: {}]   ;;  %s6787_s1 = inlined_call_operand.vmem [shape: f32[112,32], index: 1, kind: input, shape index: {}]   ;;  %s6788_s2 = inlined_call_operand.vmem [shape: f32[64,160], index: 2, kind: input, shape index: {}]   ;;  %s6789_s3 = inlined_call_operand.hbm [shape: bf16[32,128], index: 3, kind: input, shape index: {}]   ;;  %s6790_s4 = inlined_call_operand.vmem [shape: f32[1,128], index: 4, kind: input, shape index: {}]   ;;  %s6791_s5 = inlined_call_operand.vmem [shape: f32[32,32], index: 5, kind: input, shape index: {}]   ;;  %s6792_s6 = inlined_call_operand.hbm [shape: f32[32,49], index: 6, kind: input, shape index: {}]   ;;  %s6793_s7 = inlined_call_operand.hbm [shape: f32[32,49], index: 7, kind: input, shape index: {}]   ;;  %s6794_s8 = inlined_call_operand.hbm [shape: f32[32,49], index: 8, kind: input, shape index: {}]   ;;  %s6795_s9 = inlined_call_operand.vmem [shape: f32[1,49], index: 9, kind: input, shape index: {}]   ;;  %s6796_s10 = inlined_call_operand.hbm [shape: f32[32,40], index: 10, kind: input, shape index: {}]   ;;  %s6797_s11 = inlined_call_operand.vmem [shape: f32[1,40], index: 11, kind: input, shape index: {}]   ;;  %s6798_s12 = inlined_call_operand.hbm [shape: f32[16,384], index: 12, kind: output, shape index: {0}]   ;;  %s6799_s13 = inlined_call_operand.hbm [shape: f32[2,2,32], index: 13, kind: output, shape index: {1}]  }
   0x1   :  { %20 = vsyncpa [#allocation8], 0 }
   0x2   :  { %21 = vsyncpa [#allocation11], 0 }
   0x3   :  { %22 = vsyncpa [#allocation14], 0 }
   0x4   :  { %23 = vsyncpa [#allocation6], 0 }
   0x5   :  { %24 = vsyncpa [#allocation17], 0  ;;  %s4723_s25 = smov [#allocation7]   ;;  %s4535_s29 = scalar_lea.hbm %s6789_s3, 256 }
   0x6   :  { %s46_s26 = sshll.u32 %s4723_s25, 4  ;;  %p4536_p0 = scmp.ne.s32.totalorder %s6789_s3, %s4535_s29  ;;  %s47_s26 = int_to_ptr.vmem [resolvable:$true] %s46_s26 }
   0x7   :  { %p4539_p1 = scmp.lt.u32.totalorder %s4535_s29, %s6789_s3 }
   0x9   :  { %p4541_p2 = pnand %p4539_p1, %p4536_p0 }
   0xb   :  { %4544 = shalt.err (!%p4541_p2)
}
   0xc   :  { %s4545_s17 = scalar_lea.vmem %s47_s26, 256  ;;  %p4550_p4 = scmp.lt.s32.totalorder %s47_s26, %s47_s26 }
   0xd   :  { %p4546_p3 = scmp.ne.s32.totalorder %s47_s26, %s4545_s17  ;;  %p4551_p5 = scmp.lt.s32.totalorder %s4545_s17, %s4545_s17 }
   0xf   :  { %p4552_p6 = por %p4551_p5, %p4550_p4 }
  0x11   :  { %p4553_p7 = pnand %p4552_p6, %p4546_p3 }
  0x13   :  { %4556 = shalt.err (!%p4553_p7)
}
  0x14   :  { %s4724_s18 = smov 64   ;;  %s4725_s19 = smov 4  }
  0x15   :  { %52 = dma.hbm_to_vmem [thread:$0]  %s6789_s3, 256, %s47_s26, [#allocation8], %s4724_s18, %s4724_s18, %s4725_s19  }
  0x16   :  { %s4726_s22 = smov [#allocation10]   ;;  %s4727_s24 = smov [#allocation4]  }
  0x17   :  { %s74_s23 = sshll.u32 %s4726_s22, 4  ;;  %s30_s25 = sshll.u32 %s4727_s24, 4  ;;  %s75_s23 = int_to_ptr.vmem [resolvable:$true] %s74_s23  ;;  %s31_s25 = int_to_ptr.vmem [resolvable:$true] %s30_s25 }
  0x18   :  { %s4557_s29 = scalar_lea.hbm %s6793_s7, 512 }
  0x19   :  { %p4558_p8 = scmp.ne.s32.totalorder %s6793_s7, %s4557_s29  ;;  %p4561_p9 = scmp.lt.u32.totalorder %s4557_s29, %s6793_s7 }
  0x1b   :  { %p4563_p10 = pnand %p4561_p9, %p4558_p8 }
  0x1d   :  { %4566 = shalt.err (!%p4563_p10)
}
  0x1e   :  { %s4567_s3 = scalar_lea.vmem %s75_s23, 512  ;;  %p4572_p12 = scmp.lt.s32.totalorder %s75_s23, %s75_s23 }
  0x1f   :  { %p4568_p11 = scmp.ne.s32.totalorder %s75_s23, %s4567_s3  ;;  %p4573_p13 = scmp.lt.s32.totalorder %s4567_s3, %s4567_s3 }
  0x21   :  { %p4574_p0 = por %p4573_p13, %p4572_p12 }
  0x23   :  { %p4575_p1 = pnand %p4574_p0, %p4568_p11 }
  0x25   :  { %4578 = shalt.err (!%p4575_p1)
}
  0x26   :  { %s4728_s26 = smov 128   ;;  %s4729_s17 = smov 8  }
  0x27   :  { %80 = dma.hbm_to_vmem [thread:$0]  %s6793_s7, 512, %s75_s23, [#allocation11], %s4728_s26, %s4728_s26, %s4729_s17  }
  0x28   :  { %s4579_s24 = scalar_lea.hbm %s6786_s0, 256 }
  0x29   :  { %p4580_p2 = scmp.ne.s32.totalorder %s6786_s0, %s4579_s24  ;;  %p4583_p3 = scmp.lt.u32.totalorder %s4579_s24, %s6786_s0 }
  0x2b   :  { %p4585_p4 = pnand %p4583_p3, %p4580_p2 }
  0x2d   :  { %4588 = shalt.err (!%p4585_p4)
}
  0x2e   :  { %s4589_s14 = scalar_lea.vmem %s31_s25, 256  ;;  %p4594_p6 = scmp.lt.s32.totalorder %s31_s25, %s31_s25 }
  0x2f   :  { %p4590_p5 = scmp.ne.s32.totalorder %s31_s25, %s4589_s14  ;;  %p4595_p7 = scmp.lt.s32.totalorder %s4589_s14, %s4589_s14 }
  0x31   :  { %p4596_p8 = por %p4595_p7, %p4594_p6 }
  0x33   :  { %p4597_p9 = pnand %p4596_p8, %p4590_p5 }
  0x35   :  { %4600 = shalt.err (!%p4597_p9)
}
  0x36   :  { %36 = dma.hbm_to_vmem [thread:$0]  %s6786_s0, 256, %s31_s25, [#allocation5], %s4728_s26, %s4728_s26, %s4729_s17  }
  0x37   :  { %s4730_s15 = smov [#allocation9]   ;;  %s4731_s3 = smov [#allocation12]  }
  0x38   :  { %s62_s16 = sshll.u32 %s4730_s15, 4  ;;  %s86_s19 = sshll.u32 %s4731_s3, 4  ;;  %s63_s16 = int_to_ptr.vmem [resolvable:$true] %s62_s16  ;;  %s87_s19 = int_to_ptr.vmem [resolvable:$true] %s86_s19 }
  0x39   :  { %s4601_s22 = scalar_lea.hbm %s6792_s6, 512 }
  0x3a   :  { %p4602_p10 = scmp.ne.s32.totalorder %s6792_s6, %s4601_s22  ;;  %p4605_p11 = scmp.lt.u32.totalorder %s4601_s22, %s6792_s6 }
  0x3c   :  { %p4607_p12 = pnand %p4605_p11, %p4602_p10 }
  0x3e   :  { %4610 = shalt.err (!%p4607_p12)
}
  0x3f   :  { %s4611_s0 = scalar_lea.vmem %s63_s16, 512  ;;  %p4616_p0 = scmp.lt.s32.totalorder %s63_s16, %s63_s16 }
  0x40   :  { %p4612_p13 = scmp.ne.s32.totalorder %s63_s16, %s4611_s0  ;;  %p4617_p1 = scmp.lt.s32.totalorder %s4611_s0, %s4611_s0 }
  0x42   :  { %p4618_p2 = por %p4617_p1, %p4616_p0 }
  0x44   :  { %p4619_p3 = pnand %p4618_p2, %p4612_p13 }
  0x46   :  { %4622 = shalt.err (!%p4619_p3)
}
  0x47   :  { %68 = dma.hbm_to_vmem [thread:$0]  %s6792_s6, 512, %s63_s16, [#allocation8], %s4728_s26, %s4728_s26, %s4729_s17  }
  0x48   :  { %s4623_s23 = scalar_lea.hbm %s6794_s8, 512 }
  0x49   :  { %p4624_p4 = scmp.ne.s32.totalorder %s6794_s8, %s4623_s23  ;;  %p4627_p5 = scmp.lt.u32.totalorder %s4623_s23, %s6794_s8 }
  0x4b   :  { %p4629_p6 = pnand %p4627_p5, %p4624_p4 }
  0x4d   :  { %4632 = shalt.err (!%p4629_p6)
}
  0x4e   :  { %s4633_s22 = scalar_lea.vmem %s87_s19, 512  ;;  %p4638_p8 = scmp.lt.s32.totalorder %s87_s19, %s87_s19 }
  0x4f   :  { %p4634_p7 = scmp.ne.s32.totalorder %s87_s19, %s4633_s22  ;;  %p4639_p9 = scmp.lt.s32.totalorder %s4633_s22, %s4633_s22 }
  0x51   :  { %p4640_p10 = por %p4639_p9, %p4638_p8 }
  0x53   :  { %p4641_p11 = pnand %p4640_p10, %p4634_p7 }
  0x55   :  { %4644 = shalt.err (!%p4641_p11)
}
  0x56   :  { %92 = dma.hbm_to_vmem [thread:$0]  %s6794_s8, 512, %s87_s19, [#allocation11], %s4728_s26, %s4728_s26, %s4729_s17  }
  0x57   :  { %s4732_s24 = smov [#allocation13]   ;;  %s4645_s0 = scalar_lea.hbm %s6796_s10, 512 }
  0x58   :  { %s100_s27 = sshll.u32 %s4732_s24, 4  ;;  %p4646_p12 = scmp.ne.s32.totalorder %s6796_s10, %s4645_s0  ;;  %s101_s27 = int_to_ptr.vmem [resolvable:$true] %s100_s27 }
  0x59   :  { %p4649_p13 = scmp.lt.u32.totalorder %s4645_s0, %s6796_s10 }
  0x5b   :  { %p4651_p0 = pnand %p4649_p13, %p4646_p12 }
  0x5d   :  { %4654 = shalt.err (!%p4651_p0)
}
  0x5e   :  { %s4655_s23 = scalar_lea.vmem %s101_s27, 512  ;;  %p4660_p2 = scmp.lt.s32.totalorder %s101_s27, %s101_s27 }
  0x5f   :  { %p4656_p1 = scmp.ne.s32.totalorder %s101_s27, %s4655_s23  ;;  %p4661_p3 = scmp.lt.s32.totalorder %s4655_s23, %s4655_s23 }
  0x61   :  { %p4662_p4 = por %p4661_p3, %p4660_p2 }
  0x63   :  { %p4663_p5 = pnand %p4662_p4, %p4656_p1 }
  0x65   :  { %4666 = shalt.err (!%p4663_p5)
}
  0x66   :  { %106 = dma.hbm_to_vmem [thread:$0]  %s6796_s10, 512, %s101_s27, [#allocation14], %s4728_s26, %s4728_s26, %s4729_s17  }
  0x67   :  { %4711 = dma.done.wait [#allocation5], 256  }
  0x68   :  { %4712 = vsyncadd [#allocation5], 4294967040 }
  0x69   :  { %4713 = dma.done.wait [#allocation8], 768  }
  0x6a   :  { %4714 = vsyncadd [#allocation8], 4294966528 }
  0x6b   :  { %4715 = dma.done.wait [#allocation11], 1024  }
  0x6c   :  { %4716 = vsyncadd [#allocation11], 4294966272 }
  0x6d   :  { %4717 = dma.done.wait [#allocation14], 512  }
  0x6e   :  { %4718 = vsyncadd [#allocation14], 4294966784  ;;  %v6800_v0 = vmov 0.0   ;;  %vm6819_vm0 = vmmov 0   ;;  %v131_v1 = vld [vmem:[%s6788_s2 + $0x8] sm:$0xff]  ;;  %v133_v2 = vld [vmem:[%s6788_s2 + $0x18] sm:$0xff] }
  0x6f   :  { %3874 = vmatprep.subr.bf16.mxu1 %v6800_v0  ;;  %217 = vmatprep.mubr.f32.mxu0 %v6800_v0  ;;  %v130_v3 = vld [vmem:[%s6788_s2] sm:$0xff]  ;;  %v4045_v4 = vpack.c.bf16 %v133_v2, %v131_v1  ;;  %v132_v5 = vld [vmem:[%s6788_s2 + $0x10] sm:$0xff]  ;;  %v135_v6 = vld [vmem:[%s6788_s2 + $0x28] sm:$0xff]  ;;  %v4735_v27 = vmov 0   ;;  %vm146_vm1 = vcmask 523264   ;;  %vm381_vm2 = vcmask 1041409  }
  0x70   :  { %3878 = vmatprep.mubr.msk.bf16.mxu1 %vm6819_vm0, %v6800_v0  ;;  %v137_v7 = vld [vmem:[%s6788_s2 + $0x38] sm:$0xff]  ;;  %v4047_v8 = vpack.c.bf16 %v132_v5, %v130_v3  ;;  %v134_v10 = vld [vmem:[%s6788_s2 + $0x20] sm:$0xff]  ;;  %v136_v11 = vld [vmem:[%s6788_s2 + $0x30] sm:$0xff]  ;;  %vm6821_vm3 = vcmask 261120   ;;  %vm361_vm4 = vcmask 253952   ;;  %vm6826_vm5 = vcmask 254977  }
  0x71   :  { %v4049_v9 = vpack.c.bf16 %v137_v7, %v135_v6  ;;  %v139_v12 = vld [vmem:[%s6788_s2 + $0x48] sm:$0xff]  ;;  %4046 = vmatprep.subr.bf16.mxu0 %v4045_v4  ;;  %v141_v13 = vld [vmem:[%s6788_s2 + $0x58] sm:$0xff]  ;;  %v4051_v14 = vpack.c.bf16 %v136_v11, %v134_v10  ;;  %v4938_v15 = vld [vmem:[#allocation7] sm:$0xff]   ;;  %vm6827_vm6 = vcmask 256002   ;;  %vm6824_vm7 = vcmask 257027  }
  0x72   :  { %4048 = vmatpush1.bf16.msra.mxu0 %v4047_v8  ;;  %v4053_v16 = vpack.c.bf16 %v141_v13, %v139_v12  ;;  %v138_v17 = vld [vmem:[%s6788_s2 + $0x40] sm:$0xff]  ;;  %v140_v18 = vld [vmem:[%s6788_s2 + $0x50] sm:$0xff]  ;;  %v143_v19 = vld [vmem:[%s6788_s2 + $0x68] sm:$0xff]  ;;  %3875 = vmatpush3.bf16.msra.mxu1 %v4938_v15  ;;  %vm6825_vm8 = vcmask 258052   ;;  %vm6822_vm9 = vcmask 259077   ;;  %vm6823_vm10 = vcmask 260102  }
  0x73   :  { %4050 = vmatprep.subr.bf16.mxu0 %v4049_v9  ;;  %v145_v20 = vld [vmem:[%s6788_s2 + $0x78] sm:$0xff]  ;;  %3876 = vmatprep.subr.bf16.mxu1 %v6800_v0  ;;  %v4055_v22 = vpack.c.bf16 %v140_v18, %v138_v17  ;;  %v142_v24 = vld [vmem:[%s6788_s2 + $0x60] sm:$0xff]  ;;  %v144_v25 = vld [vmem:[%s6788_s2 + $0x70] sm:$0xff]  ;;  %vm1304_vm11 = vcmask 261127   ;;  %vm6820_vm12 = vcmask 1040384   ;;  %vm1989_vm13 = vcmask 400384  }
  0x74   :  { %v4954_v21 = vld [vmem:[#allocation7 + $0x8] sm:$0xff]   ;;  %v4057_v23 = vpack.c.bf16 %v145_v20, %v143_v19  ;;  %v4059_v26 = vpack.c.bf16 %v144_v25, %v142_v24  ;;  %v128_v28 = vld [vmem:[#allocation4] sm:$0xff]  ;;  %v129_v29 = vld [vmem:[#allocation4 + $0x8] sm:$0xff]  ;;  %vm2008_vm14 = vcmask 393216   ;;  %vm2652_vm15 = vcmask 130112  }
  0x75   :  { %v3736_v36 = vld [vmem:[%s6790_s4] ss:$0 sm:$0xff]  ;;  %s4736_s4 = smov 32  }
  0x76   :  { %4052 = vmatpush1.bf16.msra.mxu0 %v4051_v14  ;;  %3877 = vmatpush3.bf16.msra.mxu1 %v4954_v21 }
  0x77   :  { %4054 = vmatprep.subr.bf16.mxu0 %v4053_v16  ;;  %3882 = vmatprep.subr.bf16.mxu1 %v6800_v0 }
  0x79   :  { %3879 = vmatmul.mubr.bf16.vlgmr.msra.gmra.mrb[0].mxu1 %v4735_v27 }
  0x7a   :  { %4056 = vmatpush1.bf16.msra.mxu0 %v4055_v22  ;;  %3883 = vmatpush3.bf16.msra.mxu1 %v4938_v15 }
  0x7b   :  { %4058 = vmatprep.subr.bf16.mxu0 %v4057_v23  ;;  %3886 = vmatprep.mubr.msk.bf16.mxu1 %vm6819_vm0, %v6800_v0 }
  0x7c   :  { %3884 = vmatprep.subr.bf16.mxu1 %v6800_v0 }
  0x7e   :  { %4060 = vmatpush1.bf16.msra.mxu0 %v4059_v26  ;;  %3885 = vmatpush3.bf16.msra.mxu1 %v4954_v21 }
  0x7f   :  { %3890 = vmatprep.subr.bf16.mxu0 %v6800_v0  ;;  %3898 = vmatprep.subr.bf16.mxu1 %v6800_v0 }
  0x81   :  { %3734 = vmatmul.mubr.msk.f32.vlgmr.msra.gmra.mrb[0].mxu0 %vm146_vm1, %v128_v28 }
  0x82   :  { %223 = vmatprep.mubr.f32.mxu0 %v6800_v0  ;;  %3891 = vmatpush3.bf16.msra.mxu0 %v4938_v15 }
  0x83   :  { %3892 = vmatprep.subr.bf16.mxu0 %v6800_v0 }
  0x85   :  { %3735 = vmatmul.mubr.msk.f32.gmra.mrb[2].mxu0 %vm146_vm1, %v129_v29  ;;  %vm2659_vm1 = vcmask 195712  }
  0x86   :  { %3893 = vmatpush3.bf16.msra.mxu0 %v4954_v21  ;;  %3894 = vmatprep.mubr.msk.bf16.mxu0 %vm6819_vm0, %v6800_v0 }
  0x87   :  { %3906 = vmatprep.subr.bf16.mxu0 %v6800_v0 }
 0x14c   :  { %v293_v30 = vpop.f32.mrb[0].mxu1 }
 0x14d   :  { %v3880_v31 = vpop.f32.mrb[1].mxu1  ;;  %v300_v37 = vrot.slane %v293_v30, 1 }
 0x14e   :  { %v296_v32 = vpop.f32.mrb[2].mxu1 }
 0x14f   :  { %v3881_v33 = vpop.f32.mrb[3].mxu1 }
 0x154   :  { %v219_v34 = vpop.f32.mrb[0].mxu0 }
 0x155   :  { %v4978_v35 = vpop.f32.mrb[1].mxu0  ;;  %v4983_v39 = vadd.f32 %v3736_v36, %v219_v34 }
 0x157   :  { %v303_v43 = vadd.f32 %v293_v30, %v4983_v39 }
 0x158   :  { %v225_v38 = vpop.f32.mrb[2].mxu0 }
 0x159   :  { %v4985_v40 = vadd.f32 %v3736_v36, %v225_v38  ;;  %v4987_v41 = vpop.f32.mrb[3].mxu0  ;;  %v3739_v47 = vmul.f32 -1.442695, %v303_v43 }
 0x15b   :  { %v304_v42 = vadd.f32 %v300_v37, %v4985_v40 }
 0x15d   :  { %4143 = vtanh.f32 %v304_v42  ;;  %v3740_v46 = vmul.f32 -1.442695, %v304_v42 }
 0x15e   :  { %4145 = vtanh.f32 %v303_v43 }
 0x15f   :  { %4147 = vpow2.f32 %v3740_v46 }
 0x160   :  { %4149 = vpow2.f32 %v3739_v47 }
 0x167   :  { %v4144_v44 = vpop.eup %4143 }
 0x168   :  { %325 = vrot.lane.b32.xlu0 %v4144_v44, %s4724_s18  ;;  %v4146_v45 = vpop.eup %4145 }
 0x169   :  { %v4148_v48 = vpop.eup %4147 }
 0x16a   :  { %v312_v49 = vadd.f32 1.0, %v4148_v48  ;;  %v4150_v50 = vpop.eup %4149 }
 0x16b   :  { %v311_v51 = vadd.f32 1.0, %v4150_v50 }
 0x16c   :  { %323 = vrot.lane.b32.xlu0 %v4146_v45, %s4724_s18  ;;  %4151 = vrcp.f32 %v312_v49 }
 0x16d   :  { %4153 = vrcp.f32 %v311_v51 }
 0x176   :  { %v4152_v52 = vpop.eup %4151 }
 0x177   :  { %v4154_v55 = vpop.eup %4153  ;;  %v320_v58 = vmul.f32 0.0, %v4152_v52 }
 0x178   :  { %v319_v61 = vmul.f32 0.0, %v4154_v55 }
 0x1da   :  { %v326_v53 = vpop.permute.xlu0 %325 }
 0x1db   :  { %v330_v54 = vmul.f32 %v4152_v52, %v326_v53 }
 0x1dd   :  { %335 = vrot.lane.b32.xlu1 %v330_v54, %s4736_s4 }
 0x1de   :  { %v324_v56 = vpop.permute.xlu0 %323 }
 0x1df   :  { %v329_v57 = vmul.f32 %v4154_v55, %v324_v56 }
 0x1e1   :  { %333 = vrot.lane.b32.xlu1 %v329_v57, %s4736_s4 }
 0x24f   :  { %v336_v59 = vpop.permute.xlu1 %335 }
 0x250   :  { %v4995_v60 = vadd.f32 %v336_v59, %v320_v58 }
 0x252   :  { %6828 = vst [vmem:[#allocation24_spill] sm:$0xff] %v4995_v60  ;;  %4155 = vtanh.f32 %v4995_v60  ;;  %v450_v42 = vrot.slane %v4995_v60, 7 }
 0x253   :  { %v334_v62 = vpop.permute.xlu1 %333 }
 0x254   :  { %v4998_v63 = vadd.f32 %v334_v62, %v319_v61 }
 0x256   :  { %4157 = vtanh.f32 %v4998_v63  ;;  %v449_v45 = vrot.slane %v4998_v63, 7 }
 0x25c   :  { %v4156_v1 = vpop.eup %4155 }
 0x25d   :  { %347 = vrot.lane.b32.xlu0 %v4156_v1, %s4724_s18 }
 0x260   :  { %v4158_v2 = vpop.eup %4157 }
 0x261   :  { %345 = vrot.lane.b32.xlu1 %v4158_v2, %s4724_s18 }
 0x2cf   :  { %v348_v3 = vpop.permute.xlu0 %347 }
 0x2d0   :  { %v5003_v4 = vmul.f32 %v4152_v52, %v348_v3 }
 0x2d2   :  { %v375_v5 = vpack.c.bf16 %v5003_v4, %v5003_v4 }
 0x2d3   :  { %v346_v6 = vpop.permute.xlu1 %345 }
 0x2d4   :  { %v379_v7 = vunpack.c.l.b16 %v375_v5  ;;  %v5007_v8 = vmul.f32 %v4154_v55, %v346_v6 }
 0x2d6   :  { %v374_v9 = vpack.c.bf16 %v5007_v8, %v5007_v8  ;;  %v380_v10 = vrot.slane %v379_v7, 7 }
 0x2d8   :  { %v378_v11 = vunpack.c.l.b16 %v374_v9 }
 0x2da   :  { %v382_v12 = vsel %vm381_vm2, %v380_v10, %v378_v11 }
 0x2db   :  { %v383_v13 = vpack.c.b16 %v382_v12, %v382_v12 }
 0x2dd   :  { %384 = vrot.lane.b32.xlu0 %v383_v13, %s4736_s4 }
 0x34f   :  { %v385_v14 = vpop.permute.xlu0 %384 }
 0x350   :  { %3887 = vmatmul.mubr.msk.bf16.vlgmr.msra.gmra.mrb[4].mxu1 %vm6821_vm3, %v385_v14 }
 0x351   :  { %3899 = vmatpush3.bf16.msra.mxu1 %v4938_v15  ;;  %3902 = vmatprep.mubr.msk.bf16.mxu1 %vm6819_vm0, %v6800_v0 }
 0x352   :  { %3900 = vmatprep.subr.bf16.mxu1 %v6800_v0 }
 0x355   :  { %3901 = vmatpush3.bf16.msra.mxu1 %v4954_v21 }
 0x356   :  { %3914 = vmatprep.subr.bf16.mxu1 %v6800_v0 }
 0x423   :  { %v423_v16 = vpop.f32.mrb[4].mxu1 }
 0x424   :  { %v430_v17 = vrot.slane %v423_v16, 7  ;;  %v434_v18 = vadd.f32 %v423_v16, %v4985_v40  ;;  %v3888_v19 = vpop.f32.mrb[5].mxu1 }
 0x425   :  { %v426_v20 = vpop.f32.mrb[6].mxu1 }
 0x426   :  { %v433_v22 = vadd.f32 %v430_v17, %v4983_v39  ;;  %4159 = vtanh.f32 %v434_v18  ;;  %v3889_v23 = vpop.f32.mrb[7].mxu1  ;;  %v3743_v26 = vmul.f32 -1.442695, %v434_v18 }
 0x428   :  { %4161 = vtanh.f32 %v433_v22  ;;  %v3742_v27 = vmul.f32 -1.442695, %v433_v22 }
 0x429   :  { %4163 = vpow2.f32 %v3743_v26 }
 0x42a   :  { %4165 = vpow2.f32 %v3742_v27 }
 0x430   :  { %v4160_v24 = vpop.eup %4159 }
 0x431   :  { %459 = vrot.lane.b32.xlu0 %v4160_v24, %s4724_s18 }
 0x432   :  { %v4162_v25 = vpop.eup %4161 }
 0x433   :  { %457 = vrot.lane.b32.xlu1 %v4162_v25, %s4724_s18  ;;  %v4164_v28 = vpop.eup %4163 }
 0x434   :  { %v4166_v29 = vpop.eup %4165  ;;  %v442_v30 = vadd.f32 1.0, %v4164_v28 }
 0x435   :  { %v441_v31 = vadd.f32 1.0, %v4166_v29 }
 0x436   :  { %4167 = vrcp.f32 %v442_v30 }
 0x437   :  { %4169 = vrcp.f32 %v441_v31 }
 0x440   :  { %v4168_v32 = vpop.eup %4167 }
 0x441   :  { %v4170_v36 = vpop.eup %4169  ;;  %v454_v43 = vmul.f32 %v4168_v32, %v450_v42 }
 0x442   :  { %v453_v47 = vmul.f32 %v4170_v36, %v449_v45 }
 0x4a3   :  { %v460_v33 = vpop.permute.xlu0 %459 }
 0x4a4   :  { %v464_v34 = vmul.f32 %v4168_v32, %v460_v33 }
 0x4a5   :  { %v458_v37 = vpop.permute.xlu1 %457 }
 0x4a6   :  { %469 = vrot.lane.b32.xlu0 %v464_v34, %s4736_s4  ;;  %v463_v38 = vmul.f32 %v4170_v36, %v458_v37 }
 0x4a8   :  { %467 = vrot.lane.b32.xlu1 %v463_v38, %s4736_s4 }
 0x518   :  { %v470_v44 = vpop.permute.xlu0 %469 }
 0x519   :  { %v5028_v46 = vadd.f32 %v470_v44, %v454_v43 }
 0x51a   :  { %v468_v48 = vpop.permute.xlu1 %467 }
 0x51b   :  { %6829 = vst [vmem:[#allocation25_spill] sm:$0xff] %v5028_v46  ;;  %4171 = vtanh.f32 %v5028_v46  ;;  %v5031_v49 = vadd.f32 %v468_v48, %v453_v47  ;;  %v584_v30 = vrot.slane %v5028_v46, 7 }
 0x51d   :  { %4173 = vtanh.f32 %v5031_v49  ;;  %v583_v29 = vrot.slane %v5031_v49, 7 }
 0x525   :  { %v4172_v50 = vpop.eup %4171 }
 0x526   :  { %481 = vrot.lane.b32.xlu0 %v4172_v50, %s4724_s18 }
 0x527   :  { %v4174_v51 = vpop.eup %4173 }
 0x528   :  { %479 = vrot.lane.b32.xlu1 %v4174_v51, %s4724_s18 }
 0x598   :  { %v482_v52 = vpop.permute.xlu0 %481 }
 0x599   :  { %v5036_v53 = vmul.f32 %v4168_v32, %v482_v52 }
 0x59a   :  { %v480_v54 = vpop.permute.xlu1 %479 }
 0x59b   :  { %v5038_v55 = vmul.f32 %v4170_v36, %v480_v54  ;;  %v509_v56 = vpack.c.bf16 %v5036_v53, %v5036_v53 }
 0x59d   :  { %v508_v57 = vpack.c.bf16 %v5038_v55, %v5038_v55  ;;  %v513_v59 = vunpack.c.l.b16 %v509_v56 }
 0x59f   :  { %v512_v58 = vunpack.c.l.b16 %v508_v57 }
 0x5a1   :  { %v514_v61 = vrot.slane %v512_v58, 1 }
 0x5a3   :  { %v515_v62 = vsel %vm381_vm2, %v513_v59, %v514_v61 }
 0x5a4   :  { %v516_v1 = vpack.c.b16 %v515_v62, %v515_v62 }
 0x5a6   :  { %517 = vrot.lane.b32.xlu1 %v516_v1, %s4736_s4 }
 0x618   :  { %v518_v2 = vpop.permute.xlu1 %517 }
 0x619   :  { %3895 = vmatmul.mubr.msk.bf16.vlgmr.msra.gmra.mrb[4].mxu0 %vm6821_vm3, %v518_v2 }
 0x61a   :  { %3907 = vmatpush3.bf16.msra.mxu0 %v4938_v15  ;;  %3910 = vmatprep.mubr.msk.bf16.mxu0 %vm6819_vm0, %v6800_v0 }
 0x61b   :  { %3908 = vmatprep.subr.bf16.mxu0 %v6800_v0 }
 0x61e   :  { %3909 = vmatpush3.bf16.msra.mxu0 %v4954_v21 }
 0x61f   :  { %3922 = vmatprep.subr.bf16.mxu0 %v6800_v0 }
 0x6ec   :  { %v556_v3 = vpop.f32.mrb[4].mxu0 }
 0x6ed   :  { %v563_v5 = vrot.slane %v556_v3, 6  ;;  %v564_v6 = vrot.slane %v556_v3, 7  ;;  %v3896_v7 = vpop.f32.mrb[5].mxu0 }
 0x6ee   :  { %v559_v9 = vpop.f32.mrb[6].mxu0 }
 0x6ef   :  { %v567_v10 = vadd.f32 %v563_v5, %v4983_v39  ;;  %v568_v11 = vadd.f32 %v564_v6, %v4985_v40  ;;  %v3897_v12 = vpop.f32.mrb[7].mxu0 }
 0x6f1   :  { %4175 = vtanh.f32 %v567_v10  ;;  %v3745_v16 = vmul.f32 -1.442695, %v567_v10  ;;  %v3746_v17 = vmul.f32 -1.442695, %v568_v11 }
 0x6f2   :  { %4177 = vtanh.f32 %v568_v11 }
 0x6f3   :  { %4179 = vpow2.f32 %v3745_v16 }
 0x6f4   :  { %4181 = vpow2.f32 %v3746_v17 }
 0x6fb   :  { %v4176_v13 = vpop.eup %4175 }
 0x6fc   :  { %v4178_v14 = vpop.eup %4177  ;;  %591 = vrot.lane.b32.xlu0 %v4176_v13, %s4724_s18 }
 0x6fd   :  { %593 = vrot.lane.b32.xlu1 %v4178_v14, %s4724_s18  ;;  %v4180_v18 = vpop.eup %4179 }
 0x6fe   :  { %v4182_v19 = vpop.eup %4181  ;;  %v575_v20 = vadd.f32 1.0, %v4180_v18 }
 0x6ff   :  { %v576_v22 = vadd.f32 1.0, %v4182_v19 }
 0x700   :  { %4183 = vrcp.f32 %v575_v20 }
 0x701   :  { %4185 = vrcp.f32 %v576_v22 }
 0x70a   :  { %v4184_v23 = vpop.eup %4183 }
 0x70b   :  { %v4186_v25 = vpop.eup %4185  ;;  %v587_v31 = vmul.f32 %v4184_v23, %v583_v29 }
 0x70c   :  { %v588_v32 = vmul.f32 %v4186_v25, %v584_v30 }
 0x76e   :  { %v592_v24 = vpop.permute.xlu0 %591 }
 0x76f   :  { %v594_v26 = vpop.permute.xlu1 %593  ;;  %v597_v27 = vmul.f32 %v4184_v23, %v592_v24 }
 0x770   :  { %v598_v28 = vmul.f32 %v4186_v25, %v594_v26 }
 0x771   :  { %601 = vrot.lane.b32.xlu0 %v597_v27, %s4736_s4 }
 0x772   :  { %603 = vrot.lane.b32.xlu1 %v598_v28, %s4736_s4 }
 0x7e3   :  { %v602_v33 = vpop.permute.xlu0 %601 }
 0x7e4   :  { %v604_v34 = vpop.permute.xlu1 %603  ;;  %v5061_v36 = vadd.f32 %v602_v33, %v587_v31 }
 0x7e5   :  { %v5063_v37 = vadd.f32 %v604_v34, %v588_v32 }
 0x7e6   :  { %4187 = vtanh.f32 %v5061_v36 }
 0x7e7   :  { %6830 = vst [vmem:[#allocation26_spill] sm:$0xff] %v5063_v37  ;;  %4189 = vtanh.f32 %v5063_v37  ;;  %v719_v26 = vrot.slane %v5063_v37, 7 }
 0x7f0   :  { %v4188_v38 = vpop.eup %4187 }
 0x7f1   :  { %v4190_v42 = vpop.eup %4189  ;;  %613 = vrot.lane.b32.xlu0 %v4188_v38, %s4724_s18 }
 0x7f2   :  { %615 = vrot.lane.b32.xlu1 %v4190_v42, %s4724_s18 }
 0x863   :  { %v614_v43 = vpop.permute.xlu0 %613 }
 0x864   :  { %v616_v44 = vpop.permute.xlu1 %615  ;;  %v5069_v45 = vmul.f32 %v4184_v23, %v614_v43 }
 0x865   :  { %v5071_v47 = vmul.f32 %v4186_v25, %v616_v44  ;;  %v718_v25 = vrot.slane %v5061_v36, 7 }
 0x866   :  { %v642_v48 = vpack.c.bf16 %v5069_v45, %v5069_v45 }
 0x867   :  { %v643_v50 = vpack.c.bf16 %v5071_v47, %v5071_v47 }
 0x868   :  { %v646_v51 = vunpack.c.l.b16 %v642_v48 }
 0x869   :  { %v647_v52 = vunpack.c.l.b16 %v643_v50 }
 0x86a   :  { %v648_v54 = vrot.slane %v646_v51, 2 }
 0x86b   :  { %v649_v56 = vrot.slane %v647_v52, 1 }
 0x86d   :  { %v650_v57 = vsel %vm381_vm2, %v649_v56, %v648_v54 }
 0x86e   :  { %v651_v58 = vpack.c.b16 %v650_v57, %v650_v57 }
 0x870   :  { %652 = vrot.lane.b32.xlu0 %v651_v58, %s4736_s4 }
 0x8e2   :  { %v653_v59 = vpop.permute.xlu0 %652 }
 0x8e3   :  { %3903 = vmatmul.mubr.msk.bf16.vlgmr.msra.gmra.mrb[8].mxu1 %vm6821_vm3, %v653_v59 }
 0x8e4   :  { %3915 = vmatpush3.bf16.msra.mxu1 %v4938_v15  ;;  %3918 = vmatprep.mubr.msk.bf16.mxu1 %vm6819_vm0, %v6800_v0 }
 0x8e5   :  { %3916 = vmatprep.subr.bf16.mxu1 %v6800_v0 }
 0x8e8   :  { %3917 = vmatpush3.bf16.msra.mxu1 %v4954_v21 }
 0x8e9   :  { %3930 = vmatprep.subr.bf16.mxu1 %v6800_v0 }
 0x9b6   :  { %v691_v61 = vpop.f32.mrb[8].mxu1 }
 0x9b7   :  { %v698_v62 = vrot.slane %v691_v61, 5  ;;  %v699_v1 = vrot.slane %v691_v61, 6  ;;  %v3904_v2 = vpop.f32.mrb[9].mxu1 }
 0x9b8   :  { %v694_v3 = vpop.f32.mrb[10].mxu1 }
 0x9b9   :  { %v702_v5 = vadd.f32 %v698_v62, %v4983_v39  ;;  %v703_v6 = vadd.f32 %v699_v1, %v4985_v40  ;;  %v3905_v7 = vpop.f32.mrb[11].mxu1 }
 0x9bb   :  { %4191 = vtanh.f32 %v702_v5  ;;  %v3748_v11 = vmul.f32 -1.442695, %v702_v5  ;;  %v3749_v12 = vmul.f32 -1.442695, %v703_v6 }
 0x9bc   :  { %4193 = vtanh.f32 %v703_v6 }
 0x9bd   :  { %4195 = vpow2.f32 %v3748_v11 }
 0x9be   :  { %4197 = vpow2.f32 %v3749_v12 }
 0x9c5   :  { %v4192_v9 = vpop.eup %4191 }
 0x9c6   :  { %v4194_v10 = vpop.eup %4193  ;;  %726 = vrot.lane.b32.xlu1 %v4192_v9, %s4724_s18 }
 0x9c7   :  { %728 = vrot.lane.b32.xlu0 %v4194_v10, %s4724_s18  ;;  %v4196_v13 = vpop.eup %4195 }
 0x9c8   :  { %v4198_v14 = vpop.eup %4197  ;;  %v710_v16 = vadd.f32 1.0, %v4196_v13 }
 0x9c9   :  { %v711_v17 = vadd.f32 1.0, %v4198_v14 }
 0x9ca   :  { %4199 = vrcp.f32 %v710_v16 }
 0x9cb   :  { %4201 = vrcp.f32 %v711_v17 }
 0x9d4   :  { %v4200_v18 = vpop.eup %4199 }
 0x9d5   :  { %v4202_v20 = vpop.eup %4201  ;;  %v722_v27 = vmul.f32 %v4200_v18, %v718_v25 }
 0x9d6   :  { %v723_v28 = vmul.f32 %v4202_v20, %v719_v26 }
 0xa38   :  { %v727_v19 = vpop.permute.xlu1 %726 }
 0xa39   :  { %v729_v22 = vpop.permute.xlu0 %728  ;;  %v732_v23 = vmul.f32 %v4200_v18, %v727_v19 }
 0xa3a   :  { %v733_v24 = vmul.f32 %v4202_v20, %v729_v22 }
 0xa3b   :  { %736 = vrot.lane.b32.xlu1 %v732_v23, %s4736_s4 }
 0xa3c   :  { %738 = vrot.lane.b32.xlu0 %v733_v24, %s4736_s4 }
 0xaad   :  { %v737_v29 = vpop.permute.xlu1 %736 }
 0xaae   :  { %v739_v30 = vpop.permute.xlu0 %738  ;;  %v5094_v31 = vadd.f32 %v737_v29, %v722_v27 }
 0xaaf   :  { %v5096_v32 = vadd.f32 %v739_v30, %v723_v28 }
 0xab0   :  { %4203 = vtanh.f32 %v5094_v31  ;;  %v853_v25 = vrot.slane %v5094_v31, 7 }
 0xab1   :  { %6831 = vst [vmem:[#allocation27_spill] sm:$0xff] %v5096_v32  ;;  %4205 = vtanh.f32 %v5096_v32  ;;  %v854_v26 = vrot.slane %v5096_v32, 7 }
 0xaba   :  { %v4204_v33 = vpop.eup %4203 }
 0xabb   :  { %v4206_v34 = vpop.eup %4205  ;;  %748 = vrot.lane.b32.xlu1 %v4204_v33, %s4724_s18 }
 0xabc   :  { %750 = vrot.lane.b32.xlu0 %v4206_v34, %s4724_s18 }
 0xb2d   :  { %v749_v38 = vpop.permute.xlu1 %748 }
 0xb2e   :  { %v751_v42 = vpop.permute.xlu0 %750  ;;  %v5102_v43 = vmul.f32 %v4200_v18, %v749_v38 }
 0xb2f   :  { %v5104_v44 = vmul.f32 %v4202_v20, %v751_v42 }
 0xb30   :  { %v777_v48 = vpack.c.bf16 %v5102_v43, %v5102_v43 }
 0xb31   :  { %v778_v50 = vpack.c.bf16 %v5104_v44, %v5104_v44 }
 0xb32   :  { %v781_v51 = vunpack.c.l.b16 %v777_v48 }
 0xb33   :  { %v782_v52 = vunpack.c.l.b16 %v778_v50 }
 0xb34   :  { %v783_v54 = vrot.slane %v781_v51, 3 }
 0xb35   :  { %v784_v56 = vrot.slane %v782_v52, 2 }
 0xb37   :  { %v785_v57 = vsel %vm381_vm2, %v784_v56, %v783_v54 }
 0xb38   :  { %v786_v58 = vpack.c.b16 %v785_v57, %v785_v57 }
 0xb3a   :  { %787 = vrot.lane.b32.xlu1 %v786_v58, %s4736_s4 }
 0xbac   :  { %v788_v59 = vpop.permute.xlu1 %787 }
 0xbad   :  { %3911 = vmatmul.mubr.msk.bf16.vlgmr.msra.gmra.mrb[8].mxu0 %vm6821_vm3, %v788_v59 }
 0xbae   :  { %3923 = vmatpush3.bf16.msra.mxu0 %v4938_v15  ;;  %3926 = vmatprep.mubr.msk.bf16.mxu0 %vm6819_vm0, %v6800_v0 }
 0xbaf   :  { %3924 = vmatprep.subr.bf16.mxu0 %v6800_v0 }
 0xbb2   :  { %3925 = vmatpush3.bf16.msra.mxu0 %v4954_v21 }
 0xc80   :  { %v826_v61 = vpop.f32.mrb[8].mxu0 }
 0xc81   :  { %v833_v62 = vrot.slane %v826_v61, 4  ;;  %v834_v1 = vrot.slane %v826_v61, 5  ;;  %v3912_v2 = vpop.f32.mrb[9].mxu0 }
 0xc82   :  { %v829_v3 = vpop.f32.mrb[10].mxu0 }
 0xc83   :  { %v837_v5 = vadd.f32 %v833_v62, %v4983_v39  ;;  %v838_v6 = vadd.f32 %v834_v1, %v4985_v40  ;;  %v3913_v7 = vpop.f32.mrb[11].mxu0 }
 0xc85   :  { %4207 = vtanh.f32 %v837_v5  ;;  %v3751_v11 = vmul.f32 -1.442695, %v837_v5  ;;  %v3752_v12 = vmul.f32 -1.442695, %v838_v6 }
 0xc86   :  { %4209 = vtanh.f32 %v838_v6 }
 0xc87   :  { %4211 = vpow2.f32 %v3751_v11 }
 0xc88   :  { %4213 = vpow2.f32 %v3752_v12 }
 0xc8f   :  { %v4208_v9 = vpop.eup %4207 }
 0xc90   :  { %v4210_v10 = vpop.eup %4209  ;;  %861 = vrot.lane.b32.xlu0 %v4208_v9, %s4724_s18 }
 0xc91   :  { %863 = vrot.lane.b32.xlu1 %v4210_v10, %s4724_s18  ;;  %v4212_v13 = vpop.eup %4211 }
 0xc92   :  { %v4214_v14 = vpop.eup %4213  ;;  %v845_v16 = vadd.f32 1.0, %v4212_v13 }
 0xc93   :  { %v846_v17 = vadd.f32 1.0, %v4214_v14 }
 0xc94   :  { %4215 = vrcp.f32 %v845_v16 }
 0xc95   :  { %4217 = vrcp.f32 %v846_v17 }
 0xc9e   :  { %v4216_v18 = vpop.eup %4215 }
 0xc9f   :  { %v4218_v20 = vpop.eup %4217  ;;  %v857_v27 = vmul.f32 %v4216_v18, %v853_v25 }
 0xca0   :  { %v858_v28 = vmul.f32 %v4218_v20, %v854_v26 }
 0xd02   :  { %v862_v19 = vpop.permute.xlu0 %861 }
 0xd03   :  { %v864_v22 = vpop.permute.xlu1 %863  ;;  %v867_v23 = vmul.f32 %v4216_v18, %v862_v19 }
 0xd04   :  { %v868_v24 = vmul.f32 %v4218_v20, %v864_v22 }
 0xd05   :  { %871 = vrot.lane.b32.xlu0 %v867_v23, %s4736_s4 }
 0xd06   :  { %873 = vrot.lane.b32.xlu1 %v868_v24, %s4736_s4 }
 0xd77   :  { %v872_v29 = vpop.permute.xlu0 %871 }
 0xd78   :  { %v874_v30 = vpop.permute.xlu1 %873  ;;  %v5126_v33 = vadd.f32 %v872_v29, %v857_v27 }
 0xd79   :  { %v5128_v34 = vadd.f32 %v874_v30, %v858_v28 }
 0xd7a   :  { %4219 = vtanh.f32 %v5126_v33  ;;  %v988_v27 = vrot.slane %v5126_v33, 7 }
 0xd7b   :  { %6832 = vst [vmem:[#allocation28_spill] sm:$0xff] %v5128_v34  ;;  %4221 = vtanh.f32 %v5128_v34  ;;  %v989_v28 = vrot.slane %v5128_v34, 7 }
 0xd84   :  { %v4220_v38 = vpop.eup %4219 }
 0xd85   :  { %v4222_v42 = vpop.eup %4221  ;;  %883 = vrot.lane.b32.xlu0 %v4220_v38, %s4724_s18 }
 0xd86   :  { %885 = vrot.lane.b32.xlu1 %v4222_v42, %s4724_s18 }
 0xdf7   :  { %v884_v48 = vpop.permute.xlu0 %883 }
 0xdf8   :  { %v886_v50 = vpop.permute.xlu1 %885  ;;  %v5134_v51 = vmul.f32 %v4216_v18, %v884_v48 }
 0xdf9   :  { %v5136_v52 = vmul.f32 %v4218_v20, %v886_v50 }
 0xdfa   :  { %v912_v54 = vpack.c.bf16 %v5134_v51, %v5134_v51 }
 0xdfb   :  { %v913_v56 = vpack.c.bf16 %v5136_v52, %v5136_v52 }
 0xdfc   :  { %v916_v57 = vunpack.c.l.b16 %v912_v54 }
 0xdfd   :  { %v917_v58 = vunpack.c.l.b16 %v913_v56 }
 0xdfe   :  { %v918_v59 = vrot.slane %v916_v57, 4 }
 0xdff   :  { %v919_v61 = vrot.slane %v917_v58, 3 }
 0xe01   :  { %v920_v62 = vsel %vm381_vm2, %v919_v61, %v918_v59 }
 0xe02   :  { %v921_v1 = vpack.c.b16 %v920_v62, %v920_v62 }
 0xe04   :  { %922 = vrot.lane.b32.xlu0 %v921_v1, %s4736_s4 }
 0xe76   :  { %v923_v2 = vpop.permute.xlu0 %922 }
 0xe77   :  { %3919 = vmatmul.mubr.msk.bf16.vlgmr.msra.gmra.mrb[12].mxu1 %vm6821_vm3, %v923_v2 }
 0xe78   :  { %3931 = vmatpush3.bf16.msra.mxu1 %v4938_v15  ;;  %3934 = vmatprep.mubr.msk.bf16.mxu1 %vm6819_vm0, %v6800_v0 }
 0xe79   :  { %3932 = vmatprep.subr.bf16.mxu1 %v6800_v0 }
 0xe7c   :  { %3933 = vmatpush3.bf16.msra.mxu1 %v4954_v21 }
 0xf4a   :  { %v961_v3 = vpop.f32.mrb[12].mxu1 }
 0xf4b   :  { %v968_v5 = vrot.slane %v961_v3, 3  ;;  %v969_v6 = vrot.slane %v961_v3, 4  ;;  %v3920_v7 = vpop.f32.mrb[13].mxu1 }
 0xf4c   :  { %v964_v9 = vpop.f32.mrb[14].mxu1 }
 0xf4d   :  { %v972_v10 = vadd.f32 %v968_v5, %v4983_v39  ;;  %v973_v11 = vadd.f32 %v969_v6, %v4985_v40  ;;  %v3921_v12 = vpop.f32.mrb[15].mxu1 }
 0xf4f   :  { %4223 = vtanh.f32 %v972_v10  ;;  %v3754_v14 = vmul.f32 -1.442695, %v972_v10  ;;  %v3755_v21 = vmul.f32 -1.442695, %v973_v11 }
 0xf50   :  { %4225 = vtanh.f32 %v973_v11 }
 0xf51   :  { %4227 = vpow2.f32 %v3754_v14 }
 0xf52   :  { %4229 = vpow2.f32 %v3755_v21 }
 0xf59   :  { %v4224_v15 = vpop.eup %4223 }
 0xf5a   :  { %v4226_v13 = vpop.eup %4225  ;;  %996 = vrot.lane.b32.xlu1 %v4224_v15, %s4724_s18 }
 0xf5b   :  { %998 = vrot.lane.b32.xlu0 %v4226_v13, %s4724_s18  ;;  %v4228_v16 = vpop.eup %4227 }
 0xf5c   :  { %v4230_v17 = vpop.eup %4229  ;;  %v980_v18 = vadd.f32 1.0, %v4228_v16 }
 0xf5d   :  { %v981_v19 = vadd.f32 1.0, %v4230_v17 }
 0xf5e   :  { %4231 = vrcp.f32 %v980_v18 }
 0xf5f   :  { %4233 = vrcp.f32 %v981_v19 }
 0xf68   :  { %v4232_v20 = vpop.eup %4231 }
 0xf69   :  { %v4234_v23 = vpop.eup %4233  ;;  %v992_v29 = vmul.f32 %v4232_v20, %v988_v27 }
 0xf6a   :  { %v993_v30 = vmul.f32 %v4234_v23, %v989_v28 }
 0xfcc   :  { %v997_v22 = vpop.permute.xlu1 %996 }
 0xfcd   :  { %v999_v24 = vpop.permute.xlu0 %998  ;;  %v1002_v25 = vmul.f32 %v4232_v20, %v997_v22 }
 0xfce   :  { %v1003_v26 = vmul.f32 %v4234_v23, %v999_v24 }
 0xfcf   :  { %1006 = vrot.lane.b32.xlu1 %v1002_v25, %s4736_s4 }
 0xfd0   :  { %1008 = vrot.lane.b32.xlu0 %v1003_v26, %s4736_s4 }
0x1041   :  { %v1007_v38 = vpop.permute.xlu1 %1006 }
0x1042   :  { %v1009_v42 = vpop.permute.xlu0 %1008  ;;  %v5158_v48 = vadd.f32 %v1007_v38, %v992_v29 }
0x1043   :  { %v5160_v50 = vadd.f32 %v1009_v42, %v993_v30 }
0x1044   :  { %4235 = vtanh.f32 %v5158_v48 }
0x1045   :  { %6833 = vst [vmem:[#allocation29_spill] sm:$0xff] %v5160_v50  ;;  %4237 = vtanh.f32 %v5160_v50 }
0x104e   :  { %v4236_v54 = vpop.eup %4235 }
0x104f   :  { %v4238_v56 = vpop.eup %4237  ;;  %1018 = vrot.lane.b32.xlu1 %v4236_v54, %s4724_s18  ;;  %v1123_v54 = vrot.slane %v5158_v48, 7 }
0x1050   :  { %1020 = vrot.lane.b32.xlu0 %v4238_v56, %s4724_s18  ;;  %v1124_v56 = vrot.slane %v5160_v50, 7 }
0x10c1   :  { %v1019_v57 = vpop.permute.xlu1 %1018 }
0x10c2   :  { %v1021_v58 = vpop.permute.xlu0 %1020  ;;  %v5166_v59 = vmul.f32 %v4232_v20, %v1019_v57 }
0x10c3   :  { %v5168_v61 = vmul.f32 %v4234_v23, %v1021_v58 }
0x10c4   :  { %v1047_v62 = vpack.c.bf16 %v5166_v59, %v5166_v59 }
0x10c5   :  { %v1048_v1 = vpack.c.bf16 %v5168_v61, %v5168_v61 }
0x10c6   :  { %v1051_v2 = vunpack.c.l.b16 %v1047_v62 }
0x10c7   :  { %v1052_v3 = vunpack.c.l.b16 %v1048_v1 }
0x10c8   :  { %v1053_v5 = vrot.slane %v1051_v2, 5 }
0x10c9   :  { %v1054_v6 = vrot.slane %v1052_v3, 4 }
0x10cb   :  { %v1055_v7 = vsel %vm381_vm2, %v1054_v6, %v1053_v5 }
0x10cc   :  { %v1056_v9 = vpack.c.b16 %v1055_v7, %v1055_v7 }
0x10ce   :  { %1057 = vrot.lane.b32.xlu1 %v1056_v9, %s4736_s4 }
0x1140   :  { %v1058_v10 = vpop.permute.xlu1 %1057 }
0x1141   :  { %3927 = vmatmul.mubr.msk.bf16.vlgmr.msra.gmra.mrb[12].mxu0 %vm6821_vm3, %v1058_v10 }
0x1214   :  { %v1096_v11 = vpop.f32.mrb[12].mxu0 }
0x1215   :  { %v1103_v12 = vrot.slane %v1096_v11, 2  ;;  %v1104_v15 = vrot.slane %v1096_v11, 3  ;;  %v3928_v13 = vpop.f32.mrb[13].mxu0 }
0x1216   :  { %v1099_v14 = vpop.f32.mrb[14].mxu0 }
0x1217   :  { %v1107_v21 = vadd.f32 %v1103_v12, %v4983_v39  ;;  %v1108_v16 = vadd.f32 %v1104_v15, %v4985_v40  ;;  %v3929_v17 = vpop.f32.mrb[15].mxu0 }
0x1219   :  { %4239 = vtanh.f32 %v1107_v21  ;;  %v3757_v20 = vmul.f32 -1.442695, %v1107_v21  ;;  %v3758_v22 = vmul.f32 -1.442695, %v1108_v16 }
0x121a   :  { %4241 = vtanh.f32 %v1108_v16 }
0x121b   :  { %4243 = vpow2.f32 %v3757_v20 }
0x121c   :  { %4245 = vpow2.f32 %v3758_v22 }
0x1223   :  { %v4240_v18 = vpop.eup %4239 }
0x1224   :  { %v4242_v19 = vpop.eup %4241  ;;  %1131 = vrot.lane.b32.xlu0 %v4240_v18, %s4724_s18 }
0x1225   :  { %1133 = vrot.lane.b32.xlu1 %v4242_v19, %s4724_s18  ;;  %v4244_v23 = vpop.eup %4243 }
0x1226   :  { %v4246_v24 = vpop.eup %4245  ;;  %v1115_v25 = vadd.f32 1.0, %v4244_v23 }
0x1227   :  { %v1116_v26 = vadd.f32 1.0, %v4246_v24 }
0x1228   :  { %4247 = vrcp.f32 %v1115_v25 }
0x1229   :  { %4249 = vrcp.f32 %v1116_v26 }
0x1232   :  { %v4248_v27 = vpop.eup %4247 }
0x1233   :  { %v4250_v29 = vpop.eup %4249  ;;  %v1127_v57 = vmul.f32 %v4248_v27, %v1123_v54 }
0x1234   :  { %v1128_v58 = vmul.f32 %v4250_v29, %v1124_v56 }
0x1296   :  { %v1132_v28 = vpop.permute.xlu0 %1131 }
0x1297   :  { %v1134_v30 = vpop.permute.xlu1 %1133  ;;  %v1137_v38 = vmul.f32 %v4248_v27, %v1132_v28 }
0x1298   :  { %v1138_v42 = vmul.f32 %v4250_v29, %v1134_v30 }
0x1299   :  { %1141 = vrot.lane.b32.xlu0 %v1137_v38, %s4736_s4 }
0x129a   :  { %1143 = vrot.lane.b32.xlu1 %v1138_v42, %s4736_s4 }
0x130b   :  { %v1142_v62 = vpop.permute.xlu0 %1141 }
0x130c   :  { %v1144_v1 = vpop.permute.xlu1 %1143  ;;  %v5185_v2 = vadd.f32 %v1142_v62, %v1127_v57 }
0x130d   :  { %v5187_v3 = vadd.f32 %v1144_v1, %v1128_v58 }
0x130e   :  { %4251 = vtanh.f32 %v5185_v2 }
0x130f   :  { %6834 = vst [vmem:[#allocation30_spill] sm:$0xff] %v5187_v3  ;;  %4253 = vtanh.f32 %v5187_v3 }
0x1318   :  { %v4252_v5 = vpop.eup %4251 }
0x1319   :  { %v4254_v6 = vpop.eup %4253  ;;  %1153 = vrot.lane.b32.xlu0 %v4252_v5, %s4724_s18 }
0x131a   :  { %1155 = vrot.lane.b32.xlu1 %v4254_v6, %s4724_s18 }
0x138b   :  { %v1154_v7 = vpop.permute.xlu0 %1153 }
0x138c   :  { %v1156_v9 = vpop.permute.xlu1 %1155  ;;  %v5193_v10 = vmul.f32 %v4248_v27, %v1154_v7  ;;  %v1258_v7 = vrot.slane %v5185_v2, 7 }
0x138d   :  { %v5195_v11 = vmul.f32 %v4250_v29, %v1156_v9  ;;  %v1259_v9 = vrot.slane %v5187_v3, 7 }
0x138e   :  { %v1182_v12 = vpack.c.bf16 %v5193_v10, %v5193_v10 }
0x138f   :  { %v1183_v15 = vpack.c.bf16 %v5195_v11, %v5195_v11 }
0x1390   :  { %v1186_v13 = vunpack.c.l.b16 %v1182_v12 }
0x1391   :  { %v1187_v14 = vunpack.c.l.b16 %v1183_v15 }
0x1392   :  { %v1188_v21 = vrot.slane %v1186_v13, 6 }
0x1393   :  { %v1189_v16 = vrot.slane %v1187_v14, 5 }
0x1395   :  { %v1190_v17 = vsel %vm381_vm2, %v1189_v16, %v1188_v21 }
0x1396   :  { %v1191_v18 = vpack.c.b16 %v1190_v17, %v1190_v17 }
0x1398   :  { %1192 = vrot.lane.b32.xlu0 %v1191_v18, %s4736_s4 }
0x140a   :  { %v1193_v19 = vpop.permute.xlu0 %1192 }
0x140b   :  { %3935 = vmatmul.mubr.msk.bf16.vlgmr.msra.gmra.mrb[16].mxu1 %vm6821_vm3, %v1193_v19 }
0x14de   :  { %v1231_v20 = vpop.f32.mrb[16].mxu1 }
0x14df   :  { %v1238_v22 = vrot.slane %v1231_v20, 1  ;;  %v1239_v23 = vrot.slane %v1231_v20, 2  ;;  %v3936_v24 = vpop.f32.mrb[17].mxu1 }
0x14e0   :  { %v1234_v25 = vpop.f32.mrb[18].mxu1 }
0x14e1   :  { %v1242_v26 = vadd.f32 %v1238_v22, %v4983_v39  ;;  %v1243_v27 = vadd.f32 %v1239_v23, %v4985_v40  ;;  %v3937_v28 = vpop.f32.mrb[19].mxu1 }
0x14e3   :  { %4255 = vtanh.f32 %v1242_v26  ;;  %v3760_v38 = vmul.f32 -1.442695, %v1242_v26  ;;  %v3761_v42 = vmul.f32 -1.442695, %v1243_v27 }
0x14e4   :  { %4257 = vtanh.f32 %v1243_v27 }
0x14e5   :  { %4259 = vpow2.f32 %v3760_v38 }
0x14e6   :  { %4261 = vpow2.f32 %v3761_v42 }
0x14ed   :  { %v4256_v29 = vpop.eup %4255 }
0x14ee   :  { %v4258_v30 = vpop.eup %4257  ;;  %1266 = vrot.lane.b32.xlu1 %v4256_v29, %s4724_s18 }
0x14ef   :  { %1268 = vrot.lane.b32.xlu0 %v4258_v30, %s4724_s18  ;;  %v4260_v54 = vpop.eup %4259 }
0x14f0   :  { %v4262_v56 = vpop.eup %4261  ;;  %v1250_v57 = vadd.f32 1.0, %v4260_v54 }
0x14f1   :  { %v1251_v58 = vadd.f32 1.0, %v4262_v56 }
0x14f2   :  { %4263 = vrcp.f32 %v1250_v57 }
0x14f3   :  { %4265 = vrcp.f32 %v1251_v58 }
0x14fc   :  { %v4264_v39 = vpop.eup %4263 }
0x14fd   :  { %v5208_v62 = vpop.eup %4265  ;;  %v1262_v12 = vmul.f32 %v4264_v39, %v1258_v7  ;;  %v1547_v7 = vld [vmem:[#allocation9 + $0x18] sm:$0xff] }
0x14fe   :  { %v1263_v15 = vmul.f32 %v5208_v62, %v1259_v9 }
0x1560   :  { %v1267_v40 = vpop.permute.xlu1 %1266 }
0x1561   :  { %v1269_v1 = vpop.permute.xlu0 %1268  ;;  %v1272_v5 = vmul.f32 %v4264_v39, %v1267_v40 }
0x1562   :  { %v1273_v6 = vmul.f32 %v5208_v62, %v1269_v1 }
0x1563   :  { %1276 = vrot.lane.b32.xlu1 %v1272_v5, %s4736_s4 }
0x1564   :  { %1278 = vrot.lane.b32.xlu0 %v1273_v6, %s4736_s4  ;;  %v1546_v6 = vld [vmem:[#allocation9 + $0x10] sm:$0xff] }
0x15d5   :  { %v1277_v13 = vpop.permute.xlu1 %1276 }
0x15d6   :  { %v1279_v14 = vpop.permute.xlu0 %1278  ;;  %v5216_v21 = vadd.f32 %v1277_v13, %v1262_v12  ;;  %v4081_v13 = vpack.c.bf16 %v1547_v7, %v1546_v6 }
0x15d7   :  { %v5218_v16 = vadd.f32 %v1279_v14, %v1263_v15  ;;  %v1530_v14 = vld [vmem:[%s6787_s1] sm:$0xff] }
0x15d8   :  { %6835 = vst [vmem:[#allocation31_spill] sm:$0xff] %v5216_v21  ;;  %4267 = vtanh.f32 %v5216_v21 }
0x15d9   :  { %6836 = vst [vmem:[#allocation32_spill] sm:$0xff] %v5218_v16  ;;  %4269 = vtanh.f32 %v5218_v16 }
0x15e2   :  { %v4268_v17 = vpop.eup %4267 }
0x15e3   :  { %v4270_v18 = vpop.eup %4269  ;;  %1288 = vrot.lane.b32.xlu1 %v4268_v17, %s4724_s18 }
0x15e4   :  { %1290 = vrot.lane.b32.xlu0 %v4270_v18, %s4724_s18  ;;  %s4737_s18 = smov 96  }
0x15e7   :  { %355 = vrot.lane.b32.xlu1 %v5007_v8, %s4736_s4  ;;  %v1447_v8 = vld [vmem:[#allocation10 + $0x8] sm:$0xff] }
0x15e8   :  { %489 = vrot.lane.b32.xlu0 %v5038_v55, %s4736_s4  ;;  %v1343_v55 = vld [vmem:[%s6791_s5] sm:$0xff] }
0x15eb   :  { %623 = vrot.lane.b32.xlu1 %v5069_v45, %s4736_s4 }
0x15ec   :  { %758 = vrot.lane.b32.xlu0 %v5102_v43, %s4736_s4 }
0x15ef   :  { %893 = vrot.lane.b32.xlu1 %v5134_v51, %s4736_s4 }
0x15f0   :  { %1028 = vrot.lane.b32.xlu0 %v5166_v59, %s4736_s4 }
0x15f3   :  { %1163 = vrot.lane.b32.xlu1 %v5193_v10, %s4736_s4  ;;  %v1545_v10 = vld [vmem:[#allocation9 + $0x8] sm:$0xff] }
0x15f4   :  { %491 = vrot.lane.b32.xlu0 %v5036_v53, %s4736_s4 }
0x15f7   :  { %357 = vrot.lane.b32.xlu1 %v5003_v4, %s4736_s4  ;;  %v1446_v4 = vld [vmem:[#allocation10] sm:$0xff] }
0x15f8   :  { %760 = vrot.lane.b32.xlu0 %v5104_v44, %s4736_s4  ;;  %v4069_v53 = vpack.c.bf16 %v1447_v8, %v1446_v4  ;;  %v1345_v44 = vld [vmem:[%s6791_s5 + $0x10] sm:$0xff]  ;;  %v1531_v4 = vld [vmem:[%s6787_s1 + $0x8] sm:$0xff] }
0x15f9   :  { %v1532_v8 = vld [vmem:[%s6787_s1 + $0x10] sm:$0xff] }
0x15fa   :  { %4070 = vmatprep.subr.bf16.mxu1 %v4069_v53 }
0x15fb   :  { %625 = vrot.lane.b32.xlu1 %v5071_v47, %s4736_s4  ;;  %4072 = vmatpush3.bf16.msra.mxu1 %v4069_v53  ;;  %v1449_v47 = vld [vmem:[#allocation10 + $0x18] sm:$0xff] }
0x15fc   :  { %1030 = vrot.lane.b32.xlu0 %v5168_v61, %s4736_s4  ;;  %v1533_v53 = vld [vmem:[%s6787_s1 + $0x18] sm:$0xff] }
0x15ff   :  { %895 = vrot.lane.b32.xlu1 %v5136_v52, %s4736_s4 }
0x1603   :  { %1165 = vrot.lane.b32.xlu1 %v5195_v11, %s4736_s4 }
0x1607   :  { %500 = vrot.lane.b32.xlu1 %v5031_v49, %s4737_s18  ;;  %v1344_v49 = vld [vmem:[%s6791_s5 + $0x8] sm:$0xff] }
0x1608   :  { %v4061_v45 = vpack.c.bf16 %v1344_v49, %v1343_v55  ;;  %v1534_v55 = vld [vmem:[%s6787_s1 + $0x20] sm:$0xff]  ;;  %v1535_v49 = vld [vmem:[%s6787_s1 + $0x28] sm:$0xff] }
0x160a   :  { %4062 = vmatprep.subr.bf16.mxu0 %v4061_v45 }
0x160b   :  { %634 = vrot.lane.b32.xlu1 %v5061_v36, %s4737_s18  ;;  %v1448_v36 = vld [vmem:[#allocation10 + $0x10] sm:$0xff]  ;;  %4064 = vmatpush3.bf16.msra.mxu0 %v4061_v45 }
0x160c   :  { %v4073_v43 = vpack.c.bf16 %v1449_v47, %v1448_v36  ;;  %v1536_v45 = vld [vmem:[%s6787_s1 + $0x30] sm:$0xff]  ;;  %v1537_v36 = vld [vmem:[%s6787_s1 + $0x38] sm:$0xff]  ;;  %v1538_v47 = vld [vmem:[%s6787_s1 + $0x40] sm:$0xff] }
0x160e   :  { %4074 = vmatprep.subr.bf16.mxu1 %v4073_v43 }
0x160f   :  { %904 = vrot.lane.b32.xlu1 %v5126_v33, %s4737_s18  ;;  %v1346_v33 = vld [vmem:[%s6791_s5 + $0x18] sm:$0xff]  ;;  %4076 = vmatpush3.bf16.msra.mxu1 %v4073_v43  ;;  %v1539_v43 = vld [vmem:[%s6787_s1 + $0x48] sm:$0xff] }
0x1610   :  { %v4065_v51 = vpack.c.bf16 %v1346_v33, %v1345_v44  ;;  %v1540_v44 = vld [vmem:[%s6787_s1 + $0x50] sm:$0xff]  ;;  %v1541_v33 = vld [vmem:[%s6787_s1 + $0x58] sm:$0xff] }
0x1612   :  { %4066 = vmatprep.subr.bf16.mxu0 %v4065_v51 }
0x1613   :  { %1174 = vrot.lane.b32.xlu1 %v5185_v2, %s4737_s18  ;;  %4068 = vmatpush3.bf16.msra.mxu0 %v4065_v51  ;;  %v1544_v2 = vld [vmem:[#allocation9] sm:$0xff] }
0x1614   :  { %v5273_v11 = vpack.c.bf16 %v1545_v10, %v1544_v2  ;;  %v1542_v51 = vld [vmem:[%s6787_s1 + $0x60] sm:$0xff]  ;;  %v6802_v2 = vlaneseq }
0x1616   :  { %4078 = vmatprep.subr.bf16.mxu0 %v5273_v11 }
0x1655   :  { %v1289_v52 = vpop.permute.xlu1 %1288 }
0x1656   :  { %v1291_v59 = vpop.permute.xlu0 %1290  ;;  %v1294_v61 = vmul.f32 %v4264_v39, %v1289_v52  ;;  %v1543_v52 = vld [vmem:[%s6787_s1 + $0x68] sm:$0xff] }
0x1657   :  { %v5276_v20 = vmul.f32 %v5208_v62, %v1291_v59  ;;  %v4738_v59 = vmov 1966171168  }
0x1658   :  { %1298 = vrot.lane.b32.xlu0 %v1294_v61, %s4736_s4  ;;  %v1728_v61 = vunpack.c.l.s4 %v4738_v59 }
0x1659   :  { %v356_v19 = vpop.permute.xlu1 %355  ;;  %6837 = vst [vmem:[#allocation33_spill] sm:$0xff] %v5276_v20 }
0x165a   :  { %v490_v22 = vpop.permute.xlu0 %489  ;;  %362 = vst.msk [vmem:[#allocation2] sm:$0x1] %vm361_vm4, %v356_v19  ;;  %v1729_v10 = vunpack.c.0.s8 %v1728_v61 }
0x165b   :  { %496 = vst.msk [vmem:[#allocation2] sm:$0x2] %vm6826_vm5, %v490_v22 }
0x165c   :  { %1300 = vrot.lane.b32.xlu0 %v5276_v20, %s4736_s4 }
0x165d   :  { %v624_v23 = vpop.permute.xlu1 %623 }
0x165e   :  { %v759_v24 = vpop.permute.xlu0 %758  ;;  %630 = vst.msk [vmem:[#allocation2] sm:$0x4] %vm6827_vm6, %v624_v23 }
0x165f   :  { %765 = vst.msk [vmem:[#allocation2] sm:$0x8] %vm6824_vm7, %v759_v24 }
0x1660   :  { %366 = vrot.lane.b32.xlu0 %v4998_v63, %s4737_s18 }
0x1661   :  { %v894_v25 = vpop.permute.xlu1 %893 }
0x1662   :  { %v1029_v26 = vpop.permute.xlu0 %1028  ;;  %900 = vst.msk [vmem:[#allocation2] sm:$0x10] %vm6825_vm8, %v894_v25 }
0x1663   :  { %1035 = vst.msk [vmem:[#allocation2] sm:$0x20] %vm6822_vm9, %v1029_v26 }
0x1664   :  { %769 = vrot.lane.b32.xlu0 %v5094_v31, %s4737_s18 }
0x1665   :  { %v1164_v27 = vpop.permute.xlu1 %1163 }
0x1666   :  { %v492_v28 = vpop.permute.xlu0 %491  ;;  %1170 = vst.msk [vmem:[#allocation2] sm:$0x40] %vm6823_vm10, %v1164_v27 }
0x1667   :  { %497 = vst.msk [vmem:[#allocation2 + $0x8] sm:$0x2] %vm6826_vm5, %v492_v28 }
0x1668   :  { %1039 = vrot.lane.b32.xlu0 %v5158_v48, %s4737_s18 }
0x1669   :  { %v358_v63 = vpop.permute.xlu1 %357 }
0x166a   :  { %v761_v29 = vpop.permute.xlu0 %760  ;;  %363 = vst.msk [vmem:[#allocation2 + $0x8] sm:$0x1] %vm361_vm4, %v358_v63 }
0x166b   :  { %766 = vst.msk [vmem:[#allocation2 + $0x8] sm:$0x8] %vm6824_vm7, %v761_v29 }
0x166d   :  { %v626_v30 = vpop.permute.xlu1 %625 }
0x166e   :  { %v1031_v38 = vpop.permute.xlu0 %1030  ;;  %631 = vst.msk [vmem:[#allocation2 + $0x8] sm:$0x4] %vm6827_vm6, %v626_v30 }
0x166f   :  { %1036 = vst.msk [vmem:[#allocation2 + $0x8] sm:$0x20] %vm6822_vm9, %v1031_v38 }
0x1671   :  { %v896_v31 = vpop.permute.xlu1 %895 }
0x1672   :  { %901 = vst.msk [vmem:[#allocation2 + $0x8] sm:$0x10] %vm6825_vm8, %v896_v31 }
0x1675   :  { %v1166_v42 = vpop.permute.xlu1 %1165 }
0x1676   :  { %1171 = vst.msk [vmem:[#allocation2 + $0x8] sm:$0x40] %vm6823_vm10, %v1166_v42 }
0x1679   :  { %v501_v54 = vpop.permute.xlu1 %500 }
0x167a   :  { %506 = vst.msk [vmem:[#allocation3] sm:$0x2] %vm6826_vm5, %v501_v54  ;;  %vm2936_vm5 = vcmask 1046534  }
0x167d   :  { %v635_v48 = vpop.permute.xlu1 %634 }
0x167e   :  { %640 = vst.msk [vmem:[#allocation3] sm:$0x4] %vm6827_vm6, %v635_v48  ;;  %vm2938_vm6 = vcmask 1047559  }
0x1681   :  { %v905_v56 = vpop.permute.xlu1 %904 }
0x1682   :  { %910 = vst.msk [vmem:[#allocation3] sm:$0x10] %vm6825_vm8, %v905_v56  ;;  %vm2934_vm8 = vcmask 1045509  }
0x1685   :  { %v1175_v57 = vpop.permute.xlu1 %1174 }
0x1686   :  { %1180 = vst.msk [vmem:[#allocation3] sm:$0x40] %vm6823_vm10, %v1175_v57  ;;  %vm2930_vm10 = vcmask 1043459  }
0x16ca   :  { %v1299_v58 = vpop.permute.xlu0 %1298 }
0x16cb   :  { %1305 = vst.msk [vmem:[#allocation2] sm:$0x80] %vm1304_vm11, %v1299_v58  ;;  %1321 = vst.msk [vmem:[#allocation16 - $0x7] sm:$0x80] %vm1304_vm11, %v1299_v58 }
0x16ce   :  { %v1301_v39 = vpop.permute.xlu0 %1300 }
0x16cf   :  { %1306 = vst.msk [vmem:[#allocation2 + $0x8] sm:$0x80] %vm1304_vm11, %v1301_v39 }
0x16d2   :  { %v367_v40 = vpop.permute.xlu0 %366  ;;  %v1330_v62 = vld [vmem:[#allocation2] sm:$0xff] }
0x16d3   :  { %372 = vst.msk [vmem:[#allocation3] sm:$0x1] %vm361_vm4, %v367_v40  ;;  %3957 = vmatprep.mubr.msk.f32.mxu1 %vm6821_vm3, %v1330_v62  ;;  %v1335_v1 = vrot.slane %v1330_v62, 7 }
0x16d5   :  { %v1341_v5 = vsel %vm6820_vm12, 0.0, %v1335_v1 }
0x16d6   :  { %v770_v9 = vpop.permute.xlu0 %769  ;;  %3946 = vmatprep.mubr.msk.f32.mxu0 %vm6821_vm3, %v1341_v5  ;;  %v1331_v12 = vld [vmem:[#allocation2 + $0x8] sm:$0xff] }
0x16d7   :  { %775 = vst.msk [vmem:[#allocation3] sm:$0x8] %vm6824_vm7, %v770_v9  ;;  %3958 = vmatmul.mubr.msk.f32.vlgmr.msra.gmra.mrb[20].mxu1 %vm6821_vm3, %v1331_v12  ;;  %v1338_v15 = vrot.slane %v1331_v12, 7  ;;  %vm2932_vm7 = vcmask 1044484  }
0x16d8   :  { %4003 = vmatprep.mubr.msk.f32.mxu1 %vm6819_vm0, %v6800_v0  ;;  %v5512_v0 = vld [vmem:[%s6795_s9] ss:$0 sm:$0xff]  ;;  %vm2673_vm0 = vcmask 326912  }
0x16d9   :  { %v1342_v17 = vsel %vm6820_vm12, 0.0, %v1338_v15  ;;  %vm2680_vm12 = vcmask 392512  }
0x16da   :  { %v1040_v18 = vpop.permute.xlu0 %1039  ;;  %3947 = vmatmul.mubr.msk.f32.vlgmr.msra.gmra.mrb[16].mxu0 %vm6821_vm3, %v1342_v17 }
0x16db   :  { %1045 = vst.msk [vmem:[#allocation3] sm:$0x20] %vm6822_vm9, %v1040_v18  ;;  %4080 = vmatpush3.bf16.msra.mxu0 %v5273_v11  ;;  %3968 = vmatprep.mubr.msk.f32.mxu0 %vm6821_vm3, %v1530_v14  ;;  %v5377_v11 = vshrl.u32 %v6802_v2, 7  ;;  %vm2928_vm9 = vcmask 1042434  }
0x16dc   :  { %4082 = vmatprep.subr.bf16.mxu0 %v4081_v13 }
0x16dd   :  { %6838 = vst [vmem:[#allocation34_spill] sm:$0xff] %v5377_v11  ;;  %v1732_v19 = vsub.s32 %v1729_v10, %v5377_v11  ;;  %v1777_v26 = vsub.s32 0, %v5377_v11 }
0x16df   :  { %4084 = vmatpush3.bf16.msra.mxu0 %v4081_v13 }
0x16e2   :  { %3969 = vmatmul.mubr.msk.f32.vlgmr.msra.gmra.mrb[18].mxu0 %vm6821_vm3, %v1531_v4 }
0x16e3   :  { %3971 = vmatprep.mubr.msk.f32.mxu0 %vm6821_vm3, %v1532_v8 }
0x16e6   :  { %3972 = vmatmul.mubr.msk.f32.gmra.mrb[20].mxu0 %vm6821_vm3, %v1533_v53 }
0x16e7   :  { %3974 = vmatprep.mubr.msk.f32.mxu0 %vm6821_vm3, %v1534_v55 }
0x16ea   :  { %3975 = vmatmul.mubr.msk.f32.gmra.mrb[22].mxu0 %vm6821_vm3, %v1535_v49 }
0x16eb   :  { %3977 = vmatprep.mubr.msk.f32.mxu0 %vm6821_vm3, %v1536_v45 }
0x16ee   :  { %3978 = vmatmul.mubr.msk.f32.gmra.mrb[24].mxu0 %vm6821_vm3, %v1537_v36 }
0x16ef   :  { %3980 = vmatprep.mubr.msk.f32.mxu0 %vm6821_vm3, %v1538_v47 }
0x16f2   :  { %3981 = vmatmul.mubr.msk.f32.gmra.mrb[26].mxu0 %vm6821_vm3, %v1539_v43 }
0x16f3   :  { %3983 = vmatprep.mubr.msk.f32.mxu0 %vm6821_vm3, %v1540_v44 }
0x16f6   :  { %3984 = vmatmul.mubr.msk.f32.gmra.mrb[28].mxu0 %vm6821_vm3, %v1541_v33 }
0x16f7   :  { %3986 = vmatprep.mubr.msk.f32.mxu0 %vm6821_vm3, %v1542_v51 }
0x16fa   :  { %3987 = vmatmul.mubr.msk.f32.gmra.mrb[30].mxu0 %vm6821_vm3, %v1543_v52  ;;  %vm2687_vm3 = vcmask 458112  }
0x17aa   :  { %v5380_v22 = vpop.f32.mrb[20].mxu1 }
0x17ab   :  { %6839 = vst [vmem:[#allocation35_spill] sm:$0xff] %v5380_v22  ;;  %v2160_v23 = vcombine.high %v5380_v22, %v5380_v22  ;;  %v2167_v24 = vrot.slane %v5380_v22, %v1732_v19  ;;  %v5385_v25 = vpop.f32.mrb[21].mxu1 }
0x17ac   :  { %6840 = vst [vmem:[#allocation36_spill] sm:$0xff] %v5385_v25  ;;  %v1726_v27 = vcombine.high %v5385_v25, %v5385_v25  ;;  %v1733_v28 = vrot.slane %v5385_v25, %v1732_v19 }
0x17ad   :  { %v2174_v63 = vrot.slane %v2160_v23, %v1732_v19  ;;  %v2175_v29 = vcombine.high %v2167_v24, %v2167_v24  ;;  %v2183_v30 = vrot.slane %v2167_v24, %v1732_v19  ;;  %v3948_v38 = vpop.f32.mrb[16].mxu0 }
0x17ae   :  { %v1740_v31 = vrot.slane %v1726_v27, %v1732_v19  ;;  %v1741_v42 = vcombine.high %v1733_v28, %v1733_v28  ;;  %v1749_v54 = vrot.slane %v1733_v28, %v1732_v19  ;;  %v5392_v48 = vadd.f32 %v3948_v38, %v4987_v41  ;;  %v1419_v56 = vpop.f32.mrb[17].mxu0 }
0x17af   :  { %v2176_v57 = vcombine.high %v2174_v63, %v2174_v63  ;;  %v2190_v58 = vrot.slane %v2174_v63, %v1732_v19  ;;  %v2197_v39 = vrot.slane %v2175_v29, %v1732_v19  ;;  %v2205_v40 = vcombine.high %v2183_v30, %v2183_v30 }
0x17b0   :  { %6841 = vst [vmem:[#allocation37_spill] sm:$0xff] %v5392_v48  ;;  %v5394_v62 = vrot.slane %v2183_v30, %v1777_v26  ;;  %v1742_v1 = vcombine.high %v1740_v31, %v1740_v31  ;;  %v1756_v5 = vrot.slane %v1740_v31, %v1732_v19  ;;  %v1763_v6 = vrot.slane %v1741_v42, %v1732_v19 }
0x17b1   :  { %v2204_v7 = vrot.slane %v2176_v57, %v1732_v19  ;;  %v2206_v9 = vcombine.high %v2190_v58, %v2190_v58  ;;  %v2207_v12 = vcombine.high %v2197_v39, %v2197_v39  ;;  %v5396_v15 = vrot.slane %v2197_v39, %v1777_v26 }
0x17b2   :  { %v5398_v13 = vrot.slane %v2205_v40, %v1777_v26  ;;  %v5400_v14 = vrot.slane %v2190_v58, %v1777_v26  ;;  %v1770_v41 = vrot.slane %v1742_v1, %v1732_v19  ;;  %v1771_v17 = vcombine.high %v1749_v54, %v1749_v54 }
0x17b3   :  { %v2208_v18 = vcombine.high %v2204_v7, %v2204_v7  ;;  %v5402_v4 = vrot.slane %v2207_v12, %v1777_v26  ;;  %v5404_v8 = vrot.slane %v2204_v7, %v1777_v26  ;;  %v5406_v53 = vrot.slane %v2206_v9, %v1777_v26 }
0x17b4   :  { %v1772_v55 = vcombine.high %v1756_v5, %v1756_v5  ;;  %v1773_v49 = vcombine.high %v1763_v6, %v1763_v6  ;;  %v1774_v45 = vcombine.high %v1770_v41, %v1770_v41  ;;  %v5408_v36 = vrot.slane %v1749_v54, %v1777_v26 }
0x17b5   :  { %6842 = vst [vmem:[#allocation38_spill] sm:$0xff] %v5402_v4  ;;  %v5410_v47 = vrot.slane %v2208_v18, %v1777_v26  ;;  %v5412_v43 = vrot.slane %v1763_v6, %v1777_v26  ;;  %v5414_v44 = vrot.slane %v1771_v17, %v1777_v26  ;;  %v5416_v33 = vrot.slane %v1756_v5, %v1777_v26  ;;  %v3970_v51 = vpop.f32.mrb[18].mxu0 }
0x17b6   :  { %v5418_v52 = vrot.slane %v1773_v49, %v1777_v26  ;;  %v5420_v59 = vrot.slane %v1770_v41, %v1777_v26  ;;  %v5422_v61 = vrot.slane %v1772_v55, %v1777_v26  ;;  %v1656_v10 = vpop.f32.mrb[19].mxu0  ;;  %v5424_v19 = vrot.slane %v1774_v45, %v1777_v26 }
0x17b7   :  { %v5427_v23 = vadd.f32 %v1419_v56, %v4978_v35  ;;  %v1823_v24 = vadd.f32 %v3970_v51, %v5412_v43  ;;  %v1816_v27 = vadd.f32 %v3970_v51, %v5408_v36  ;;  %v1830_v28 = vadd.f32 %v3970_v51, %v5414_v44 }
0x17b8   :  { %v1844_v63 = vadd.f32 %v3970_v51, %v5416_v33  ;;  %v1822_v29 = vadd.f32 %v5412_v43, %v1656_v10  ;;  %v1815_v30 = vadd.f32 %v5408_v36, %v1656_v10  ;;  %v1829_v31 = vadd.f32 %v5414_v44, %v1656_v10 }
0x17b9   :  { %6843 = vst [vmem:[#allocation39_spill] sm:$0xff] %v5427_v23  ;;  %v3973_v38 = vpop.f32.mrb[20].mxu0  ;;  %v1836_v26 = vadd.f32 %v5418_v52, %v1656_v10  ;;  %4271 = vtanh.f32 %v1823_v24  ;;  %v1837_v35 = vadd.f32 %v3970_v51, %v5418_v52  ;;  %v1843_v54 = vadd.f32 %v5416_v33, %v1656_v10 }
0x17ba   :  { %v1666_v42 = vpop.f32.mrb[21].mxu0  ;;  %v5440_v56 = vadd.f32 %v5420_v59, %v1656_v10  ;;  %v5443_v57 = vadd.f32 %v3970_v51, %v5420_v59  ;;  %v5446_v58 = vadd.f32 %v5422_v61, %v1656_v10  ;;  %v5449_v39 = vadd.f32 %v3970_v51, %v5422_v61 }
0x17bb   :  { %4273 = vtanh.f32 %v1816_v27  ;;  %v5452_v40 = vadd.f32 %v3970_v51, %v5424_v19  ;;  %v5455_v1 = vadd.f32 %v5424_v19, %v1656_v10  ;;  %v5458_v5 = vadd.f32 %v3973_v38, %v5412_v43 }
0x17bc   :  { %4275 = vtanh.f32 %v1830_v28  ;;  %v5461_v7 = vadd.f32 %v3973_v38, %v5408_v36  ;;  %v5464_v9 = vadd.f32 %v3973_v38, %v5414_v44  ;;  %v5467_v12 = vadd.f32 %v3973_v38, %v5418_v52 }
0x17bd   :  { %v3976_v6 = vpop.f32.mrb[22].mxu0  ;;  %4277 = vtanh.f32 %v1844_v63  ;;  %v5470_v17 = vadd.f32 %v3973_v38, %v5420_v59  ;;  %v5473_v18 = vadd.f32 %v3973_v38, %v5416_v33  ;;  %v5476_v55 = vadd.f32 %v3973_v38, %v5424_v19 }
0x17be   :  { %v1676_v41 = vpop.f32.mrb[23].mxu0  ;;  %4279 = vtanh.f32 %v1822_v29  ;;  %v5479_v49 = vadd.f32 %v3973_v38, %v5422_v61  ;;  %v5482_v45 = vadd.f32 %v5412_v43, %v1666_v42  ;;  %v5485_v51 = vadd.f32 %v5408_v36, %v1666_v42 }
0x17bf   :  { %4281 = vtanh.f32 %v1815_v30  ;;  %v5488_v10 = vadd.f32 %v5416_v33, %v1666_v42  ;;  %v5491_v24 = vadd.f32 %v5414_v44, %v1666_v42  ;;  %v5494_v27 = vadd.f32 %v5420_v59, %v1666_v42 }
0x17c0   :  { %v5499_v63 = vadd.f32 %v5418_v52, %v1666_v42  ;;  %v5502_v29 = vadd.f32 %v5424_v19, %v1666_v42  ;;  %v5505_v38 = vadd.f32 %v5422_v61, %v1666_v42  ;;  %4283 = vtanh.f32 %v1836_v26 }
0x17c1   :  { %v5496_v28 = vpop.f32.mrb[24].mxu0  ;;  %v5515_v2 = vadd.f32 %v3976_v6, %v5412_v43  ;;  %v5518_v20 = vadd.f32 %v3976_v6, %v5408_v36  ;;  %v5521_v25 = vadd.f32 %v3976_v6, %v5414_v44  ;;  %v5524_v42 = vadd.f32 %v3976_v6, %v5418_v52 }
0x17c2   :  { %v5507_v30 = vpop.f32.mrb[25].mxu0  ;;  %v5527_v22 = vadd.f32 %v3976_v6, %v5416_v33  ;;  %v5530_v48 = vadd.f32 %v3976_v6, %v5420_v59  ;;  %4285 = vtanh.f32 %v1829_v31  ;;  %v5533_v26 = vadd.f32 %v3976_v6, %v5424_v19 }
0x17c3   :  { %v4272_v23 = vpop.eup %4271  ;;  %v5536_v16 = vadd.f32 %v3976_v6, %v5422_v61  ;;  %v5542_v3 = vadd.f32 %v5412_v43, %v1676_v41  ;;  %v5545_v46 = vadd.f32 %v5408_v36, %v1676_v41  ;;  %4287 = vtanh.f32 %v1843_v54 }
0x17c4   :  { %v1941_v32 = vmul.f32 %v4272_v23, %v5512_v0  ;;  %v5550_v31 = vadd.f32 %v5416_v33, %v1676_v41  ;;  %v5553_v6 = vadd.f32 %v5414_v44, %v1676_v41  ;;  %v5558_v11 = vadd.f32 %v5422_v61, %v1676_v41 }
0x17c5   :  { %v5538_v50 = vpop.f32.mrb[26].mxu0  ;;  %6844 = vst [vmem:[#allocation40_spill] sm:$0xff] %v5542_v3  ;;  %6845 = vst [vmem:[#allocation41_spill] sm:$0xff] %v5545_v46  ;;  %v4274_v34 = vpop.eup %4273  ;;  %4289 = vtanh.f32 %v1837_v35  ;;  %v5562_v54 = vadd.f32 %v5418_v52, %v1676_v41 }
0x17c6   :  { %v5547_v21 = vpop.f32.mrb[27].mxu0  ;;  %6846 = vst [vmem:[#allocation42_spill] sm:$0xff] %v5550_v31  ;;  %6847 = vst [vmem:[#allocation43_spill] sm:$0xff] %v5553_v6  ;;  %v4276_v37 = vpop.eup %4275  ;;  %v2015_v60 = vsel %vm1989_vm13, %v1941_v32, 0.0  ;;  %v1934_v23 = vmul.f32 %v4274_v34, %v5512_v0  ;;  %v5565_v31 = vadd.f32 %v5424_v19, %v1676_v41  ;;  %4291 = vtanh.f32 %v5443_v57 }
0x17c7   :  { %6848 = vst [vmem:[#allocation44_spill] sm:$0xff] %v5558_v11  ;;  %v4278_v4 = vpop.eup %4277  ;;  %2016 = vadd.xlane.f32.xlu1 %v2015_v60  ;;  %v1948_v3 = vmul.f32 %v4276_v37, %v5512_v0  ;;  %6849 = vst [vmem:[#allocation45_spill] sm:$0xff] %v5562_v54  ;;  %v5572_v11 = vadd.f32 %v5420_v59, %v1676_v41  ;;  %4293 = vtanh.f32 %v5440_v56 }
0x17c8   :  { %6850 = vst [vmem:[#allocation46_spill] sm:$0xff] %v5565_v31  ;;  %v4280_v6 = vpop.eup %4279  ;;  %v1993_v46 = vsel %vm1989_vm13, %v1934_v23, 0.0  ;;  %v1962_v34 = vmul.f32 %v4278_v4, %v5512_v0  ;;  %v5581_v23 = vadd.f32 %v5496_v28, %v5394_v62  ;;  %v5586_v4 = vadd.f32 %v5496_v28, %v5400_v14 }
0x17c9   :  { %v5568_v32 = vpop.f32.mrb[28].mxu0  ;;  %v4282_v60 = vpop.eup %4281  ;;  %1994 = vadd.xlane.f32.xlu0 %v1993_v46  ;;  %v2036_v35 = vsel %vm1989_vm13, %v1948_v3, 0.0  ;;  %v1940_v3 = vmul.f32 %v4280_v6, %v5512_v0  ;;  %v5594_v57 = vadd.f32 %v5496_v28, %v5396_v15  ;;  %4295 = vtanh.f32 %v5449_v39 }
0x17ca   :  { %v5574_v37 = vpop.f32.mrb[29].mxu0  ;;  %v1933_v31 = vmul.f32 %v4282_v60, %v5512_v0  ;;  %6851 = vst [vmem:[#allocation47_spill] sm:$0xff] %v5581_v23  ;;  %v4284_v54 = vpop.eup %4283  ;;  %6852 = vst [vmem:[#allocation48_spill] sm:$0xff] %v5586_v4  ;;  %v2078_v46 = vsel %vm1989_vm13, %v1962_v34, 0.0  ;;  %v5607_v6 = vadd.f32 %v5496_v28, %v5398_v13  ;;  %4297 = vtanh.f32 %v5446_v58 }
0x17cb   :  { %2037 = vadd.xlane.f32.xlu1 %v2036_v35  ;;  %v1954_v56 = vmul.f32 %v4284_v54, %v5512_v0  ;;  %v5602_v35 = vadd.f32 %v5496_v28, %v5410_v47  ;;  %v2012_v39 = vsel %vm1989_vm13, %v1940_v3, 0.0  ;;  %4299 = vtanh.f32 %v5455_v1 }
0x17cc   :  { %v4286_v60 = vpop.eup %4285  ;;  %v1990_v34 = vsel %vm1989_vm13, %v1933_v31, 0.0  ;;  %6854 = vst [vmem:[#allocation50_spill] sm:$0xff] %v5607_v6  ;;  %v5622_v31 = vadd.f32 %v5496_v28, %v5406_v53  ;;  %4301 = vtanh.f32 %v5452_v40 }
0x17cd   :  { %v5589_v41 = vpop.f32.mrb[30].mxu0  ;;  %2079 = vadd.xlane.f32.xlu0 %v2078_v46  ;;  %6853 = vst [vmem:[#allocation49_spill] sm:$0xff] %v5602_v35  ;;  %v4288_v4 = vpop.eup %4287  ;;  %v5612_v46 = vadd.f32 %v5496_v28, %v5404_v8  ;;  %v1947_v54 = vmul.f32 %v4286_v60, %v5512_v0  ;;  %v5618_v35 = vadd.f32 %v5412_v43, %v5507_v30  ;;  %v2054_v58 = vsel %vm1989_vm13, %v1954_v56, 0.0 }
0x17ce   :  { %v5596_v23 = vpop.f32.mrb[31].mxu0  ;;  %v1961_v3 = vmul.f32 %v4288_v4, %v5512_v0  ;;  %v5633_v43 = vadd.f32 %v5422_v61, %v5507_v30  ;;  %v5637_v60 = vadd.f32 %v5408_v36, %v5507_v30  ;;  %v5652_v36 = vadd.f32 %v5416_v33, %v5507_v30 }
0x17cf   :  { %1991 = vadd.xlane.f32.xlu1 %v1990_v34  ;;  %v4290_v6 = vpop.eup %4289  ;;  %v5628_v34 = vadd.f32 %v5418_v52, %v5507_v30  ;;  %v5646_v52 = vadd.f32 %v5414_v44, %v5507_v30  ;;  %v2033_v1 = vsel %vm1989_vm13, %v1947_v54, 0.0  ;;  %4303 = vtanh.f32 %v5458_v5 }
0x17d0   :  { %v4292_v56 = vpop.eup %4291  ;;  %v1955_v61 = vmul.f32 %v4290_v6, %v5512_v0  ;;  %v5661_v44 = vadd.f32 %v5420_v59, %v5507_v30  ;;  %v2075_v40 = vsel %vm1989_vm13, %v1961_v3, 0.0  ;;  %v5667_v33 = vadd.f32 %v5538_v50, %v5400_v14 }
0x17d1   :  { %2013 = vadd.xlane.f32.xlu0 %v2012_v39  ;;  %v5641_v39 = vadd.f32 %v5424_v19, %v5507_v30  ;;  %v5656_v19 = vadd.f32 %v5538_v50, %v5396_v15  ;;  %v4294_v4 = vpop.eup %4293  ;;  %v1969_v6 = vmul.f32 %v4292_v56, %v5512_v0  ;;  %4305 = vtanh.f32 %v5461_v7 }
0x17d2   :  { %v2057_v5 = vsel %vm1989_vm13, %v1955_v61, 0.0  ;;  %v1968_v59 = vmul.f32 %v4294_v4, %v5512_v0  ;;  %v5678_v30 = vadd.f32 %v5538_v50, %v5394_v62  ;;  %4307 = vtanh.f32 %v5464_v9 }
0x17d3   :  { %2055 = vadd.xlane.f32.xlu1 %v2054_v58  ;;  %v4296_v54 = vpop.eup %4295  ;;  %v5672_v58 = vadd.f32 %v5538_v50, %v5404_v8  ;;  %v5683_v56 = vadd.f32 %v5538_v50, %v5410_v47  ;;  %v2099_v7 = vsel %vm1989_vm13, %v1969_v6, 0.0  ;;  %v5689_v61 = vadd.f32 %v5538_v50, %v5398_v13 }
0x17d4   :  { %v4298_v3 = vpop.eup %4297  ;;  %4309 = vtanh.f32 %v5467_v12 }
0x17d5   :  { %2034 = vadd.xlane.f32.xlu0 %v2033_v1  ;;  %6855 = vst [vmem:[#allocation51_spill] sm:$0xff] %v5683_v56  ;;  %v1976_v1 = vmul.f32 %v4296_v54, %v5512_v0  ;;  %v4300_v4 = vpop.eup %4299  ;;  %v1975_v9 = vmul.f32 %v4298_v3, %v5512_v0  ;;  %4311 = vtanh.f32 %v5470_v17 }
0x17d6   :  { %v4302_v56 = vpop.eup %4301  ;;  %v1982_v54 = vmul.f32 %v4300_v4, %v5512_v0  ;;  %4313 = vtanh.f32 %v5473_v18  ;;  %v5718_v18 = vadd.f32 %v5398_v13, %v5547_v21 }
0x17d7   :  { %2076 = vadd.xlane.f32.xlu1 %v2075_v40  ;;  %v2096_v40 = vsel %vm1989_vm13, %v1968_v59, 0.0  ;;  %v2120_v6 = vsel %vm1989_vm13, %v1976_v1, 0.0  ;;  %v2117_v59 = vsel %vm1989_vm13, %v1975_v9, 0.0  ;;  %v1983_v3 = vmul.f32 %v4302_v56, %v5512_v0 }
0x17d8   :  { %4315 = vtanh.f32 %v5476_v55  ;;  %v2138_v1 = vsel %vm1989_vm13, %v1982_v54, 0.0 }
0x17d9   :  { %2058 = vadd.xlane.f32.xlu0 %v2057_v5  ;;  %v5696_v5 = vadd.f32 %v5394_v62, %v5547_v21  ;;  %v4304_v12 = vpop.eup %4303  ;;  %4317 = vtanh.f32 %v5479_v49  ;;  %v2141_v56 = vsel %vm1989_vm13, %v1983_v3, 0.0 }
0x17da   :  { %v1943_v4 = vmul.f32 %v4304_v12, %v5512_v0  ;;  %4319 = vtanh.f32 %v5482_v45  ;;  %v5727_v12 = vadd.f32 %v5400_v14, %v5547_v21 }
0x17db   :  { %2100 = vadd.xlane.f32.xlu1 %v2099_v7  ;;  %v5703_v7 = vadd.f32 %v5538_v50, %v5406_v53  ;;  %v4306_v17 = vpop.eup %4305  ;;  %4321 = vtanh.f32 %v5485_v51 }
0x17dc   :  { %v1936_v9 = vmul.f32 %v4306_v17, %v5512_v0  ;;  %v2021_v55 = vsel %vm1989_vm13, %v1943_v4, 0.0  ;;  %v5738_v17 = vadd.f32 %v5410_v47, %v5547_v21  ;;  %4323 = vtanh.f32 %v5488_v10 }
0x17dd   :  { %2097 = vadd.xlane.f32.xlu0 %v2096_v40  ;;  %6856 = vst [vmem:[#allocation52_spill] sm:$0xff] %v5703_v7  ;;  %v5710_v40 = vadd.f32 %v5396_v15, %v5547_v21  ;;  %v4308_v7 = vpop.eup %4307  ;;  %4325 = vtanh.f32 %v5491_v24 }
0x17de   :  { %v1950_v54 = vmul.f32 %v4308_v7, %v5512_v0  ;;  %v1999_v3 = vsel %vm1989_vm13, %v1936_v9, 0.0  ;;  %4327 = vtanh.f32 %v5494_v27 }
0x17df   :  { %2121 = vadd.xlane.f32.xlu1 %v2120_v6  ;;  %v4310_v6 = vpop.eup %4309  ;;  %4329 = vtanh.f32 %v5499_v63 }
0x17e0   :  { %v4312_v49 = vpop.eup %4311  ;;  %v1957_v45 = vmul.f32 %v4310_v6, %v5512_v0  ;;  %v2042_v51 = vsel %vm1989_vm13, %v1950_v54, 0.0  ;;  %v5754_v6 = vadd.f32 %v5568_v32, %v5394_v62  ;;  %v5760_v54 = vadd.f32 %v5568_v32, %v5400_v14 }
0x17e1   :  { %2118 = vadd.xlane.f32.xlu0 %v2117_v59  ;;  %v5732_v59 = vadd.f32 %v5404_v8, %v5547_v21  ;;  %v4314_v7 = vpop.eup %4313  ;;  %v1971_v4 = vmul.f32 %v4312_v49, %v5512_v0  ;;  %4331 = vtanh.f32 %v5502_v29 }
0x17e2   :  { %v4316_v9 = vpop.eup %4315  ;;  %v2063_v10 = vsel %vm1989_vm13, %v1957_v45, 0.0  ;;  %6857 = vst [vmem:[#allocation53_spill] sm:$0xff] %v5760_v54  ;;  %v5771_v45 = vadd.f32 %v5568_v32, %v5406_v53  ;;  %v5778_v54 = vadd.f32 %v5568_v32, %v5410_v47  ;;  %4333 = vtanh.f32 %v5505_v38 }
0x17e3   :  { %2139 = vadd.xlane.f32.xlu1 %v2138_v1  ;;  %v5743_v1 = vadd.f32 %v5406_v53, %v5547_v21  ;;  %v4318_v49 = vpop.eup %4317  ;;  %v2105_v24 = vsel %vm1989_vm13, %v1971_v4, 0.0  ;;  %v5783_v4 = vadd.f32 %v5568_v32, %v5404_v8  ;;  %4335 = vtanh.f32 %v5518_v20 }
0x17e4   :  { %v1978_v27 = vmul.f32 %v4318_v49, %v5512_v0  ;;  %4337 = vtanh.f32 %v5515_v2  ;;  %v5815_v20 = vadd.f32 %v5400_v14, %v5574_v37 }
0x17e5   :  { %2142 = vadd.xlane.f32.xlu0 %v2141_v56  ;;  %v5749_v56 = vadd.f32 %v5568_v32, %v5396_v15  ;;  %4339 = vtanh.f32 %v5524_v42 }
0x17e6   :  { %v2126_v29 = vsel %vm1989_vm13, %v1978_v27, 0.0  ;;  %6863 = vst [vmem:[#allocation59_spill] sm:$0xff] %v5815_v20  ;;  %4341 = vtanh.f32 %v5521_v25 }
0x17e7   :  { %2022 = vadd.xlane.f32.xlu1 %v2021_v55  ;;  %v1964_v55 = vmul.f32 %v4314_v7, %v5512_v0  ;;  %v4320_v7 = vpop.eup %4319  ;;  %4343 = vtanh.f32 %v5530_v48 }
0x17e8   :  { %v1942_v63 = vmul.f32 %v4320_v7, %v5512_v0  ;;  %4345 = vtanh.f32 %v5527_v22 }
0x17e9   :  { %2000 = vadd.xlane.f32.xlu0 %v1999_v3  ;;  %v5765_v3 = vadd.f32 %v5568_v32, %v5398_v13  ;;  %4347 = vtanh.f32 %v5536_v16 }
0x17ea   :  { %4349 = vtanh.f32 %v5533_v26 }
0x17eb   :  { %2043 = vadd.xlane.f32.xlu1 %v2042_v51  ;;  %6858 = vst [vmem:[#allocation54_spill] sm:$0xff] %v5765_v3  ;;  %v1985_v51 = vmul.f32 %v4316_v9, %v5512_v0  ;;  %v4322_v3 = vpop.eup %4321 }
0x17ec   :  { %v4324_v49 = vpop.eup %4323 }
0x17ed   :  { %2064 = vadd.xlane.f32.xlu0 %v2063_v10  ;;  %v2084_v10 = vsel %vm1989_vm13, %v1964_v55, 0.0  ;;  %v2147_v9 = vsel %vm1989_vm13, %v1985_v51, 0.0  ;;  %v5789_v55 = vadd.f32 %v5396_v15, %v5574_v37  ;;  %v5800_v51 = vadd.f32 %v5398_v13, %v5574_v37  ;;  %v4326_v7 = vpop.eup %4325 }
0x17ee   :  { %v1963_v38 = vmul.f32 %v4324_v49, %v5512_v0  ;;  %v5821_v49 = vadd.f32 %v5410_v47, %v5574_v37 }
0x17ef   :  { %2106 = vadd.xlane.f32.xlu1 %v2105_v24  ;;  %6859 = vst [vmem:[#allocation55_spill] sm:$0xff] %v5789_v55  ;;  %v5794_v24 = vadd.f32 %v5394_v62, %v5574_v37  ;;  %6861 = vst [vmem:[#allocation57_spill] sm:$0xff] %v5800_v51  ;;  %v4328_v55 = vpop.eup %4327 }
0x17f0   :  { %v4330_v51 = vpop.eup %4329  ;;  %v1970_v2 = vmul.f32 %v4328_v55, %v5512_v0  ;;  %6864 = vst [vmem:[#allocation60_spill] sm:$0xff] %v5821_v49  ;;  %v6867_v49 = vld [vmem:[#allocation41_spill] sm:$0xff] }
0x17f1   :  { %2085 = vadd.xlane.f32.xlu0 %v2084_v10  ;;  %6860 = vst [vmem:[#allocation56_spill] sm:$0xff] %v5794_v24  ;;  %v1935_v10 = vmul.f32 %v4322_v3, %v5512_v0  ;;  %v1949_v3 = vmul.f32 %v4326_v7, %v5512_v0  ;;  %v5810_v24 = vadd.f32 %v5404_v8, %v5574_v37  ;;  %4351 = vtanh.f32 %v6867_v49 }
0x17f2   :  { %v1956_v7 = vmul.f32 %v4330_v51, %v5512_v0  ;;  %v2102_v25 = vsel %vm1989_vm13, %v1970_v2, 0.0  ;;  %v5844_v51 = vadd.f32 %v5589_v41, %v5398_v13  ;;  %v5855_v2 = vadd.f32 %v5589_v41, %v5400_v14 }
0x17f3   :  { %2148 = vadd.xlane.f32.xlu1 %v2147_v9  ;;  %v2018_v9 = vsel %vm1989_vm13, %v1942_v63, 0.0  ;;  %v1996_v27 = vsel %vm1989_vm13, %v1935_v10, 0.0  ;;  %6862 = vst [vmem:[#allocation58_spill] sm:$0xff] %v5810_v24  ;;  %v2081_v63 = vsel %vm1989_vm13, %v1963_v38, 0.0  ;;  %v5826_v10 = vadd.f32 %v5406_v53, %v5574_v37  ;;  %v6868_v24 = vld [vmem:[#allocation40_spill] sm:$0xff] }
0x17f4   :  { %v2039_v42 = vsel %vm1989_vm13, %v1949_v3, 0.0  ;;  %v5837_v38 = vadd.f32 %v5589_v41, %v5394_v62  ;;  %v2060_v3 = vsel %vm1989_vm13, %v1956_v7, 0.0  ;;  %v5861_v7 = vadd.f32 %v5589_v41, %v5410_v47 }
0x17f5   :  { %2127 = vadd.xlane.f32.xlu0 %v2126_v29  ;;  %v4332_v29 = vpop.eup %4331  ;;  %6865 = vst [vmem:[#allocation61_spill] sm:$0xff] %v5826_v10  ;;  %4353 = vtanh.f32 %v6868_v24  ;;  %v5887_v49 = vadd.f32 %v5398_v13, %v5596_v23  ;;  %v5900_v13 = vadd.f32 %v5404_v8, %v5596_v23 }
0x17f6   :  { %v4334_v55 = vpop.eup %4333 }
0x17f7   :  { %2019 = vadd.xlane.f32.xlu1 %v2018_v9  ;;  %v5832_v9 = vadd.f32 %v5589_v41, %v5396_v15  ;;  %v1977_v48 = vmul.f32 %v4334_v55, %v5512_v0 }
0x17f9   :  { %1997 = vadd.xlane.f32.xlu0 %v1996_v27  ;;  %v1984_v27 = vmul.f32 %v4332_v29, %v5512_v0  ;;  %v2123_v16 = vsel %vm1989_vm13, %v1977_v48, 0.0 }
0x17fb   :  { %2082 = vadd.xlane.f32.xlu1 %v2081_v63  ;;  %v4336_v63 = vpop.eup %4335  ;;  %v2144_v22 = vsel %vm1989_vm13, %v1984_v27, 0.0  ;;  %v5872_v27 = vadd.f32 %v5396_v15, %v5596_v23  ;;  %v5882_v15 = vadd.f32 %v5394_v62, %v5596_v23  ;;  %v5894_v62 = vadd.f32 %v5400_v14, %v5596_v23 }
0x17fc   :  { %v4338_v10 = vpop.eup %4337  ;;  %v1938_v29 = vmul.f32 %v4336_v63, %v5512_v0 }
0x17fd   :  { %2040 = vadd.xlane.f32.xlu0 %v2039_v42  ;;  %v5850_v42 = vadd.f32 %v5589_v41, %v5406_v53  ;;  %v4340_v55 = vpop.eup %4339  ;;  %6866 = vst [vmem:[#allocation62_spill] sm:$0xff] %v5872_v27 }
0x17fe   :  { %v4342_v63 = vpop.eup %4341  ;;  %v1959_v26 = vmul.f32 %v4340_v55, %v5512_v0 }
0x17ff   :  { %2103 = vadd.xlane.f32.xlu1 %v2102_v25  ;;  %v5866_v25 = vadd.f32 %v5589_v41, %v5404_v8  ;;  %v4344_v20 = vpop.eup %4343  ;;  %v6872_v8 = vld [vmem:[#allocation44_spill] sm:$0xff] }
0x1800   :  { %v4346_v27 = vpop.eup %4345  ;;  %v1973_v24 = vmul.f32 %v4344_v20, %v5512_v0  ;;  %v5905_v20 = vadd.f32 %v5410_v47, %v5596_v23 }
0x1801   :  { %2061 = vadd.xlane.f32.xlu0 %v2060_v3  ;;  %v1945_v3 = vmul.f32 %v4338_v10, %v5512_v0  ;;  %v1952_v10 = vmul.f32 %v4342_v63, %v5512_v0  ;;  %v4348_v55 = vpop.eup %4347 }
0x1802   :  { %v1980_v14 = vmul.f32 %v4348_v55, %v5512_v0 }
0x1803   :  { %2145 = vadd.xlane.f32.xlu1 %v2144_v22  ;;  %v2005_v22 = vsel %vm1989_vm13, %v1938_v29, 0.0  ;;  %v2027_v48 = vsel %vm1989_vm13, %v1945_v3, 0.0  ;;  %v2069_v29 = vsel %vm1989_vm13, %v1959_v26, 0.0  ;;  %v6870_v3 = vld [vmem:[#allocation42_spill] sm:$0xff]  ;;  %v2048_v63 = vsel %vm1989_vm13, %v1952_v10, 0.0  ;;  %v6871_v26 = vld [vmem:[#allocation45_spill] sm:$0xff] }
0x1804   :  { %v5911_v10 = vadd.f32 %v5406_v53, %v5596_v23 }
0x1805   :  { %2124 = vadd.xlane.f32.xlu0 %v2123_v16  ;;  %v6869_v16 = vld [vmem:[#allocation43_spill] sm:$0xff] }
0x1806   :  { %4355 = vtanh.f32 %v6869_v16  ;;  %v2111_v16 = vsel %vm1989_vm13, %v1973_v24, 0.0  ;;  %v2132_v24 = vsel %vm1989_vm13, %v1980_v14, 0.0  ;;  %v6876_v14 = vld [vmem:[#allocation48_spill] sm:$0xff] }
0x1807   :  { %2006 = vadd.xlane.f32.xlu1 %v2005_v22  ;;  %4357 = vtanh.f32 %v6870_v3  ;;  %v1966_v22 = vmul.f32 %v4346_v27, %v5512_v0 }
0x1808   :  { %4359 = vtanh.f32 %v6871_v26 }
0x1809   :  { %2028 = vadd.xlane.f32.xlu0 %v2027_v48  ;;  %v4350_v48 = vpop.eup %4349  ;;  %4361 = vtanh.f32 %v6872_v8 }
0x180a   :  { %v4352_v27 = vpop.eup %4351  ;;  %v1987_v3 = vmul.f32 %v4350_v48, %v5512_v0  ;;  %4363 = vtanh.f32 %v5572_v11 }
0x180b   :  { %2070 = vadd.xlane.f32.xlu1 %v2069_v29  ;;  %v2090_v29 = vsel %vm1989_vm13, %v1966_v22, 0.0  ;;  %v4354_v26 = vpop.eup %4353  ;;  %v1937_v53 = vmul.f32 %v4352_v27, %v5512_v0 }
0x180c   :  { %v2153_v8 = vsel %vm1989_vm13, %v1987_v3, 0.0  ;;  %v1944_v22 = vmul.f32 %v4354_v26, %v5512_v0  ;;  %v6877_v26 = vld [vmem:[#allocation49_spill] sm:$0xff] }
0x180d   :  { %2049 = vadd.xlane.f32.xlu0 %v2048_v63  ;;  %v6873_v63 = vld [vmem:[#allocation38_spill] sm:$0xff] }
0x180e   :  { %v2270_v47 = vadd.f32 %v5496_v28, %v6873_v63  ;;  %v6875_v28 = vld [vmem:[#allocation47_spill] sm:$0xff] }
0x180f   :  { %2112 = vadd.xlane.f32.xlu1 %v2111_v16  ;;  %v6874_v16 = vld [vmem:[#allocation46_spill] sm:$0xff] }
0x1810   :  { %v4356_v55 = vpop.eup %4355  ;;  %4365 = vtanh.f32 %v6874_v16  ;;  %v6878_v16 = vld [vmem:[#allocation50_spill] sm:$0xff] }
0x1811   :  { %2091 = vadd.xlane.f32.xlu0 %v2090_v29  ;;  %4367 = vtanh.f32 %v2270_v47  ;;  %v4358_v48 = vpop.eup %4357  ;;  %v2002_v29 = vsel %vm1989_vm13, %v1937_v53, 0.0  ;;  %v1951_v11 = vmul.f32 %v4356_v55, %v5512_v0 }
0x1812   :  { %4369 = vtanh.f32 %v6875_v28  ;;  %v4360_v27 = vpop.eup %4359  ;;  %v1965_v3 = vmul.f32 %v4358_v48, %v5512_v0 }
0x1813   :  { %2133 = vadd.xlane.f32.xlu1 %v2132_v24  ;;  %4371 = vtanh.f32 %v6876_v14  ;;  %v2024_v24 = vsel %vm1989_vm13, %v1944_v22, 0.0  ;;  %v4362_v47 = vpop.eup %4361  ;;  %v2045_v53 = vsel %vm1989_vm13, %v1951_v11, 0.0  ;;  %v1958_v55 = vmul.f32 %v4360_v27, %v5512_v0 }
0x1814   :  { %4373 = vtanh.f32 %v5594_v57  ;;  %v4364_v57 = vpop.eup %4363  ;;  %v2087_v22 = vsel %vm1989_vm13, %v1965_v3, 0.0  ;;  %v1979_v48 = vmul.f32 %v4362_v47, %v5512_v0 }
0x1815   :  { %2154 = vadd.xlane.f32.xlu0 %v2153_v8  ;;  %4375 = vtanh.f32 %v6877_v26  ;;  %v2276_v8 = vadd.f32 %v5589_v41, %v6873_v63  ;;  %v1972_v11 = vmul.f32 %v4364_v57, %v5512_v0 }
0x1816   :  { %4377 = vtanh.f32 %v6878_v16  ;;  %v2129_v14 = vsel %vm1989_vm13, %v1979_v48, 0.0 }
0x1817   :  { %2003 = vadd.xlane.f32.xlu1 %v2002_v29  ;;  %4379 = vtanh.f32 %v5612_v46  ;;  %v2066_v46 = vsel %vm1989_vm13, %v1958_v55, 0.0 }
0x1818   :  { %4381 = vtanh.f32 %v5618_v35 }
0x1819   :  { %2025 = vadd.xlane.f32.xlu0 %v2024_v24  ;;  %4383 = vtanh.f32 %v5832_v9  ;;  %v2108_v24 = vsel %vm1989_vm13, %v1972_v11, 0.0 }
0x181a   :  { %v4366_v28 = vpop.eup %4365  ;;  %4385 = vtanh.f32 %v5837_v38 }
0x181b   :  { %2046 = vadd.xlane.f32.xlu1 %v2045_v53  ;;  %v4368_v29 = vpop.eup %4367  ;;  %4387 = vtanh.f32 %v2276_v8  ;;  %v1986_v27 = vmul.f32 %v4366_v28, %v5512_v0 }
0x181c   :  { %v4370_v41 = vpop.eup %4369  ;;  %4389 = vtanh.f32 %v5844_v51  ;;  %v2382_v3 = vmul.f32 %v4368_v29, %v5512_v0 }
0x181d   :  { %2088 = vadd.xlane.f32.xlu0 %v2087_v22  ;;  %v4372_v35 = vpop.eup %4371  ;;  %4391 = vtanh.f32 %v5850_v42  ;;  %v2150_v47 = vsel %vm1989_vm13, %v1986_v27, 0.0  ;;  %v2361_v42 = vmul.f32 %v4370_v41, %v5512_v0 }
0x181e   :  { %v4374_v9 = vpop.eup %4373  ;;  %4393 = vtanh.f32 %v5855_v2  ;;  %v2480_v53 = vsel %vm1989_vm13, %v2382_v3, 0.0  ;;  %v2389_v55 = vmul.f32 %v4372_v35, %v5512_v0 }
0x181f   :  { %2067 = vadd.xlane.f32.xlu1 %v2066_v46  ;;  %v4376_v38 = vpop.eup %4375  ;;  %4395 = vtanh.f32 %v5861_v7  ;;  %v2417_v57 = vsel %vm1989_vm13, %v2361_v42, 0.0  ;;  %v2368_v22 = vmul.f32 %v4374_v9, %v5512_v0 }
0x1820   :  { %v4378_v26 = vpop.eup %4377  ;;  %4397 = vtanh.f32 %v5866_v25  ;;  %v2501_v46 = vsel %vm1989_vm13, %v2389_v55, 0.0  ;;  %v2410_v11 = vmul.f32 %v4376_v38, %v5512_v0 }
0x1821   :  { %2130 = vadd.xlane.f32.xlu0 %v2129_v14  ;;  %v4380_v51 = vpop.eup %4379  ;;  %4399 = vtanh.f32 %v5628_v34  ;;  %v2375_v3 = vmul.f32 %v4378_v26, %v5512_v0 }
0x1822   :  { %v4382_v16 = vpop.eup %4381  ;;  %4401 = vtanh.f32 %v5622_v31 }
0x1823   :  { %2109 = vadd.xlane.f32.xlu1 %v2108_v24  ;;  %v4384_v2 = vpop.eup %4383  ;;  %4403 = vtanh.f32 %v5633_v43  ;;  %v2438_v24 = vsel %vm1989_vm13, %v2368_v22, 0.0  ;;  %v1946_v55 = vmul.f32 %v4382_v16, %v5512_v0 }
0x1824   :  { %v4386_v8 = vpop.eup %4385  ;;  %v2374_v7 = vmul.f32 %v4384_v2, %v5512_v0  ;;  %4405 = vtanh.f32 %v5637_v60 }
0x1825   :  { %2151 = vadd.xlane.f32.xlu0 %v2150_v47  ;;  %v4388_v25 = vpop.eup %4387  ;;  %v2367_v48 = vmul.f32 %v4386_v8, %v5512_v0  ;;  %4407 = vtanh.f32 %v5641_v39 }
0x1826   :  { %v4390_v34 = vpop.eup %4389  ;;  %v5966_v28 = vsel %vm2008_vm14, %v2374_v7, 0.0  ;;  %v2388_v29 = vmul.f32 %v4388_v25, %v5512_v0  ;;  %4409 = vtanh.f32 %v5646_v52  ;;  %v2459_v25 = vsel %vm1989_vm13, %v2375_v3, 0.0 }
0x1827   :  { %2481 = vadd.xlane.f32.xlu1 %v2480_v53  ;;  %v4392_v31 = vpop.eup %4391  ;;  %v5972_v41 = vsel %vm2008_vm14, %v2367_v48, 0.0  ;;  %v2381_v35 = vmul.f32 %v4390_v34, %v5512_v0  ;;  %v2564_v53 = vsel %vm1989_vm13, %v2410_v11, 0.0  ;;  %4411 = vtanh.f32 %v5656_v19 }
0x1828   :  { %v4394_v14 = vpop.eup %4393  ;;  %v5977_v43 = vsel %vm2008_vm14, %v2388_v29, 0.0  ;;  %v2409_v27 = vmul.f32 %v4392_v31, %v5512_v0  ;;  %v2030_v48 = vsel %vm2008_vm14, %v1946_v55, 0.0  ;;  %4413 = vtanh.f32 %v5652_v36 }
0x1829   :  { %2418 = vadd.xlane.f32.xlu0 %v2417_v57  ;;  %v4396_v9 = vpop.eup %4395  ;;  %v5983_v38 = vsel %vm2008_vm14, %v2381_v35, 0.0  ;;  %v2395_v47 = vmul.f32 %v4394_v14, %v5512_v0  ;;  %v2396_v57 = vmul.f32 %v4380_v51, %v5512_v0  ;;  %4415 = vtanh.f32 %v5667_v33 }
0x182a   :  { %v4398_v42 = vpop.eup %4397  ;;  %v5988_v60 = vsel %vm2008_vm14, %v2409_v27, 0.0  ;;  %v2416_v2 = vmul.f32 %v4396_v9, %v5512_v0  ;;  %4417 = vtanh.f32 %v5661_v44 }
0x182b   :  { %2502 = vadd.xlane.f32.xlu1 %v2501_v46  ;;  %v5994_v26 = vsel %vm2008_vm14, %v2395_v47, 0.0  ;;  %v2402_v8 = vmul.f32 %v4398_v42, %v5512_v0  ;;  %v4400_v7 = vpop.eup %4399  ;;  %v2522_v52 = vsel %vm1989_vm13, %v2396_v57, 0.0  ;;  %4419 = vtanh.f32 %v5672_v58  ;;  %v6879_v47 = vld [vmem:[#allocation51_spill] sm:$0xff] }
0x182c   :  { %v5999_v39 = vsel %vm2008_vm14, %v2416_v2, 0.0  ;;  %v4402_v16 = vpop.eup %4401  ;;  %v1960_v34 = vmul.f32 %v4400_v7, %v5512_v0  ;;  %4421 = vtanh.f32 %v5678_v30 }
0x182d   :  { %2439 = vadd.xlane.f32.xlu0 %v2438_v24  ;;  %v6004_v22 = vsel %vm2008_vm14, %v2402_v8, 0.0  ;;  %v4404_v29 = vpop.eup %4403  ;;  %v2403_v31 = vmul.f32 %v4402_v16, %v5512_v0  ;;  %4423 = vtanh.f32 %v6879_v47 }
0x182e   :  { %v4406_v51 = vpop.eup %4405  ;;  %v2072_v46 = vsel %vm2008_vm14, %v1960_v34, 0.0  ;;  %v1981_v19 = vmul.f32 %v4404_v29, %v5512_v0  ;;  %4425 = vtanh.f32 %v5689_v61  ;;  %v6880_v29 = vld [vmem:[#allocation52_spill] sm:$0xff] }
0x182f   :  { %2565 = vadd.xlane.f32.xlu1 %v2564_v53  ;;  %v4408_v11 = vpop.eup %4407  ;;  %v2543_v35 = vsel %vm1989_vm13, %v2403_v31, 0.0  ;;  %v1939_v36 = vmul.f32 %v4406_v51, %v5512_v0  ;;  %v2272_v53 = vadd.f32 %v5538_v50, %v6873_v63  ;;  %4427 = vtanh.f32 %v5696_v5 }
0x1830   :  { %v4410_v14 = vpop.eup %4409  ;;  %v2135_v27 = vsel %vm2008_vm14, %v1981_v19, 0.0  ;;  %v1988_v33 = vmul.f32 %v4408_v11, %v5512_v0 }
0x1831   :  { %2460 = vadd.xlane.f32.xlu0 %v2459_v25  ;;  %v4412_v9 = vpop.eup %4411  ;;  %v2009_v24 = vsel %vm2008_vm14, %v1939_v36, 0.0  ;;  %v1953_v44 = vmul.f32 %v4410_v14, %v5512_v0  ;;  %4429 = vtanh.f32 %v2272_v53 }
0x1832   :  { %v4414_v3 = vpop.eup %4413  ;;  %v2156_v42 = vsel %vm2008_vm14, %v1988_v33, 0.0  ;;  %v2370_v58 = vmul.f32 %v4412_v9, %v5512_v0  ;;  %4431 = vtanh.f32 %v5710_v40 }
0x1833   :  { %2031 = vadd.xlane.f32.xlu1 %v2030_v48  ;;  %v4416_v2 = vpop.eup %4415  ;;  %v2051_v30 = vsel %vm2008_vm14, %v1953_v44, 0.0  ;;  %v1967_v55 = vmul.f32 %v4414_v3, %v5512_v0  ;;  %4433 = vtanh.f32 %v6880_v29  ;;  %v6881_v44 = vlaneseq }
0x1834   :  { %v4418_v8 = vpop.eup %4417  ;;  %v2444_v7 = vsel %vm1989_vm13, %v2370_v58, 0.0  ;;  %v2391_v25 = vmul.f32 %v4416_v2, %v5512_v0  ;;  %4435 = vtanh.f32 %v5718_v18 }
0x1835   :  { %2523 = vadd.xlane.f32.xlu0 %v2522_v52  ;;  %v4420_v57 = vpop.eup %4419  ;;  %v2093_v61 = vsel %vm2008_vm14, %v1967_v55, 0.0  ;;  %v1974_v16 = vmul.f32 %v4418_v8, %v5512_v0  ;;  %v2271_v52 = vadd.f32 %v6873_v63, %v5547_v21  ;;  %v6057_v3 = vand.u32 127, %v6881_v44 }
0x1836   :  { %v4422_v50 = vpop.eup %4421  ;;  %v2507_v48 = vsel %vm1989_vm13, %v2391_v25, 0.0  ;;  %v2398_v34 = vmul.f32 %v4420_v57, %v5512_v0 }
0x1837   :  { %2073 = vadd.xlane.f32.xlu1 %v2072_v46  ;;  %v4424_v5 = vpop.eup %4423  ;;  %v2114_v31 = vsel %vm2008_vm14, %v1974_v16, 0.0  ;;  %v2363_v51 = vmul.f32 %v4422_v50, %v5512_v0  ;;  %4437 = vtanh.f32 %v2271_v52  ;;  %v6882_v16 = vld [vmem:[#allocation34_spill] sm:$0xff]  ;;  %vm2666_vm14 = vcmask 261312  }
0x1838   :  { %v4426_v46 = vpop.eup %4425  ;;  %v2528_v40 = vsel %vm1989_vm13, %v2398_v34, 0.0  ;;  %v2412_v19 = vmul.f32 %v4424_v5, %v5512_v0  ;;  %4439 = vtanh.f32 %v5732_v59  ;;  %v2274_v34 = vadd.f32 %v5568_v32, %v6873_v63 }
0x1839   :  { %2544 = vadd.xlane.f32.xlu0 %v2543_v35  ;;  %v4428_v11 = vpop.eup %4427  ;;  %v2423_v35 = vsel %vm1989_vm13, %v2363_v51, 0.0  ;;  %v2377_v36 = vmul.f32 %v4426_v46, %v5512_v0  ;;  %4441 = vtanh.f32 %v5727_v12 }
0x183a   :  { %v2570_v14 = vsel %vm1989_vm13, %v2412_v19, 0.0  ;;  %4443 = vtanh.f32 %v5743_v1 }
0x183b   :  { %2136 = vadd.xlane.f32.xlu1 %v2135_v27  ;;  %v4430_v21 = vpop.eup %4429  ;;  %v2362_v27 = vmul.f32 %v4428_v11, %v5512_v0  ;;  %v2465_v33 = vsel %vm1989_vm13, %v2377_v36, 0.0  ;;  %4445 = vtanh.f32 %v5738_v17 }
0x183c   :  { %v4432_v18 = vpop.eup %4431  ;;  %v2384_v9 = vmul.f32 %v4430_v21, %v5512_v0  ;;  %4447 = vtanh.f32 %v5754_v6  ;;  %v6077_v6 = vsub.s32 %v6057_v3, %v6882_v16 }
0x183d   :  { %2010 = vadd.xlane.f32.xlu0 %v2009_v24  ;;  %v4434_v24 = vpop.eup %4433  ;;  %v2420_v59 = vsel %vm1989_vm13, %v2362_v27, 0.0  ;;  %v2369_v47 = vmul.f32 %v4432_v18, %v5512_v0  ;;  %4449 = vtanh.f32 %v5749_v56 }
0x183e   :  { %v2486_v12 = vsel %vm1989_vm13, %v2384_v9, 0.0  ;;  %v2405_v2 = vmul.f32 %v4434_v24, %v5512_v0 }
0x183f   :  { %2157 = vadd.xlane.f32.xlu1 %v2156_v42  ;;  %v4436_v42 = vpop.eup %4435  ;;  %v2441_v55 = vsel %vm1989_vm13, %v2369_v47, 0.0 }
0x1840   :  { %v2376_v8 = vmul.f32 %v4436_v42, %v5512_v0  ;;  %v2549_v17 = vsel %vm1989_vm13, %v2405_v2, 0.0 }
0x1841   :  { %2052 = vadd.xlane.f32.xlu0 %v2051_v30  ;;  %v4438_v53 = vpop.eup %4437  ;;  %v2647_v30 = vadd.s32 4294967288, %v6057_v3 }
0x1842   :  { %v2383_v57 = vmul.f32 %v4438_v53, %v5512_v0  ;;  %v2462_v5 = vsel %vm1989_vm13, %v2376_v8, 0.0 }
0x1843   :  { %2445 = vadd.xlane.f32.xlu1 %v2444_v7  ;;  %v4440_v7 = vpop.eup %4439  ;;  %v6073_v50 = vsub.s32 %v2647_v30, %v6882_v16 }
0x1844   :  { %v2397_v29 = vmul.f32 %v4440_v7, %v5512_v0  ;;  %v2483_v51 = vsel %vm1989_vm13, %v2383_v57, 0.0 }
0x1845   :  { %2094 = vadd.xlane.f32.xlu0 %v2093_v61  ;;  %v4442_v61 = vpop.eup %4441 }
0x1846   :  { %v4444_v52 = vpop.eup %4443  ;;  %v2525_v36 = vsel %vm1989_vm13, %v2397_v29, 0.0 }
0x1847   :  { %2508 = vadd.xlane.f32.xlu1 %v2507_v48  ;;  %v6883_v48 = vld [vmem:[#allocation54_spill] sm:$0xff]  ;;  %v4446_v19 = vpop.eup %4445 }
0x1848   :  { %4451 = vtanh.f32 %v6883_v48  ;;  %v2273_v48 = vadd.f32 %v6873_v63, %v5574_v37 }
0x1849   :  { %2115 = vadd.xlane.f32.xlu0 %v2114_v31  ;;  %v6884_v31 = vld [vmem:[#allocation53_spill] sm:$0xff] }
0x184a   :  { %4453 = vtanh.f32 %v6884_v31 }
0x184b   :  { %2529 = vadd.xlane.f32.xlu1 %v2528_v40  ;;  %v6089_v40 = vld [vmem:[%s6795_s9] ss:$0 sm:$0xff]  ;;  %4455 = vtanh.f32 %v2274_v34 }
0x184c   :  { %v2390_v32 = vmul.f32 %v6089_v40, %v4442_v61  ;;  %v2404_v21 = vmul.f32 %v6089_v40, %v4444_v52  ;;  %4457 = vtanh.f32 %v5771_v45  ;;  %v2411_v44 = vmul.f32 %v6089_v40, %v4446_v19  ;;  %v6886_v52 = vld [vmem:[#allocation56_spill] sm:$0xff] }
0x184d   :  { %2424 = vadd.xlane.f32.xlu0 %v2423_v35  ;;  %4459 = vtanh.f32 %v5783_v4 }
0x184e   :  { %v2504_v9 = vsel %vm1989_vm13, %v2390_v32, 0.0  ;;  %4461 = vtanh.f32 %v5778_v54  ;;  %v2567_v30 = vsel %vm1989_vm13, %v2411_v44, 0.0 }
0x184f   :  { %2571 = vadd.xlane.f32.xlu1 %v2570_v14  ;;  %v4448_v14 = vpop.eup %4447 }
0x1851   :  { %2466 = vadd.xlane.f32.xlu0 %v2465_v33 }
0x1853   :  { %2421 = vadd.xlane.f32.xlu1 %v2420_v59  ;;  %v4450_v59 = vpop.eup %4449 }
0x1854   :  { %v2017_v58 = vpop.xlane.xlu1 %2016  ;;  %v4452_v2 = vpop.eup %4451 }
0x1855   :  { %2487 = vadd.xlane.f32.xlu0 %v2486_v12  ;;  %v2696_v27 = vrot.slane %v2017_v58, %v6073_v50  ;;  %v2546_v12 = vsel %vm1989_vm13, %v2404_v21, 0.0  ;;  %v2365_v58 = vmul.f32 %v6089_v40, %v4448_v14  ;;  %v4454_v8 = vpop.eup %4453  ;;  %v2379_v54 = vmul.f32 %v6089_v40, %v4452_v2 }
0x1856   :  { %v1995_v1 = vpop.xlane.xlu0 %1994  ;;  %v4456_v34 = vpop.eup %4455 }
0x1857   :  { %2442 = vadd.xlane.f32.xlu1 %v2441_v55  ;;  %v2651_v11 = vrot.slane %v1995_v1, %v6073_v50  ;;  %v2372_v55 = vmul.f32 %v6089_v40, %v4450_v59  ;;  %v2429_v61 = vsel %vm1989_vm13, %v2365_v58, 0.0  ;;  %v4458_v32 = vpop.eup %4457 }
0x1858   :  { %v2038_v25 = vpop.xlane.xlu1 %2037  ;;  %v4460_v21 = vpop.eup %4459 }
0x1859   :  { %2550 = vadd.xlane.f32.xlu0 %v2549_v17  ;;  %v2730_v45 = vrot.slane %v2038_v25, %v6073_v50  ;;  %v6885_v25 = vld [vmem:[#allocation55_spill] sm:$0xff]  ;;  %v2450_v31 = vsel %vm1989_vm13, %v2372_v55, 0.0  ;;  %v2400_v2 = vmul.f32 %v6089_v40, %v4460_v21 }
0x185a   :  { %v2080_v56 = vpop.xlane.xlu0 %2079  ;;  %4463 = vtanh.f32 %v6885_v25  ;;  %v6890_v25 = vld [vmem:[#allocation60_spill] sm:$0xff] }
0x185b   :  { %2463 = vadd.xlane.f32.xlu1 %v2462_v5  ;;  %v2798_v4 = vrot.slane %v2080_v56, %v6073_v50  ;;  %4465 = vtanh.f32 %v6886_v52 }
0x185c   :  { %v1992_v46 = vpop.xlane.xlu1 %1991 }
0x185d   :  { %2484 = vadd.xlane.f32.xlu0 %v2483_v51  ;;  %v2646_v0 = vrot.slane %v1992_v46, %v6077_v6  ;;  %v2393_v46 = vmul.f32 %v6089_v40, %v4454_v8 }
0x185e   :  { %v2014_v35 = vpop.xlane.xlu0 %2013 }
0x185f   :  { %v2692_v18 = vrot.slane %v2014_v35, %v6077_v6  ;;  %v6099_v33 = vsel %vm2652_vm15, %v2651_v11, %v2646_v0  ;;  %2526 = vadd.xlane.f32.xlu1 %v2525_v36  ;;  %v6887_v11 = vld [vmem:[#allocation57_spill] sm:$0xff]  ;;  %v2471_v35 = vsel %vm1989_vm13, %v2379_v54, 0.0  ;;  %v2386_v36 = vmul.f32 %v6089_v40, %v4456_v34 }
0x1860   :  { %v2056_v24 = vpop.xlane.xlu1 %2055  ;;  %4467 = vtanh.f32 %v6887_v11  ;;  %v6891_v34 = vld [vmem:[#allocation61_spill] sm:$0xff] }
0x1861   :  { %v6105_v47 = vsel %vm2652_vm15, %v2696_v27, %v2692_v18  ;;  %2505 = vadd.xlane.f32.xlu0 %v2504_v9  ;;  %v2760_v5 = vrot.slane %v2056_v24, %v6077_v6  ;;  %4469 = vtanh.f32 %v2273_v48  ;;  %v2513_v27 = vsel %vm1989_vm13, %v2393_v46, 0.0  ;;  %v4462_v24 = vpop.eup %4461 }
0x1862   :  { %v2035_v42 = vpop.xlane.xlu0 %2034  ;;  %v2407_v9 = vmul.f32 %v6089_v40, %v4458_v32  ;;  %v2492_v58 = vsel %vm1989_vm13, %v2386_v36, 0.0  ;;  %v2414_v8 = vmul.f32 %v6089_v40, %v4462_v24 }
0x1863   :  { %v2726_v53 = vrot.slane %v2035_v42, %v6077_v6  ;;  %2547 = vadd.xlane.f32.xlu1 %v2546_v12  ;;  %v6888_v42 = vld [vmem:[#allocation58_spill] sm:$0xff] }
0x1864   :  { %v2077_v1 = vpop.xlane.xlu1 %2076  ;;  %4471 = vtanh.f32 %v6888_v42 }
0x1865   :  { %v6117_v7 = vsel %vm2652_vm15, %v2730_v45, %v2726_v53  ;;  %2568 = vadd.xlane.f32.xlu0 %v2567_v30  ;;  %v2794_v17 = vrot.slane %v2077_v1, %v6077_v6  ;;  %v4464_v45 = vpop.eup %4463  ;;  %v6889_v30 = vld [vmem:[#allocation59_spill] sm:$0xff]  ;;  %v2555_v1 = vsel %vm1989_vm13, %v2407_v9, 0.0 }
0x1866   :  { %v2059_v57 = vpop.xlane.xlu0 %2058  ;;  %4473 = vtanh.f32 %v6889_v30  ;;  %v2371_v54 = vmul.f32 %v6089_v40, %v4464_v45 }
0x1867   :  { %v2764_v56 = vrot.slane %v2059_v57, %v6073_v50  ;;  %v6128_v29 = vsel %vm2652_vm15, %v2798_v4, %v2794_v17  ;;  %2430 = vadd.xlane.f32.xlu1 %v2429_v61  ;;  %v4466_v4 = vpop.eup %4465  ;;  %4475 = vtanh.f32 %v6890_v25  ;;  %v2534_v61 = vsel %vm1989_vm13, %v2400_v2, 0.0 }
0x1868   :  { %v2101_v51 = vpop.xlane.xlu1 %2100  ;;  %4477 = vtanh.f32 %v6891_v34  ;;  %v2364_v52 = vmul.f32 %v6089_v40, %v4466_v4  ;;  %v2447_v46 = vsel %vm1989_vm13, %v2371_v54, 0.0 }
0x1869   :  { %v6134_v19 = vsel %vm2652_vm15, %v2764_v56, %v2760_v5  ;;  %2451 = vadd.xlane.f32.xlu0 %v2450_v31  ;;  %v2832_v37 = vrot.slane %v2101_v51, %v6073_v50  ;;  %v2576_v5 = vsel %vm1989_vm13, %v2414_v8, 0.0  ;;  %4479 = vtanh.f32 %v5882_v15 }
0x186a   :  { %v2098_v0 = vpop.xlane.xlu0 %2097  ;;  %v4468_v48 = vpop.eup %4467  ;;  %v2426_v11 = vsel %vm1989_vm13, %v2364_v52, 0.0 }
0x186b   :  { %v2828_v14 = vrot.slane %v2098_v0, %v6077_v6  ;;  %2472 = vadd.xlane.f32.xlu1 %v2471_v35  ;;  %v4470_v31 = vpop.eup %4469  ;;  %v2378_v32 = vmul.f32 %v6089_v40, %v4468_v48  ;;  %v6892_v48 = vld [vmem:[#allocation62_spill] sm:$0xff] }
0x186c   :  { %v2122_v18 = vpop.xlane.xlu1 %2121  ;;  %v2385_v35 = vmul.f32 %v6089_v40, %v4470_v31  ;;  %4481 = vtanh.f32 %v6892_v48 }
0x186d   :  { %v6144_v44 = vsel %vm2652_vm15, %v2832_v37, %v2828_v14  ;;  %2514 = vadd.xlane.f32.xlu0 %v2513_v27  ;;  %v2866_v59 = vrot.slane %v2122_v18, %v6073_v50  ;;  %v2468_v14 = vsel %vm1989_vm13, %v2378_v32, 0.0 }
0x186e   :  { %v2119_v12 = vpop.xlane.xlu0 %2118  ;;  %v4472_v37 = vpop.eup %4471  ;;  %v2489_v9 = vsel %vm1989_vm13, %v2385_v35, 0.0 }
0x186f   :  { %v2862_v53 = vrot.slane %v2119_v12, %v6077_v6  ;;  %2493 = vadd.xlane.f32.xlu1 %v2492_v58  ;;  %v2399_v27 = vmul.f32 %v6089_v40, %v4472_v37 }
0x1870   :  { %v6153_v55 = vpop.xlane.xlu1 %2139  ;;  %v4474_v36 = vpop.eup %4473 }
0x1871   :  { %v6157_v17 = vsel %vm2652_vm15, %v2866_v59, %v2862_v53  ;;  %2556 = vadd.xlane.f32.xlu0 %v2555_v1  ;;  %v4476_v18 = vpop.eup %4475  ;;  %v2392_v59 = vmul.f32 %v6089_v40, %v4474_v36  ;;  %v2531_v58 = vsel %vm1989_vm13, %v2399_v27, 0.0  ;;  %v2661_v27 = vadd.s32 4294967272, %v6057_v3 }
0x1872   :  { %v6160_v57 = vpop.xlane.xlu0 %2142  ;;  %v4478_v42 = vpop.eup %4477  ;;  %v2413_v2 = vmul.f32 %v6089_v40, %v4476_v18 }
0x1873   :  { %2535 = vadd.xlane.f32.xlu1 %v2534_v61  ;;  %v2510_v45 = vsel %vm1989_vm13, %v2392_v59, 0.0  ;;  %v2406_v30 = vmul.f32 %v6089_v40, %v4478_v42  ;;  %v2275_v61 = vadd.f32 %v6873_v63, %v5596_v23  ;;  %v4480_v63 = vpop.eup %4479 }
0x1874   :  { %v6166_v56 = vpop.xlane.xlu1 %2022  ;;  %v2573_v8 = vsel %vm1989_vm13, %v2413_v2, 0.0  ;;  %v2675_v2 = vadd.s32 4294967256, %v6057_v3 }
0x1875   :  { %2577 = vadd.xlane.f32.xlu0 %v2576_v5  ;;  %v2552_v4 = vsel %vm1989_vm13, %v2406_v30, 0.0  ;;  %4483 = vtanh.f32 %v2275_v61  ;;  %v6264_v61 = vsub.s32 %v2661_v27, %v6882_v16 }
0x1876   :  { %v6169_v51 = vpop.xlane.xlu0 %2000  ;;  %4485 = vtanh.f32 %v5887_v49 }
0x1877   :  { %2448 = vadd.xlane.f32.xlu1 %v2447_v46  ;;  %4487 = vtanh.f32 %v5900_v13  ;;  %v2654_v46 = vadd.s32 4294967280, %v6057_v3 }
0x1878   :  { %v6174_v0 = vpop.xlane.xlu1 %2043  ;;  %4489 = vtanh.f32 %v5894_v62 }
0x1879   :  { %2427 = vadd.xlane.f32.xlu0 %v2426_v11  ;;  %4491 = vtanh.f32 %v5911_v10 }
0x187a   :  { %v6177_v21 = vpop.xlane.xlu0 %2064  ;;  %4493 = vtanh.f32 %v5905_v20 }
0x187b   :  { %2469 = vadd.xlane.f32.xlu1 %v2468_v14  ;;  %v6248_v14 = vsub.s32 %v2654_v46, %v6882_v16 }
0x187c   :  { %v6182_v24 = vpop.xlane.xlu1 %2106 }
0x187d   :  { %2490 = vadd.xlane.f32.xlu0 %v2489_v9 }
0x187e   :  { %v6185_v12 = vpop.xlane.xlu0 %2085 }
0x187f   :  { %2532 = vadd.xlane.f32.xlu1 %v2531_v58  ;;  %v2668_v58 = vadd.s32 4294967264, %v6057_v3 }
0x1880   :  { %v6190_v53 = vpop.xlane.xlu1 %2148 }
0x1881   :  { %2511 = vadd.xlane.f32.xlu0 %v2510_v45 }
0x1882   :  { %v6193_v1 = vpop.xlane.xlu0 %2127 }
0x1883   :  { %2574 = vadd.xlane.f32.xlu1 %v2573_v8 }
0x1884   :  { %v6197_v25 = vpop.xlane.xlu1 %2019 }
0x1885   :  { %2553 = vadd.xlane.f32.xlu0 %v2552_v4 }
0x1886   :  { %v6202_v54 = vpop.xlane.xlu0 %1997 }
0x1887   :  { %2457 = vadd.xlane.f32.xlu1 %v5966_v28  ;;  %v2658_v4 = vrot.slane %v6202_v54, %v6248_v14  ;;  %v6276_v54 = vsub.s32 %v2675_v2, %v6882_v16 }
0x1888   :  { %v6206_v34 = vpop.xlane.xlu1 %2082 }
0x1889   :  { %2436 = vadd.xlane.f32.xlu0 %v5972_v41  ;;  %v4482_v41 = vpop.eup %4481 }
0x188a   :  { %v6209_v5 = vpop.xlane.xlu0 %2040  ;;  %v2373_v62 = vmul.f32 %v6089_v40, %v4482_v41 }
0x188b   :  { %2499 = vadd.xlane.f32.xlu1 %v5977_v43  ;;  %v2366_v43 = vmul.f32 %v6089_v40, %v4480_v63 }
0x188c   :  { %v6213_v15 = vpop.xlane.xlu1 %2103 }
0x188d   :  { %2478 = vadd.xlane.f32.xlu0 %v5983_v38  ;;  %v4484_v38 = vpop.eup %4483  ;;  %v2432_v10 = vsel %vm1989_vm13, %v2366_v43, 0.0  ;;  %v2701_v43 = vrot.slane %v6197_v25, %v6248_v14 }
0x188e   :  { %v6217_v23 = vpop.xlane.xlu0 %2061 }
0x188f   :  { %2562 = vadd.xlane.f32.xlu1 %v5988_v60  ;;  %v4486_v60 = vpop.eup %4485 }
0x1890   :  { %v6221_v28 = vpop.xlane.xlu1 %2145  ;;  %v4488_v31 = vpop.eup %4487  ;;  %v2380_v32 = vmul.f32 %v6089_v40, %v4486_v60 }
0x1891   :  { %2520 = vadd.xlane.f32.xlu0 %v5994_v26  ;;  %v2387_v26 = vmul.f32 %v6089_v40, %v4484_v38  ;;  %v4490_v37 = vpop.eup %4489  ;;  %v2401_v35 = vmul.f32 %v6089_v40, %v4488_v31  ;;  %v6273_v38 = vsub.s32 %v2668_v58, %v6882_v16  ;;  %v2702_v31 = vsel %vm2659_vm1, %v2701_v43, %v6105_v47  ;;  %v6893_v43 = vld [vmem:[#allocation24_spill] sm:$0xff] }
0x1892   :  { %v6225_v49 = vpop.xlane.xlu0 %2124  ;;  %v4492_v36 = vpop.eup %4491  ;;  %v2474_v18 = vsel %vm1989_vm13, %v2380_v32, 0.0  ;;  %v2394_v59 = vmul.f32 %v6089_v40, %v4490_v37  ;;  %v2769_v37 = vrot.slane %v6217_v23, %v6248_v14 }
0x1893   :  { %2583 = vadd.xlane.f32.xlu1 %v5999_v39  ;;  %v2453_v39 = vsel %vm1989_vm13, %v2373_v62, 0.0  ;;  %v4494_v42 = vpop.eup %4493  ;;  %v2537_v30 = vsel %vm1989_vm13, %v2401_v35, 0.0  ;;  %v2408_v8 = vmul.f32 %v6089_v40, %v4492_v36 }
0x1894   :  { %v6230_v13 = vpop.xlane.xlu1 %2006  ;;  %v2516_v48 = vsel %vm1989_vm13, %v2394_v59, 0.0  ;;  %v2415_v41 = vmul.f32 %v6089_v40, %v4494_v42  ;;  %v2665_v40 = vrot.slane %v6169_v51, %v6264_v61  ;;  %v2770_v59 = vsel %vm2659_vm1, %v2769_v37, %v6134_v19 }
0x1895   :  { %2541 = vadd.xlane.f32.xlu0 %v6004_v22  ;;  %v2495_v22 = vsel %vm1989_vm13, %v2387_v26, 0.0  ;;  %v2558_v60 = vsel %vm1989_vm13, %v2408_v8, 0.0  ;;  %v2774_v42 = vrot.slane %v6177_v21, %v6264_v61 }
0x1896   :  { %v6234_v52 = vpop.xlane.xlu0 %2028  ;;  %v2579_v25 = vsel %vm1989_vm13, %v2415_v41, 0.0 }
0x1897   :  { %2433 = vadd.xlane.f32.xlu1 %v2432_v10  ;;  %v2660_v10 = vsel %vm2659_vm1, %v2658_v4, %v6099_v33  ;;  %v2679_v33 = vrot.slane %v6230_v13, %v6276_v54  ;;  %v2716_v35 = vrot.slane %v6234_v52, %v6276_v54  ;;  %v2775_v8 = vsel %vm2666_vm14, %v2774_v42, %v2770_v59  ;;  %v6900_v42 = vld [vmem:[#allocation29_spill] sm:$0xff] }
0x1898   :  { %v6240_v20 = vpop.xlane.xlu1 %2070  ;;  %v2667_v51 = vsel %vm2666_vm14, %v2665_v40, %v2660_v10  ;;  %v6894_v10 = vld [vmem:[#allocation26_spill] sm:$0xff]  ;;  %v2803_v59 = vrot.slane %v6206_v34, %v6248_v14  ;;  %v2896_v34 = vrot.slane %v6153_v55, %v6077_v6  ;;  %v2905_v55 = vrot.slane %v6221_v28, %v6248_v14 }
0x1899   :  { %2454 = vadd.xlane.f32.xlu0 %v2453_v39  ;;  %v2706_v39 = vrot.slane %v6166_v56, %v6264_v61  ;;  %v2784_v2 = vrot.slane %v6240_v20, %v6276_v54 }
0x189a   :  { %v6243_v11 = vpop.xlane.xlu0 %2049 }
0x189b   :  { %2496 = vadd.xlane.f32.xlu1 %v2495_v22  ;;  %v2707_v36 = vsel %vm2666_vm14, %v2706_v39, %v2702_v31  ;;  %v6896_v31 = vld [vmem:[#allocation28_spill] sm:$0xff]  ;;  %v6897_v39 = vld [vmem:[#allocation25_spill] sm:$0xff] }
0x189c   :  { %v6252_v9 = vpop.xlane.xlu1 %2112 }
0x189d   :  { %2475 = vadd.xlane.f32.xlu0 %v2474_v18 }
0x189e   :  { %v6257_v45 = vpop.xlane.xlu0 %2091 }
0x189f   :  { %2538 = vadd.xlane.f32.xlu1 %v2537_v30 }
0x18a0   :  { %v6267_v63 = vpop.xlane.xlu1 %2133 }
0x18a1   :  { %2517 = vadd.xlane.f32.xlu0 %v2516_v48 }
0x18a2   :  { %v6278_v62 = vpop.xlane.xlu0 %2154 }
0x18a3   :  { %2559 = vadd.xlane.f32.xlu1 %v2558_v60 }
0x18a4   :  { %v2004_v26 = vpop.xlane.xlu1 %2003 }
0x18a5   :  { %2580 = vadd.xlane.f32.xlu0 %v2579_v25  ;;  %v2672_v46 = vrot.slane %v2004_v26, %v6273_v38  ;;  %v6895_v25 = vld [vmem:[#allocation31_spill] sm:$0xff] }
0x18a6   :  { %v2026_v32 = vpop.xlane.xlu0 %2025 }
0x18a7   :  { %v2711_v22 = vrot.slane %v2026_v32, %v6273_v38  ;;  %v2674_v47 = vsel %vm2673_vm0, %v2672_v46, %v2667_v51  ;;  %v6898_v32 = vld [vmem:[#allocation30_spill] sm:$0xff]  ;;  %v2682_v51 = vadd.s32 4294967248, %v6057_v3 }
0x18a8   :  { %v6301_v27 = vpop.xlane.xlu1 %2046  ;;  %v6304_v56 = vsel %vm2680_vm12, %v2679_v33, %v2674_v47 }
0x18a9   :  { %v2712_v13 = vsel %vm2673_vm0, %v2711_v22, %v2707_v36  ;;  %v6899_v22 = vld [vmem:[#allocation27_spill] sm:$0xff]  ;;  %v6360_v36 = vsub.s32 %v2682_v51, %v6882_v16  ;;  %v3468_v51 = vld [vmem:[#allocation12 + $0x18] sm:$0xff] }
0x18aa   :  { %v6307_v18 = vpop.xlane.xlu0 %2088  ;;  %v2717_v23 = vsel %vm2680_vm12, %v2716_v35, %v2712_v13  ;;  %v2735_v35 = vrot.slane %v6209_v5, %v6248_v14  ;;  %v2745_v5 = vrot.slane %v6301_v27, %v6273_v38  ;;  %v2804_v27 = vsel %vm2659_vm1, %v2803_v59, %v6128_v29 }
0x18ac   :  { %v2068_v52 = vpop.xlane.xlu1 %2067 }
0x18ad   :  { %v2779_v58 = vrot.slane %v2068_v52, %v6273_v38  ;;  %v2736_v52 = vsel %vm2659_vm1, %v2735_v35, %v6117_v7  ;;  %v2808_v7 = vrot.slane %v6185_v12, %v6264_v61  ;;  %v2813_v12 = vrot.slane %v6307_v18, %v6273_v38 }
0x18ae   :  { %v6317_v30 = vpop.xlane.xlu0 %2130 }
0x18af   :  { %v2780_v4 = vsel %vm2673_vm0, %v2779_v58, %v2775_v8  ;;  %v2900_v58 = vrot.slane %v6160_v57, %v6073_v50  ;;  %v6901_v57 = vld [vmem:[#allocation32_spill] sm:$0xff] }
0x18b0   :  { %v6321_v48 = vpop.xlane.xlu1 %2109  ;;  %v6324_v41 = vsel %vm2680_vm12, %v2784_v2, %v2780_v4  ;;  %v2740_v2 = vrot.slane %v6174_v0, %v6264_v61  ;;  %v2837_v4 = vrot.slane %v6213_v15, %v6248_v14  ;;  %v2871_v0 = vrot.slane %v6225_v49, %v6248_v14  ;;  %v3465_v15 = vld [vmem:[#allocation12] sm:$0xff] }
0x18b1   :  { %v2750_v49 = vrot.slane %v6243_v11, %v6276_v54 }
0x18b2   :  { %v6326_v19 = vpop.xlane.xlu0 %2151  ;;  %v2741_v29 = vsel %vm2666_vm14, %v2740_v2, %v2736_v52  ;;  %v2842_v52 = vrot.slane %v6182_v24, %v6264_v61  ;;  %v2838_v11 = vsel %vm2659_vm1, %v2837_v4, %v6144_v44  ;;  %v2872_v24 = vsel %vm2659_vm1, %v2871_v0, %v6157_v17 }
0x18b3   :  { %v2818_v44 = vrot.slane %v6257_v45, %v6276_v54  ;;  %v2876_v4 = vrot.slane %v6193_v1, %v6264_v61 }
0x18b4   :  { %v6328_v21 = vpop.xlane.xlu1 %2481  ;;  %368 = vrot.lane.b32.xlu1 %v6893_v43, %s4737_s18  ;;  %v2843_v45 = vsel %vm2666_vm14, %v2842_v52, %v2838_v11 }
0x18b6   :  { %v6332_v60 = vpop.xlane.xlu0 %2418 }
0x18b8   :  { %v6334_v20 = vpop.xlane.xlu1 %2502  ;;  %636 = vrot.lane.b32.xlu1 %v6894_v10, %s4737_s18 }
0x18ba   :  { %v6338_v40 = vpop.xlane.xlu0 %2439 }
0x18bb   :  { %1309 = vrot.lane.b32.xlu0 %v6895_v25, %s4737_s18  ;;  %v3466_v25 = vld [vmem:[#allocation12 + $0x8] sm:$0xff] }
0x18bc   :  { %v6342_v26 = vpop.xlane.xlu1 %2565  ;;  %906 = vrot.lane.b32.xlu1 %v6896_v31, %s4737_s18  ;;  %v3467_v31 = vld [vmem:[#allocation12 + $0x10] sm:$0xff] }
0x18bd   :  { %v4107_v59 = vpack.c.bf16 %v3468_v51, %v3467_v31 }
0x18be   :  { %v6346_v46 = vpop.xlane.xlu0 %2460 }
0x18bf   :  { %502 = vrot.lane.b32.xlu0 %v6897_v39, %s4737_s18  ;;  %v2746_v39 = vsel %vm2673_vm0, %v2745_v5, %v2741_v29  ;;  %v2809_v5 = vsel %vm2666_vm14, %v2808_v7, %v2804_v27  ;;  %v2852_v29 = vrot.slane %v6252_v9, %v6276_v54  ;;  %v2920_v9 = vrot.slane %v6278_v62, %v6276_v54 }
0x18c0   :  { %v2032_v33 = vpop.xlane.xlu1 %2031  ;;  %1176 = vrot.lane.b32.xlu1 %v6898_v32, %s4737_s18  ;;  %v4103_v32 = vpack.c.bf16 %v3466_v25, %v3465_v15 }
0x18c1   :  { %v2721_v16 = vrot.slane %v2032_v33, %v6360_v36 }
0x18c2   :  { %v6353_v37 = vpop.xlane.xlu0 %2523  ;;  %4104 = vmatprep.subr.bf16.mxu0 %v4103_v32 }
0x18c3   :  { %771 = vrot.lane.b32.xlu0 %v6899_v22, %s4737_s18  ;;  %v2722_v33 = vsel %vm2687_vm3, %v2721_v16, %v2717_v23  ;;  %v2910_v23 = vrot.slane %v6190_v53, %v6264_v61  ;;  %v2751_v16 = vsel %vm2680_vm12, %v2750_v49, %v2746_v39  ;;  %4106 = vmatpush3.bf16.msra.mxu0 %v4103_v32 }
0x18c4   :  { %v2074_v47 = vpop.xlane.xlu1 %2073  ;;  %v2814_v53 = vsel %vm2673_vm0, %v2813_v12, %v2809_v5  ;;  %4108 = vmatprep.subr.bf16.mxu0 %v4107_v59 }
0x18c5   :  { %v2789_v18 = vrot.slane %v2074_v47, %v6360_v36 }
0x18c6   :  { %v6362_v13 = vpop.xlane.xlu0 %2544 }
0x18c7   :  { %1041 = vrot.lane.b32.xlu0 %v6900_v42, %s4737_s18  ;;  %v2901_v42 = vsel %vm2652_vm15, %v2900_v58, %v2896_v34  ;;  %v2847_v58 = vrot.slane %v6321_v48, %v6273_v38  ;;  %v2790_v7 = vsel %vm2687_vm3, %v2789_v18, %v6324_v41  ;;  %v2915_v48 = vrot.slane %v6326_v19, %v6273_v38 }
0x18c8   :  { %v6368_v3 = vpop.xlane.xlu1 %2136  ;;  %v2906_v47 = vsel %vm2659_vm1, %v2905_v55, %v2901_v42  ;;  %4110 = vmatpush3.bf16.msra.mxu0 %v4107_v59  ;;  %v2877_v41 = vsel %vm2666_vm14, %v2876_v4, %v2872_v24 }
0x18c9   :  { %v2911_v12 = vsel %vm2666_vm14, %v2910_v23, %v2906_v47  ;;  %v2848_v1 = vsel %vm2673_vm0, %v2847_v58, %v2843_v45  ;;  %v2891_v25 = vrot.slane %v6368_v3, %v6360_v36  ;;  %v3000_v47 = vrot.slane %v6332_v60, %v6077_v6 }
0x18ca   :  { %v2011_v8 = vpop.xlane.xlu0 %2010  ;;  %v2853_v49 = vsel %vm2680_vm12, %v2852_v29, %v2848_v1 }
0x18cb   :  { %v2686_v43 = vrot.slane %v2011_v8, %v6360_v36  ;;  %1311 = vrot.lane.b32.xlu0 %v6901_v57, %s4737_s18  ;;  %v2881_v8 = vrot.slane %v6317_v30, %v6273_v38  ;;  %v2819_v30 = vsel %vm2680_vm12, %v2818_v44, %v2814_v53 }
0x18cc   :  { %v6397_v10 = vpop.xlane.xlu1 %2157 }
0x18cd   :  { %v2688_v28 = vsel %vm2687_vm3, %v2686_v43, %v6304_v56  ;;  %v2882_v15 = vsel %vm2673_vm0, %v2881_v8, %v2877_v41  ;;  %v2925_v32 = vrot.slane %v6397_v10, %v6360_v36  ;;  %v3034_v8 = vrot.slane %v6338_v40, %v6077_v6 }
0x18ce   :  { %v2927_v22 = vsel %vm381_vm2, %v2722_v33, %v2688_v28  ;;  %v2053_v35 = vpop.xlane.xlu0 %2052  ;;  %v2886_v33 = vrot.slane %v6267_v63, %v6276_v54  ;;  %v2916_v28 = vsel %vm2673_vm0, %v2915_v48, %v2911_v12 }
0x18cf   :  { %v2755_v56 = vrot.slane %v2053_v35, %v6360_v36  ;;  %v2921_v59 = vsel %vm2680_vm12, %v2920_v9, %v2916_v28  ;;  %v3204_v9 = vrot.slane %v6362_v13, %v6077_v6 }
0x18d0   :  { %v6418_v2 = vpop.xlane.xlu1 %2445  ;;  %v2887_v3 = vsel %vm2680_vm12, %v2886_v33, %v2882_v15  ;;  %v2926_v42 = vsel %vm2687_vm3, %v2925_v32, %v2921_v59 }
0x18d1   :  { %v2756_v34 = vsel %vm2687_vm3, %v2755_v56, %v2751_v16  ;;  %v2892_v63 = vsel %vm2687_vm3, %v2891_v25, %v2887_v3 }
0x18d2   :  { %v2929_v27 = vsel %vm2928_vm9, %v2756_v34, %v2927_v22  ;;  %v2095_v17 = vpop.xlane.xlu0 %2094 }
0x18d3   :  { %v2931_v43 = vsel %vm2930_vm10, %v2790_v7, %v2929_v27  ;;  %v2823_v55 = vrot.slane %v2095_v17, %v6360_v36  ;;  %v3043_v7 = vrot.slane %v6418_v2, %v6248_v14 }
0x18d4   :  { %v6441_v0 = vpop.xlane.xlu1 %2508 }
0x18d5   :  { %v2824_v19 = vsel %vm2687_vm3, %v2823_v55, %v2819_v30  ;;  %v3102_v30 = vrot.slane %v6328_v21, %v6077_v6  ;;  %v3145_v32 = vrot.slane %v6441_v0, %v6248_v14  ;;  %v3238_v0 = vrot.slane %v6342_v26, %v6077_v6 }
0x18d6   :  { %v2933_v31 = vsel %vm2932_vm7, %v2824_v19, %v2931_v43  ;;  %v2116_v39 = vpop.xlane.xlu0 %2115  ;;  %v3068_v43 = vrot.slane %v6346_v46, %v6077_v6  ;;  %v3170_v46 = vrot.slane %v6353_v37, %v6077_v6 }
0x18d7   :  { %v2857_v51 = vrot.slane %v2116_v39, %v6360_v36  ;;  %v3136_v39 = vrot.slane %v6334_v20, %v6077_v6 }
0x18d8   :  { %v2530_v18 = vpop.xlane.xlu1 %2529 }
0x18d9   :  { %v2858_v22 = vsel %vm2687_vm3, %v2857_v51, %v2853_v49  ;;  %v3179_v25 = vrot.slane %v2530_v18, %v6248_v14 }
0x18da   :  { %v2425_v35 = vpop.xlane.xlu0 %2424  ;;  %v2935_v10 = vsel %vm2934_vm8, %v2858_v22, %v2933_v31 }
0x18db   :  { %v2937_v62 = vsel %vm2936_vm5, %v2892_v63, %v2935_v10  ;;  %v3009_v16 = vrot.slane %v2425_v35, %v6248_v14 }
0x18dc   :  { %v2572_v52 = vpop.xlane.xlu1 %2571  ;;  %v6470_v23 = vsel %vm2938_vm6, %v2926_v42, %v2937_v62 }
0x18dd   :  { %v3277_v58 = vsel %vm1989_vm13, %v6470_v23, -inf  ;;  %v3247_v59 = vrot.slane %v2572_v52, %v6248_v14 }
0x18de   :  { %v2467_v56 = vpop.xlane.xlu0 %2466 }
0x18df   :  { %v3077_v45 = vrot.slane %v2467_v56, %v6248_v14 }
0x18e0   :  { %v2422_v11 = vpop.xlane.xlu1 %2421 }
0x18e1   :  { %v3004_v5 = vrot.slane %v2422_v11, %v6073_v50 }
0x18e2   :  { %v2488_v24 = vpop.xlane.xlu0 %2487 }
0x18e3   :  { %v3005_v53 = vsel %vm2652_vm15, %v3004_v5, %v3000_v47  ;;  %v3111_v12 = vrot.slane %v2488_v24, %v6248_v14 }
0x18e4   :  { %v2443_v34 = vpop.xlane.xlu1 %2442  ;;  %3278 = vmax.xlane.f32.xlu1 %v3277_v58  ;;  %v6480_v44 = vsel %vm2659_vm1, %v3009_v16, %v3005_v53 }
0x18e5   :  { %v3038_v60 = vrot.slane %v2443_v34, %v6073_v50 }
0x18e6   :  { %v2551_v27 = vpop.xlane.xlu0 %2550 }
0x18e7   :  { %v3039_v17 = vsel %vm2652_vm15, %v3038_v60, %v3034_v8  ;;  %v3213_v20 = vrot.slane %v2551_v27, %v6248_v14 }
0x18e8   :  { %v2464_v4 = vpop.xlane.xlu1 %2463  ;;  %v6489_v48 = vsel %vm2659_vm1, %v3043_v7, %v3039_v17 }
0x18e9   :  { %v3072_v55 = vrot.slane %v2464_v4, %v6073_v50 }
0x18ea   :  { %v2485_v40 = vpop.xlane.xlu0 %2484 }
0x18eb   :  { %v3106_v2 = vrot.slane %v2485_v40, %v6073_v50  ;;  %v3073_v41 = vsel %vm2652_vm15, %v3072_v55, %v3068_v43  ;;  %v6902_v40 = vld [vmem:[#allocation39_spill] sm:$0xff] }
0x18ec   :  { %v2527_v1 = vpop.xlane.xlu1 %2526  ;;  %v6501_v19 = vsel %vm2659_vm1, %v3077_v45, %v3073_v41 }
0x18ed   :  { %v3107_v29 = vsel %vm2652_vm15, %v3106_v2, %v3102_v30  ;;  %v3174_v15 = vrot.slane %v2527_v1, %v6073_v50  ;;  %v3764_v30 = vmul.f32 -1.442695, %v6902_v40 }
0x18ee   :  { %v2506_v21 = vpop.xlane.xlu0 %2505  ;;  %v3112_v31 = vsel %vm2659_vm1, %v3111_v12, %v3107_v29 }
0x18ef   :  { %v3140_v33 = vrot.slane %v2506_v21, %v6073_v50  ;;  %v3175_v28 = vsel %vm2652_vm15, %v3174_v15, %v3170_v46  ;;  %4495 = vpow2.f32 %v3764_v30 }
0x18f0   :  { %v2548_v37 = vpop.xlane.xlu1 %2547  ;;  %v6516_v51 = vsel %vm2659_vm1, %v3179_v25, %v3175_v28 }
0x18f1   :  { %v3141_v49 = vsel %vm2652_vm15, %v3140_v33, %v3136_v39  ;;  %v3208_v18 = vrot.slane %v2548_v37, %v6073_v50 }
0x18f2   :  { %v2569_v3 = vpop.xlane.xlu0 %2568  ;;  %v6524_v22 = vsel %vm2659_vm1, %v3145_v32, %v3141_v49 }
0x18f3   :  { %v3242_v63 = vrot.slane %v2569_v3, %v6073_v50  ;;  %v3209_v35 = vsel %vm2652_vm15, %v3208_v18, %v3204_v9 }
0x18f4   :  { %v2431_v13 = vpop.xlane.xlu1 %2430  ;;  %v6532_v10 = vsel %vm2659_vm1, %v3213_v20, %v3209_v35 }
0x18f5   :  { %v3243_v42 = vsel %vm2652_vm15, %v3242_v63, %v3238_v0  ;;  %v3019_v46 = vrot.slane %v2431_v13, %v6273_v38 }
0x18f6   :  { %v2452_v62 = vpop.xlane.xlu0 %2451  ;;  %v6536_v56 = vsel %vm2659_vm1, %v3247_v59, %v3243_v42 }
0x18f7   :  { %v3053_v39 = vrot.slane %v2452_v62, %v6273_v38 }
0x18f8   :  { %v6538_v11 = vpop.xlane.xlu1 %2472 }
0x18f9   :  { %v3087_v35 = vrot.slane %v6538_v11, %v6273_v38 }
0x18fa   :  { %v6540_v47 = vpop.xlane.xlu0 %2514 }
0x18fc   :  { %v2494_v6 = vpop.xlane.xlu1 %2493 }
0x18fd   :  { %v3121_v37 = vrot.slane %v2494_v6, %v6273_v38 }
0x18fe   :  { %v6542_v50 = vpop.xlane.xlu0 %2556 }
0x1900   :  { %v6544_v26 = vpop.xlane.xlu1 %2535 }
0x1902   :  { %v6546_v14 = vpop.xlane.xlu0 %2577 }
0x1904   :  { %v2449_v52 = vpop.xlane.xlu1 %2448 }
0x1905   :  { %v3048_v2 = vrot.slane %v2449_v52, %v6264_v61 }
0x1906   :  { %v2428_v5 = vpop.xlane.xlu0 %2427 }
0x1907   :  { %v3014_v55 = vrot.slane %v2428_v5, %v6264_v61  ;;  %v3049_v15 = vsel %vm2666_vm14, %v3048_v2, %v6489_v48 }
0x1908   :  { %v2470_v16 = vpop.xlane.xlu1 %2469  ;;  %v3054_v3 = vsel %vm2673_vm0, %v3053_v39, %v3049_v15 }
0x1909   :  { %v3015_v12 = vsel %vm2666_vm14, %v3014_v55, %v6480_v44  ;;  %v3082_v25 = vrot.slane %v2470_v16, %v6264_v61 }
0x190a   :  { %v2491_v24 = vpop.xlane.xlu0 %2490  ;;  %v3020_v32 = vsel %vm2673_vm0, %v3019_v46, %v3015_v12  ;;  %v4496_v12 = vpop.eup %4495 }
0x190b   :  { %v3116_v1 = vrot.slane %v2491_v24, %v6264_v61  ;;  %v3083_v59 = vsel %vm2666_vm14, %v3082_v25, %v6501_v19 }
0x190c   :  { %v2533_v53 = vpop.xlane.xlu1 %2532 }
0x190d   :  { %v3184_v33 = vrot.slane %v2533_v53, %v6264_v61  ;;  %v3117_v9 = vsel %vm2666_vm14, %v3116_v1, %v3112_v31  ;;  %v3189_v53 = vrot.slane %v6544_v26, %v6273_v38  ;;  %v3155_v26 = vrot.slane %v6540_v47, %v6273_v38 }
0x190e   :  { %v2512_v58 = vpop.xlane.xlu0 %2511  ;;  %v3122_v5 = vsel %vm2673_vm0, %v3121_v37, %v3117_v9  ;;  %v3223_v47 = vrot.slane %v6542_v50, %v6273_v38  ;;  %v3257_v50 = vrot.slane %v6546_v14, %v6273_v38 }
0x190f   :  { %v3150_v18 = vrot.slane %v2512_v58, %v6264_v61  ;;  %v3185_v42 = vsel %vm2666_vm14, %v3184_v33, %v6516_v51 }
0x1910   :  { %v6548_v34 = vpop.xlane.xlu1 %2574  ;;  %v3190_v2 = vsel %vm2673_vm0, %v3189_v53, %v3185_v42 }
0x1911   :  { %v3151_v51 = vsel %vm2666_vm14, %v3150_v18, %v6524_v22 }
0x1912   :  { %v2554_v8 = vpop.xlane.xlu0 %2553  ;;  %v3156_v15 = vsel %vm2673_vm0, %v3155_v26, %v3151_v51 }
0x1913   :  { %v3218_v62 = vrot.slane %v2554_v8, %v6264_v61  ;;  %v3088_v8 = vsel %vm2673_vm0, %v3087_v35, %v3083_v59  ;;  %v1436_v59 = vadd.f32 1.0, %v4496_v12 }
0x1914   :  { %v2458_v60 = vpop.xlane.xlu1 %2457 }
0x1915   :  { %v3063_v20 = vrot.slane %v2458_v60, %v6360_v36  ;;  %v3219_v22 = vsel %vm2666_vm14, %v3218_v62, %v6532_v10 }
0x1916   :  { %v2437_v7 = vpop.xlane.xlu0 %2436 }
0x1917   :  { %v3029_v28 = vrot.slane %v2437_v7, %v6360_v36  ;;  %v3252_v7 = vrot.slane %v6548_v34, %v6264_v61 }
0x1918   :  { %v2500_v27 = vpop.xlane.xlu1 %2499 }
0x1919   :  { %v3131_v16 = vrot.slane %v2500_v27, %v6360_v36 }
0x191a   :  { %v2479_v17 = vpop.xlane.xlu0 %2478 }
0x191b   :  { %v3097_v58 = vrot.slane %v2479_v17, %v6360_v36 }
0x191c   :  { %v6550_v4 = vpop.xlane.xlu1 %2562 }
0x191e   :  { %v6552_v43 = vpop.xlane.xlu0 %2520 }
0x191f   :  { %v3165_v10 = vrot.slane %v6552_v43, %v6360_v36  ;;  %v3233_v43 = vrot.slane %v6550_v4, %v6360_v36 }
0x1920   :  { %v6555_v45 = vpop.xlane.xlu1 %2583 }
0x1922   :  { %v6559_v41 = vpop.xlane.xlu0 %2541 }
0x1923   :  { %v3199_v61 = vrot.slane %v6559_v41, %v6360_v36  ;;  %v3253_v41 = vsel %vm2666_vm14, %v3252_v7, %v6536_v56 }
0x1924   :  { %v2434_v29 = vpop.xlane.xlu1 %2433 }
0x1925   :  { %v3024_v21 = vrot.slane %v2434_v29, %v6276_v54 }
0x1926   :  { %v2455_v44 = vpop.xlane.xlu0 %2454 }
0x1927   :  { %v3058_v49 = vrot.slane %v2455_v44, %v6276_v54  ;;  %v3025_v48 = vsel %vm2680_vm12, %v3024_v21, %v3020_v32  ;;  %v3224_v32 = vsel %vm2673_vm0, %v3223_v47, %v3219_v22  ;;  %v6912_v47 = vmov 0.0  }
0x1928   :  { %v3030_v0 = vsel %vm2687_vm3, %v3029_v28, %v3025_v48  ;;  %v2497_v63 = vpop.xlane.xlu1 %2496  ;;  %v3258_v48 = vsel %vm2673_vm0, %v3257_v50, %v3253_v41  ;;  %vm6904_vm0 = vcmask 256002   ;;  %v3383_v50 = vld [vmem:[%s6787_s1 + $0x40] sm:$0xff] }
0x1929   :  { %v3059_v31 = vsel %vm2680_vm12, %v3058_v49, %v3054_v3  ;;  %v3126_v13 = vrot.slane %v2497_v63, %v6276_v54  ;;  %v3267_v49 = vrot.slane %v6555_v45, %v6360_v36  ;;  %v6903_v63 = vld [vmem:[#allocation37_spill] sm:$0xff] }
0x192a   :  { %v3064_v6 = vsel %vm2687_vm3, %v3063_v20, %v3059_v31  ;;  %v2476_v52 = vpop.xlane.xlu0 %2475  ;;  %v3765_v35 = vmul.f32 -1.442695, %v6903_v63  ;;  %v4532_v63 = vld [vmem:[%s6795_s9] ss:$0 sm:$0xff] }
0x192b   :  { %v3269_v11 = vsel %vm381_vm2, %v3064_v6, %v3030_v0  ;;  %v3092_v19 = vrot.slane %v2476_v52, %v6276_v54  ;;  %v3127_v24 = vsel %vm2680_vm12, %v3126_v13, %v3122_v5  ;;  %vm6905_vm2 = vcmask 254977  }
0x192c   :  { %v2539_v60 = vpop.xlane.xlu1 %2538  ;;  %v3132_v55 = vsel %vm2687_vm3, %v3131_v16, %v3127_v24  ;;  %4497 = vpow2.f32 %v3765_v35 }
0x192d   :  { %v3093_v27 = vsel %vm2680_vm12, %v3092_v19, %v3088_v8  ;;  %v3194_v40 = vrot.slane %v2539_v60, %v6276_v54  ;;  %4499 = vrcp.f32 %v1436_v59  ;;  %v4739_v8 = vmov 0.0|0.0  }
0x192e   :  { %v3098_v17 = vsel %vm2687_vm3, %v3097_v58, %v3093_v27  ;;  %v2518_v30 = vpop.xlane.xlu0 %2517  ;;  %4085 = vmatprep.subr.bf16.mxu1 %v4739_v8 }
0x192f   :  { %v3270_v34 = vsel %vm2928_vm9, %v3098_v17, %v3269_v11  ;;  %v3160_v1 = vrot.slane %v2518_v30, %v6276_v54  ;;  %v3195_v46 = vsel %vm2680_vm12, %v3194_v40, %v3190_v2  ;;  %v3299_v17 = vld [vmem:[%s6787_s1] sm:$0xff]  ;;  %v3300_v30 = vld [vmem:[%s6787_s1 + $0x8] sm:$0xff]  ;;  %v3301_v2 = vld [vmem:[%s6787_s1 + $0x10] sm:$0xff] }
0x1930   :  { %v3271_v29 = vsel %vm2930_vm10, %v3132_v55, %v3270_v34  ;;  %v2560_v25 = vpop.xlane.xlu1 %2559  ;;  %v3200_v39 = vsel %vm2687_vm3, %v3199_v61, %v3195_v46  ;;  %v4086_v12 = vpack.c.bf16 %v3300_v30, %v3299_v17  ;;  %v3303_v34 = vld [vmem:[%s6787_s1 + $0x20] sm:$0xff]  ;;  %vm6913_vm10 = vcmask 1040384  }
0x1931   :  { %v3161_v21 = vsel %vm2680_vm12, %v3160_v1, %v3156_v15  ;;  %v3228_v33 = vrot.slane %v2560_v25, %v6276_v54  ;;  %v3304_v1 = vld [vmem:[%s6787_s1 + $0x28] sm:$0xff] }
0x1932   :  { %v3166_v28 = vsel %vm2687_vm3, %v3165_v10, %v3161_v21  ;;  %v2581_v44 = vpop.xlane.xlu0 %2580  ;;  %4087 = vmatpush3.bf16.msra.mxu1 %v4086_v12  ;;  %v4092_v46 = vpack.c.bf16 %v3304_v1, %v3303_v34  ;;  %v3305_v10 = vld [vmem:[%s6787_s1 + $0x30] sm:$0x1] }
0x1933   :  { %v3262_v37 = vrot.slane %v2581_v44, %v6276_v54  ;;  %v3229_v56 = vsel %vm2680_vm12, %v3228_v33, %v3224_v32  ;;  %v3272_v9 = vsel %vm2932_vm7, %v3166_v28, %v3271_v29  ;;  %vm6909_vm7 = vcmask 259077   ;;  %4088 = vmatprep.subr.bf16.mxu1 %v4739_v8  ;;  %v3382_v33 = vld [vmem:[%s6787_s1 + $0x38] sm:$0xff]  ;;  %v3384_v32 = vld [vmem:[%s6787_s1 + $0x48] sm:$0xff] }
0x1934   :  { %v369_v38 = vpop.permute.xlu1 %368  ;;  %v3234_v14 = vsel %vm2687_vm3, %v3233_v43, %v3229_v56  ;;  %v3273_v4 = vsel %vm2934_vm8, %v3200_v39, %v3272_v9  ;;  %vm6910_vm8 = vcmask 261120   ;;  %v4095_v28 = vpack.c.bf16 %v3383_v50, %v3382_v33 }
0x1935   :  { %v3263_v18 = vsel %vm2680_vm12, %v3262_v37, %v3258_v48  ;;  %373 = vst.msk [vmem:[#allocation3 + $0x8] sm:$0x1] %vm361_vm4, %v369_v38  ;;  %v3274_v54 = vsel %vm2936_vm5, %v3234_v14, %v3273_v4  ;;  %vm6907_vm5 = vcmask 257027   ;;  %vm6911_vm9 = vmmov %vm6910_vm8  ;;  %v3385_v37 = vld [vmem:[%s6787_s1 + $0x50] sm:$0xff]  ;;  %v3387_v48 = vld [vmem:[%s6787_s1 + $0x60] sm:$0xff] }
0x1936   :  { %v1310_v20 = vpop.permute.xlu0 %1309  ;;  %v3268_v3 = vsel %vm2687_vm3, %v3267_v49, %v3263_v18  ;;  %vm6906_vm3 = vcmask 258052   ;;  %v4498_v16 = vpop.eup %4497  ;;  %v4098_v9 = vpack.c.bf16 %v3385_v37, %v3384_v32  ;;  %v3386_v49 = vld [vmem:[%s6787_s1 + $0x58] sm:$0xff]  ;;  %v3388_v14 = vld [vmem:[%s6787_s1 + $0x68] sm:$0x1]  ;;  %vm6915_vm12 = vmmov %vm6913_vm10 }
0x1937   :  { %1315 = vst.msk [vmem:[#allocation3] sm:$0x80] %vm1304_vm11, %v1310_v20  ;;  %1328 = vst.msk [vmem:[#allocation16 - $0x5] sm:$0x80] %vm1304_vm11, %v1310_v20  ;;  %v6650_v36 = vsel %vm2938_vm6, %v3268_v3, %v3274_v54  ;;  %vm6908_vm6 = vcmask 260102   ;;  %v4500_v11 = vpop.eup %4499  ;;  %v1437_v24 = vadd.f32 1.0, %v4498_v16  ;;  %v4101_v38 = vpack.c.bf16 %v3387_v48, %v3386_v49 }
0x1938   :  { %v3280_v45 = vsel %vm1989_vm13, %v6650_v36, -inf  ;;  %v637_v0 = vpop.permute.xlu1 %636  ;;  %v6916_v18 = vld [vmem:[#allocation35_spill] sm:$0xff]  ;;  %v6917_v3 = vld [vmem:[#allocation36_spill] sm:$0xff] }
0x1939   :  { %3281 = vmax.xlane.f32.xlu0 %v3280_v45  ;;  %641 = vst.msk [vmem:[#allocation3 + $0x8] sm:$0x4] %vm6904_vm0, %v637_v0 }
0x193a   :  { %v503_v31 = vpop.permute.xlu0 %502 }
0x193b   :  { %507 = vst.msk [vmem:[#allocation3 + $0x8] sm:$0x2] %vm6905_vm2, %v503_v31 }
0x193c   :  { %v907_v13 = vpop.permute.xlu1 %906 }
0x193d   :  { %911 = vst.msk [vmem:[#allocation3 + $0x8] sm:$0x10] %vm6906_vm3, %v907_v13 }
0x193e   :  { %v772_v42 = vpop.permute.xlu0 %771  ;;  %v1332_v62 = vld [vmem:[#allocation3] sm:$0xff] }
0x193f   :  { %776 = vst.msk [vmem:[#allocation3 + $0x8] sm:$0x8] %vm6907_vm5, %v772_v42  ;;  %4501 = vtanh.f32 %v1332_v62  ;;  %v1323_v42 = vrot.slane %v6901_v57, 7  ;;  %v6918_v62 = vld [vmem:[#allocation33_spill] sm:$0xff]  ;;  %v3594_v57 = vld [vmem:[#allocation13 + $0x10] sm:$0xff] }
0x1940   :  { %v1177_v6 = vpop.permute.xlu1 %1176  ;;  %4503 = vrcp.f32 %v1437_v24  ;;  %v3593_v24 = vld [vmem:[#allocation13 + $0x8] sm:$0xff] }
0x1941   :  { %1181 = vst.msk [vmem:[#allocation3 + $0x8] sm:$0x40] %vm6908_vm6, %v1177_v6  ;;  %v1317_v6 = vrot.slane %v6918_v62, 7 }
0x1942   :  { %v1042_v52 = vpop.permute.xlu0 %1041 }
0x1943   :  { %1046 = vst.msk [vmem:[#allocation3 + $0x8] sm:$0x20] %vm6909_vm7, %v1042_v52 }
0x1946   :  { %v1312_v5 = vpop.permute.xlu0 %1311 }
0x1947   :  { %1316 = vst.msk [vmem:[#allocation3 + $0x8] sm:$0x80] %vm1304_vm11, %v1312_v5  ;;  %vm6914_vm11 = vmmov 0  }
0x1949   :  { %v4502_v19 = vpop.eup %4501 }
0x194a   :  { %v6662_v53 = vmul.f32 %v4502_v19, %v4500_v11  ;;  %v4504_v58 = vpop.eup %4503  ;;  %v3592_v19 = vld [vmem:[#allocation13] sm:$0xff] }
0x194c   :  { %4031 = vmatprep.mubr.msk.f32.mxu0 %vm6910_vm8, %v6662_v53 }
0x194e   :  { %v1333_v51 = vld [vmem:[#allocation3 + $0x8] sm:$0xff] }
0x194f   :  { %4505 = vtanh.f32 %v1333_v51  ;;  %v4111_v51 = vpack.c.bf16 %v3593_v24, %v3592_v19 }
0x1959   :  { %v4506_v60 = vpop.eup %4505 }
0x195a   :  { %v6666_v7 = vmul.f32 %v4506_v60, %v4504_v58  ;;  %v3595_v58 = vld [vmem:[#allocation13 + $0x18] sm:$0xff] }
0x195c   :  { %4032 = vmatmul.mubr.msk.f32.vlgmr.msra.gmra.mrb[32].mxu0 %vm6911_vm9, %v6666_v7 }
0x1971   :  { %v6670_v27 = vpop.xlane.xlu1 %3278 }
0x1972   :  { %v3283_v55 = vsub.f32 %v6470_v23, %v6670_v27  ;;  %v3302_v23 = vld [vmem:[%s6787_s1 + $0x18] sm:$0xff]  ;;  %s4740_s1 = smov [#allocation16]  }
0x1973   :  { %v4089_v61 = vpack.c.bf16 %v3302_v23, %v3301_v2  ;;  %s3715_s9 = sshll.u32 %s4740_s1, 4  ;;  %s3716_s9 = int_to_ptr.vmem [resolvable:$true] %s3715_s9 }
0x1974   :  { %v3285_v40 = vmul.f32 1.442695, %v3283_v55  ;;  %p4672_p7 = scmp.lt.s32.totalorder %s3716_s9, %s3716_s9 }
0x1975   :  { %4090 = vmatpush3.bf16.msra.mxu1 %v4089_v61 }
0x1976   :  { %4507 = vpow2.f32 %v3285_v40  ;;  %4091 = vmatprep.subr.bf16.mxu1 %v4739_v8 }
0x1979   :  { %4093 = vmatpush3.bf16.msra.mxu1 %v4092_v46 }
0x197a   :  { %4001 = vmatprep.subr.mxu1 %v6912_v47 }
0x197d   :  { %4002 = vmatpush3.msk.msra.mxu1 %vm6913_vm10, %v3305_v10 }
0x197e   :  { %4094 = vmatprep.subr.bf16.mxu1 %v4739_v8 }
0x1980   :  { %v4508_v26 = vpop.eup %4507 }
0x1981   :  { %v3289_v22 = vsel %vm1989_vm13, %v4508_v26, 0.0 }
0x1982   :  { %3290 = vadd.xlane.f32.xlu0 %v3289_v22 }
0x19c6   :  { %v6698_v29 = vpop.xlane.xlu0 %3281 }
0x19c7   :  { %v3284_v15 = vsub.f32 %v6650_v36, %v6698_v29 }
0x19c9   :  { %v3287_v25 = vmul.f32 1.442695, %v3284_v15 }
0x19cb   :  { %4509 = vpow2.f32 %v3287_v25 }
0x19d5   :  { %v4510_v41 = vpop.eup %4509 }
0x19d6   :  { %v3292_v21 = vsel %vm1989_vm13, %v4510_v41, 0.0 }
0x19d7   :  { %3293 = vadd.xlane.f32.xlu1 %v3292_v21 }
0x1a0f   :  { %v6703_v39 = vpop.xlane.xlu0 %3290 }
0x1a10   :  { %4511 = vrcp.f32 %v6703_v39 }
0x1a1a   :  { %v4512_v43 = vpop.eup %4511 }
0x1a1b   :  { %v3296_v44 = vmul.f32 %v4512_v43, %v4508_v26 }
0x1a1d   :  { %4004 = vmatmul.mubr.msk.f32.vlgmr.msra.gmra.mrb[22].mxu1 %vm1989_vm13, %v3296_v44  ;;  %v3687_v56 = vsel %vm1989_vm13, %v3296_v44, 0.0 }
0x1a1e   :  { %3693 = vst [vmem:[#allocation15 + $0x8] sm:$0xff] %v3687_v56  ;;  %4096 = vmatpush3.bf16.msra.mxu1 %v4095_v28  ;;  %4020 = vmatprep.mubr.msk.f32.mxu1 %vm6914_vm11, %v6912_v47 }
0x1a1f   :  { %4097 = vmatprep.subr.bf16.mxu1 %v4739_v8 }
0x1a22   :  { %4099 = vmatpush3.bf16.msra.mxu1 %v4098_v9 }
0x1a23   :  { %4100 = vmatprep.subr.bf16.mxu1 %v4739_v8  ;;  %v4115_v8 = vpack.c.bf16 %v3595_v58, %v3594_v57 }
0x1a26   :  { %4102 = vmatpush3.bf16.msra.mxu1 %v4101_v38  ;;  %v4533_v38 = vld [vmem:[#allocation2] sm:$0xff] }
0x1a27   :  { %4018 = vmatprep.subr.mxu1 %v6912_v47 }
0x1a2a   :  { %4019 = vmatpush3.msk.msra.mxu1 %vm6915_vm12, %v3388_v14 }
0x1a2b   :  { %4112 = vmatprep.subr.bf16.mxu1 %v4111_v51 }
0x1a2f   :  { %v4033_v4 = vpop.f32.mrb[32].mxu0 }
0x1a30   :  { %v3547_v54 = vadd.f32 %v4033_v4, %v6916_v18  ;;  %v3541_v20 = vpop.f32.mrb[33].mxu0 }
0x1a31   :  { %v3542_v36 = vadd.f32 %v3541_v20, %v6917_v3 }
0x1a32   :  { %4513 = vtanh.f32 %v3547_v54 }
0x1a33   :  { %4515 = vtanh.f32 %v3542_v36 }
0x1a3c   :  { %v4514_v45 = vpop.eup %4513 }
0x1a3d   :  { %v4516_v0 = vpop.eup %4515  ;;  %v3553_v35 = vmul.f32 %v4532_v63, %v4514_v45  ;;  %v4534_v45 = vld [vmem:[#allocation2 + $0x8] sm:$0xff] }
0x1a3e   :  { %v3552_v59 = vmul.f32 %v4532_v63, %v4516_v0 }
0x1a3f   :  { %v3557_v31 = vsel %vm1989_vm13, %v3553_v35, 0.0 }
0x1a40   :  { %3558 = vadd.xlane.f32.xlu1 %v3557_v31  ;;  %v3554_v13 = vsel %vm1989_vm13, %v3552_v59, 0.0 }
0x1a41   :  { %3555 = vadd.xlane.f32.xlu0 %v3554_v13 }
0x1a51   :  { %1324 = vrot.lane.b32.xlu1 %v1323_v42, %s4737_s18  ;;  %s4667_s18 = scalar_lea.vmem %s3716_s9, 64 }
0x1a52   :  { %p4668_p6 = scmp.ne.s32.totalorder %s3716_s9, %s4667_s18  ;;  %p4673_p8 = scmp.lt.s32.totalorder %s4667_s18, %s4667_s18 }
0x1a54   :  { %p4674_p9 = por %p4673_p8, %p4672_p7 }
0x1a56   :  { %p4675_p10 = pnand %p4674_p9, %p4668_p6 }
0x1a57   :  { %1318 = vrot.lane.b32.xlu0 %v1317_v6, %s4736_s4 }
0x1a64   :  { %v3294_v52 = vpop.xlane.xlu1 %3293 }
0x1a65   :  { %4517 = vrcp.f32 %v3294_v52 }
0x1a6f   :  { %v4518_v5 = vpop.eup %4517 }
0x1a70   :  { %v3298_v16 = vmul.f32 %v4518_v5, %v4510_v41 }
0x1a72   :  { %4021 = vmatmul.mubr.msk.f32.vlgmr.msra.gmra.mrb[24].mxu1 %vm1989_vm13, %v3298_v16  ;;  %v3688_v11 = vsel %vm1989_vm13, %v3298_v16, 0.0  ;;  %vm3689_vm13 = vcmask 7168  }
0x1a73   :  { %3696 = vst [vmem:[#allocation15 + $0x20] sm:$0xff] %v3688_v11  ;;  %4114 = vmatpush3.bf16.msra.mxu1 %v4111_v51 }
0x1a74   :  { %4116 = vmatprep.subr.bf16.mxu1 %v4115_v8 }
0x1a77   :  { %4118 = vmatpush3.bf16.msra.mxu1 %v4115_v8 }
0x1acd   :  { %v3559_v60 = vpop.xlane.xlu1 %3558 }
0x1ace   :  { %v3561_v55 = vmax.f32 %v6698_v29, %v3559_v60  ;;  %v3556_v40 = vpop.xlane.xlu0 %3555 }
0x1acf   :  { %v3560_v26 = vmax.f32 %v6670_v27, %v3556_v40 }
0x1ad0   :  { %v3563_v22 = vsub.f32 %v3559_v60, %v3561_v55  ;;  %v3569_v17 = vsub.f32 %v6698_v29, %v3561_v55 }
0x1ad1   :  { %v3562_v30 = vsub.f32 %v3556_v40, %v3560_v26  ;;  %v3568_v2 = vsub.f32 %v6670_v27, %v3560_v26  ;;  %v1325_v12 = vpop.permute.xlu1 %1324 }
0x1ad2   :  { %v3566_v23 = vmul.f32 1.442695, %v3563_v22  ;;  %v3572_v61 = vmul.f32 1.442695, %v3569_v17  ;;  %1329 = vst.msk [vmem:[#allocation16 + $0x3] sm:$0x1] %vm361_vm4, %v1325_v12  ;;  %v1319_v34 = vpop.permute.xlu0 %1318 }
0x1ad3   :  { %v3570_v1 = vmul.f32 1.442695, %v3568_v2  ;;  %1322 = vst.msk [vmem:[#allocation16 + $0x1] sm:$0x1] %vm361_vm4, %v1319_v34  ;;  %v3564_v46 = vmul.f32 1.442695, %v3562_v30  ;;  %vm6919_vm4 = vmmov %vm6910_vm8 }
0x1ad4   :  { %4519 = vpow2.f32 %v3572_v61  ;;  %vm6920_vm15 = vmmov %vm6919_vm4 }
0x1ad5   :  { %4521 = vpow2.f32 %v3566_v23 }
0x1ad6   :  { %4523 = vpow2.f32 %v3570_v1 }
0x1ad7   :  { %4525 = vpow2.f32 %v3564_v46 }
0x1ade   :  { %v4520_v47 = vpop.eup %4519 }
0x1adf   :  { %v4522_v10 = vpop.eup %4521  ;;  %v3575_v29 = vmul.f32 %v4520_v47, %v3294_v52 }
0x1ae0   :  { %v4524_v15 = vpop.eup %4523 }
0x1ae1   :  { %v3577_v25 = vadd.f32 %v4522_v10, %v3575_v29  ;;  %v3574_v27 = vmul.f32 %v4524_v15, %v6703_v39  ;;  %v4526_v41 = vpop.eup %4525 }
0x1ae3   :  { %4527 = vrcp.f32 %v3577_v25  ;;  %v3576_v21 = vadd.f32 %v4526_v41, %v3574_v27 }
0x1ae5   :  { %4529 = vrcp.f32 %v3576_v21 }
0x1aed   :  { %v4528_v33 = vpop.eup %4527 }
0x1aee   :  { %v3581_v50 = vmul.f32 %v4528_v33, %v4522_v10 }
0x1aef   :  { %v4530_v43 = vpop.eup %4529 }
0x1af0   :  { %v3378_v28 = vpop.f32.mrb[22].mxu1  ;;  %v3579_v44 = vmul.f32 %v4530_v43, %v4526_v41  ;;  %v3691_v37 = vsel %vm3689_vm13, %v3581_v50, 0.0  ;;  %v3585_v4 = vsub.f32 1.0, %v3581_v50  ;;  %v3583_v54 = vmul.f32 %v3581_v50, %v6666_v7 }
0x1af1   :  { %v4005_v32 = vpop.f32.mrb[23].mxu1  ;;  %3697 = vst [vmem:[#allocation15 + $0x28] sm:$0xff] %v3691_v37 }
0x1af2   :  { %v3584_v56 = vsub.f32 1.0, %v3579_v44  ;;  %v3690_v9 = vsel %vm3689_vm13, %v3579_v44, 0.0  ;;  %v3582_v49 = vmul.f32 %v3579_v44, %v6662_v53 }
0x1af3   :  { %3694 = vst [vmem:[#allocation15 + $0x10] sm:$0xff] %v3690_v9 }
0x1af4   :  { %v3586_v48 = vmul.f32 %v3584_v56, %v3378_v28 }
0x1af6   :  { %v3588_v39 = vadd.f32 %v3586_v48, %v3582_v49 }
0x1af8   :  { %v3590_v14 = vadd.f32 %v4533_v38, %v3588_v39 }
0x1afa   :  { %4042 = vmatprep.mubr.msk.f32.mxu1 %vm6919_vm4, %v3590_v14 }
0x1b45   :  { %v3461_v18 = vpop.f32.mrb[24].mxu1 }
0x1b46   :  { %v3587_v20 = vmul.f32 %v3585_v4, %v3461_v18  ;;  %v4022_v3 = vpop.f32.mrb[25].mxu1 }
0x1b48   :  { %v3589_v36 = vadd.f32 %v3587_v20, %v3583_v54 }
0x1b4a   :  { %v3591_v0 = vadd.f32 %v4534_v45, %v3589_v36 }
0x1b4c   :  { %4043 = vmatmul.mubr.msk.f32.vlgmr.msra.gmra.mrb[26].mxu1 %vm6920_vm15, %v3591_v0 }
0x1b4d   :  { %4678 = shalt.err (!%p4675_p10)
}
0x1b4e   :  { %s4679_s27 = scalar_lea.hbm %s6799_s13, 64 }
0x1b4f   :  { %p4680_p11 = scmp.ne.s32.totalorder %s6799_s13, %s4679_s27  ;;  %p4683_p12 = scmp.lt.u32.totalorder %s4679_s27, %s6799_s13 }
0x1b51   :  { %p4685_p13 = pnand %p4683_p12, %p4680_p11 }
0x1b53   :  { %4688 = shalt.err (!%p4685_p13)
}
0x1b54   :  { %s4741_s30 = smov 2   ;;  %v3789_v53 = vld [vmem:[%s6797_s11] ss:$0 sm:$0xff]  ;;  %vm3684_vm1 = vcmask 326656   ;;  %s4742_s8 = smov [#allocation15]  }
0x1b55   :  { %3721 = dma.vmem_to_hbm [thread:$0]  %s3716_s9, 64, %s6799_s13, [#allocation17], %s4736_s4, %s4736_s4, %s4741_s30  }
0x1b56   :  { %s3703_s19 = sshll.u32 %s4742_s8, 4  ;;  %s3704_s19 = int_to_ptr.vmem [resolvable:$true] %s3703_s19 }
0x1b57   :  { %s4689_s15 = scalar_lea.vmem %s3704_s19, 768  ;;  %p4694_p1 = scmp.lt.s32.totalorder %s3704_s19, %s3704_s19 }
0x1b58   :  { %p4690_p0 = scmp.ne.s32.totalorder %s3704_s19, %s4689_s15  ;;  %p4695_p2 = scmp.lt.s32.totalorder %s4689_s15, %s4689_s15 }
0x1b5a   :  { %p4696_p3 = por %p4695_p2, %p4694_p1 }
0x1b5c   :  { %p4697_p4 = pnand %p4696_p3, %p4690_p0 }
0x1c1f   :  { %v4044_v7 = vpop.f32.mrb[26].mxu1 }
0x1c20   :  { %v3681_v63 = vadd.f32 %v4044_v7, %v3789_v53  ;;  %v3675_v35 = vpop.f32.mrb[27].mxu1 }
0x1c21   :  { %v3676_v59 = vadd.f32 %v3789_v53, %v3675_v35 }
0x1c22   :  { %v3686_v31 = vsel %vm3684_vm1, %v3681_v63, 0.0 }
0x1c23   :  { %3695 = vst [vmem:[#allocation15 + $0x18] sm:$0xff] %v3686_v31  ;;  %v3685_v13 = vsel %vm3684_vm1, %v3676_v59, 0.0 }
0x1c24   :  { %3692 = vst [vmem:[#allocation15] sm:$0xff] %v3685_v13 }
0x1c25   :  { %4700 = shalt.err (!%p4697_p4)
}
0x1c26   :  { %s4701_s4 = scalar_lea.hbm %s6798_s12, 768 }
0x1c27   :  { %p4702_p5 = scmp.ne.s32.totalorder %s6798_s12, %s4701_s4  ;;  %p4705_p6 = scmp.lt.u32.totalorder %s4701_s4, %s6798_s12 }
0x1c29   :  { %p4707_p7 = pnand %p4705_p6, %p4702_p5 }
0x1c2b   :  { %4710 = shalt.err (!%p4707_p7)
}
0x1c2c   :  { %s4743_s20 = smov 384   ;;  %s4744_s21 = smov 24  }
0x1c2d   :  { %3709 = dma.vmem_to_hbm [thread:$0]  %s3704_s19, 768, %s6798_s12, [#allocation6], %s4743_s20, %s4743_s20, %s4744_s21  }
0x1c2e   :  { %4719 = dma.done.wait [#allocation6], 768  }
0x1c2f   :  { %4720 = vsyncadd [#allocation6], 4294966528 }
0x1c30   :  { %4721 = dma.done.wait [#allocation17], 64  }
0x1c31   :  { %4722 = vsyncadd [#allocation17], 4294967232 }
0x1c32   :  { %3728 = vsyncpa [#allocation5], 1 }
0x1c33   :  { %3729 = vsyncpa [#allocation8], 1 }
0x1c34   :  { %3730 = vsyncpa [#allocation11], 1 }
0x1c35   :  { %3731 = vsyncpa [#allocation14], 1 }
0x1c36   :  { %3732 = vsyncpa [#allocation6], 1 }
0x1c37   :  { %3733 = vsyncpa [#allocation17], 1 }

</bundles_post_ra>
